<compile_context>
chip_gen: v7x
topology: tpu7x:2x2x1
jax: 0.10.0
libtpu: 0.0.40
codegen_flags: <defaults>
</compile_context>

<pallas_src>
import math

import numpy as np
import jax
import jax.numpy as jnp
from jax import lax
from jax.experimental import pallas as pl
from jax.experimental.pallas import tpu as pltpu

# ---------------- synthetic BERT config (small) ----------------
VOCAB = 64
MAX_POS = 16
TYPE_VOCAB = 2
HIDDEN = 32
N_HEADS = 2
HEAD_DIM = HIDDEN // N_HEADS
INTERMEDIATE = 64
N_LAYERS = 2
LN_EPS = 1e-12

BATCH = 2
SEQ = 8

# ---------------- token-code bit layout (one packed int32 per token) ----------
ID_BITS, TT_BITS, POS_BITS, BATCH_BITS = 15, 2, 9, 5
ID_MASK = (1 << ID_BITS) - 1
TT_SHIFT = ID_BITS
TT_MASK = (1 << TT_BITS) - 1
POS_SHIFT = TT_SHIFT + TT_BITS
POS_MASK = (1 << POS_BITS) - 1
BATCH_SHIFT = POS_SHIFT + POS_BITS          # bits 26..30 -> int32 stays positive


# ---------------- weight-slab layout: single [SLAB_ROWS, 128] f32 array -------
def _rup8(n):
    return ((n + 7) // 8) * 8


SLAB_LANES = 128
assert HIDDEN <= SLAB_LANES and INTERMEDIATE <= SLAB_LANES

EMB_ROWS = VOCAB + TYPE_VOCAB + MAX_POS     # combined word|type|position table
EMB_ROWS_P = _rup8(EMB_ROWS)
OFF_EMB = 0
OFF_EMB_LN = OFF_EMB + EMB_ROWS_P           # row 0: gamma, row 1: beta
LAYER0 = OFF_EMB_LN + 8

# per-layer relative offsets (all matrix blocks start at multiples of 8 rows)
REL_QKV = 0                                  # 3*N_HEADS blocks of [HIDDEN, HEAD_DIM]
REL_AO_W = REL_QKV + 3 * N_HEADS * HIDDEN
REL_I_W = REL_AO_W + HIDDEN
REL_O_W = REL_I_W + HIDDEN
REL_SMALL = REL_O_W + INTERMEDIATE
SM_AOB = 3 * N_HEADS                         # rows 0..3*N_HEADS-1: per-head q/k/v biases
SM_IB = SM_AOB + 1
SM_OB = SM_IB + 1
SM_LN1G, SM_LN1B, SM_LN2G, SM_LN2B = SM_OB + 1, SM_OB + 2, SM_OB + 3, SM_OB + 4
SMALL_ROWS = _rup8(SM_LN2B + 1)
LAYER_STRIDE = REL_SMALL + SMALL_ROWS
SLAB_ROWS = LAYER0 + N_LAYERS * LAYER_STRIDE


# ---------------- in-kernel math helpers (operate on values) ----------------
def _layernorm(x, gamma, beta):
    mean = jnp.mean(x, axis=-1, keepdims=True)
    xc = x - mean
    var = jnp.mean(xc * xc, axis=-1, keepdims=True)
    return xc * lax.rsqrt(var + LN_EPS) * gamma + beta


def _gelu_erf(x):
    # Exact erf-GELU (HF BERT default), erf via Abramowitz&Stegun 7.1.26:
    # |err(erf)| < 1.5e-7; uses only exp so it lowers on all TPU generations.
    z = x * 0.7071067811865476
    az = jnp.abs(z)
    t = 1.0 / (1.0 + 0.3275911 * az)
    poly = ((((1.061405429 * t - 1.453152027) * t + 1.421413741) * t
             - 0.284496736) * t + 0.254829592) * t
    erf_abs = 1.0 - poly * jnp.exp(-az * az)
    erf = jnp.where(z >= 0, erf_abs, -erf_abs)
    return 0.5 * x * (1.0 + erf)


# ---------------- the fused encoder kernel ----------------
def _make_encoder_kernel(nb, seq):
    """nb = total batch (all inputs_tuple entries stacked), seq = padded length."""
    M = nb * seq
    scale = 1.0 / math.sqrt(HEAD_DIM)
    f32 = jnp.float32

    def kernel(codes_ref, coltag_ref, w_ref, o_ref):
        def W(row, nrows, ncols):
            # static row/col offsets into the packed weight slab (lane start 0)
            return w_ref[pl.ds(row, nrows), pl.ds(0, ncols)]

        # ---- decode the packed per-token code word ----
        code = codes_ref[...]                                   # [M, 1] int32
        ids = code & ID_MASK
        tt = (code >> TT_SHIFT) & TT_MASK
        pos = (code >> POS_SHIFT) & POS_MASK
        row_tag = (code >> BATCH_SHIFT) + 1                     # [M, 1] batch id + 1

        # ---- word + type + position embeddings: ONE one-hot matmul ----
        col = lax.broadcasted_iota(jnp.int32, (M, EMB_ROWS_P), 1)
        hit = (((col == ids) & (ids < VOCAB))
               | ((col == tt + VOCAB) & (tt < TYPE_VOCAB))
               | ((col == pos + VOCAB + TYPE_VOCAB) & (pos < MAX_POS)))
        emb = jnp.dot(hit.astype(f32), W(OFF_EMB, EMB_ROWS_P, HIDDEN),
                      preferred_element_type=f32)               # [M, H]
        h = _layernorm(emb, W(OFF_EMB_LN, 1, HIDDEN), W(OFF_EMB_LN + 1, 1, HIDDEN))

        # ---- additive attention mask (batch isolation + key padding), hoisted ----
        attn_ok = coltag_ref[...] == row_tag                    # [1,M]==[M,1] -> [M,M]
        mask_add = jnp.where(attn_ok, f32(0.0), f32(-1e30))

        # ---- transformer layers: weights resident in VMEM, fully unrolled ----
        # TODO(synk): dropout omitted (stochastic; identity at eval time).
        for l in range(N_LAYERS):
            base = LAYER0 + l * LAYER_STRIDE
            sm = base + REL_SMALL

            ctx_heads = []
            for hd in range(N_HEADS):
                # per-head weights were split at pack time -> no lane-offset slices
                wq = W(base + REL_QKV + (0 * N_HEADS + hd) * HIDDEN, HIDDEN, HEAD_DIM)
                wk = W(base + REL_QKV + (1 * N_HEADS + hd) * HIDDEN, HIDDEN, HEAD_DIM)
                wv = W(base + REL_QKV + (2 * N_HEADS + hd) * HIDDEN, HIDDEN, HEAD_DIM)
                q_h = jnp.dot(h, wq, preferred_element_type=f32) + W(sm + 0 * N_HEADS + hd, 1, HEAD_DIM)
                k_h = jnp.dot(h, wk, preferred_element_type=f32) + W(sm + 1 * N_HEADS + hd, 1, HEAD_DIM)
                v_h = jnp.dot(h, wv, preferred_element_type=f32) + W(sm + 2 * N_HEADS + hd, 1, HEAD_DIM)

                s = lax.dot_general(q_h, k_h, (((1,), (1,)), ((), ())),
                                    preferred_element_type=f32) * scale + mask_add
                m = jnp.max(s, axis=-1, keepdims=True)
                p = jnp.exp(s - m)
                p = p * (1.0 / jnp.sum(p, axis=-1, keepdims=True))   # exact softmax
                ctx_heads.append(jnp.dot(p, v_h, preferred_element_type=f32))

            # fused attention-output projection: single [M,H] x [H,H] dot
            ctx = jnp.concatenate(ctx_heads, axis=-1)                # [M, H]
            attn_out = (jnp.dot(ctx, W(base + REL_AO_W, HIDDEN, HIDDEN),
                                preferred_element_type=f32)
                        + W(sm + SM_AOB, 1, HIDDEN))
            h1 = _layernorm(attn_out + h,
                            W(sm + SM_LN1G, 1, HIDDEN), W(sm + SM_LN1B, 1, HIDDEN))

            inter = _gelu_erf(jnp.dot(h1, W(base + REL_I_W, HIDDEN, INTERMEDIATE),
                                      preferred_element_type=f32)
                              + W(sm + SM_IB, 1, INTERMEDIATE))
            out = (jnp.dot(inter, W(base + REL_O_W, INTERMEDIATE, HIDDEN),
                           preferred_element_type=f32)
                   + W(sm + SM_OB, 1, HIDDEN))
            h = _layernorm(out + h1,
                           W(sm + SM_LN2G, 1, HIDDEN), W(sm + SM_LN2B, 1, HIDDEN))

        # ---- CLS pooling via one-hot selection matmul (rows 0, S, 2S, ...) ----
        cls_sel = (lax.broadcasted_iota(jnp.int32, (nb, M), 1)
                   == seq * lax.broadcasted_iota(jnp.int32, (nb, M), 0)).astype(f32)
        o_ref[...] = jnp.dot(cls_sel, h, preferred_element_type=f32)

    return kernel


# ---------------- wrapper: one pallas_call for the whole encoder ----------------
@jax.jit
def bert_encode(wslab, input_ids, token_type_ids, attention_mask):
    """Returns last_hidden_state[:, 0] (CLS embedding), shape [nb, HIDDEN]."""
    nb, seq = input_ids.shape
    M = nb * seq
    assert VOCAB <= ID_MASK + 1 and TYPE_VOCAB <= TT_MASK + 1
    assert seq <= POS_MASK + 1 and seq <= MAX_POS and nb <= (1 << BATCH_BITS)

    ids = input_ids.astype(jnp.int32)
    tt = token_type_ids.astype(jnp.int32)
    pos = jnp.arange(seq, dtype=jnp.int32)[None, :]
    bidx = jnp.arange(nb, dtype=jnp.int32)[:, None]
    codes = (ids | (tt << TT_SHIFT) | (pos << POS_SHIFT)
             | (bidx << BATCH_SHIFT)).reshape(M, 1)                  # [M, 1]
    col_tag = ((bidx + 1) * attention_mask.astype(jnp.int32)).reshape(1, M)  # [1, M]

    vmem = pl.BlockSpec(memory_space=pltpu.MemorySpace.VMEM)
    return pl.pallas_call(
        _make_encoder_kernel(nb, seq),
        out_shape=jax.ShapeDtypeStruct((nb, HIDDEN), jnp.float32),
        in_specs=[vmem, vmem, vmem],
        out_specs=vmem,
    )(codes, col_tag, wslab)


# ---------------- host-side weight packing into the single slab ----------------
def pack_params(params):
    slab = np.zeros((SLAB_ROWS, SLAB_LANES), np.float32)

    slab[OFF_EMB:OFF_EMB + VOCAB, :HIDDEN] = np.asarray(params["word_emb"])
    slab[OFF_EMB + VOCAB:OFF_EMB + VOCAB + TYPE_VOCAB, :HIDDEN] = np.asarray(params["type_emb"])
    slab[OFF_EMB + VOCAB + TYPE_VOCAB:OFF_EMB + EMB_ROWS, :HIDDEN] = np.asarray(params["pos_emb"])
    slab[OFF_EMB_LN, :HIDDEN] = np.asarray(params["emb_ln_g"]).reshape(-1)
    slab[OFF_EMB_LN + 1, :HIDDEN] = np.asarray(params["emb_ln_b"]).reshape(-1)

    for l, lp in enumerate(params["layers"]):
        base = LAYER0 + l * LAYER_STRIDE
        sm = base + REL_SMALL
        # per-head Q/K/V weight columns become their own row blocks
        for t, name in enumerate(("q_w", "k_w", "v_w")):
            w = np.asarray(lp[name])                          # [HIDDEN, HIDDEN]
            for hd in range(N_HEADS):
                r = base + REL_QKV + (t * N_HEADS + hd) * HIDDEN
                slab[r:r + HIDDEN, :HEAD_DIM] = w[:, hd * HEAD_DIM:(hd + 1) * HEAD_DIM]
        for t, name in enumerate(("q_b", "k_b", "v_b")):
            b = np.asarray(lp[name]).reshape(-1)
            for hd in range(N_HEADS):
                slab[sm + t * N_HEADS + hd, :HEAD_DIM] = b[hd * HEAD_DIM:(hd + 1) * HEAD_DIM]
        slab[base + REL_AO_W:base + REL_AO_W + HIDDEN, :HIDDEN] = np.asarray(lp["ao_w"])
        slab[base + REL_I_W:base + REL_I_W + HIDDEN, :INTERMEDIATE] = np.asarray(lp["i_w"])
        slab[base + REL_O_W:base + REL_O_W + INTERMEDIATE, :HIDDEN] = np.asarray(lp["o_w"])
        slab[sm + SM_AOB, :HIDDEN] = np.asarray(lp["ao_b"]).reshape(-1)
        slab[sm + SM_IB, :INTERMEDIATE] = np.asarray(lp["i_b"]).reshape(-1)
        slab[sm + SM_OB, :HIDDEN] = np.asarray(lp["o_b"]).reshape(-1)
        slab[sm + SM_LN1G, :HIDDEN] = np.asarray(lp["ln1_g"]).reshape(-1)
        slab[sm + SM_LN1B, :HIDDEN] = np.asarray(lp["ln1_b"]).reshape(-1)
        slab[sm + SM_LN2G, :HIDDEN] = np.asarray(lp["ln2_g"]).reshape(-1)
        slab[sm + SM_LN2B, :HIDDEN] = np.asarray(lp["ln2_b"]).reshape(-1)
    return jnp.asarray(slab)


def text_encoder_forward(params, inputs_tuple):
    """Mirrors TextEncoder.forward: list of CLS embeddings, one per inputs dict."""
    # TODO(synk): BertTokenizer (string->ids) and checkpoint loading have no
    # Pallas equivalent; this starts from already-tokenized integer tensors.
    wslab = pack_params(params)
    shapes = {tuple(d["input_ids"].shape) for d in inputs_tuple}
    if len(shapes) == 1:
        # Batch all tuple entries into ONE fused encoder call, split CLS after.
        ids = jnp.concatenate([d["input_ids"] for d in inputs_tuple], axis=0)
        tt = jnp.concatenate([d["token_type_ids"] for d in inputs_tuple], axis=0)
        mask = jnp.concatenate([d["attention_mask"] for d in inputs_tuple], axis=0)
        cls = bert_encode(wslab, ids, tt, mask)
        outs, off = [], 0
        for d in inputs_tuple:
            b = d["input_ids"].shape[0]
            outs.append(cls[off:off + b])
            off += b
        return outs
    # Fallback: entries with different padded lengths run individually.
    return [bert_encode(wslab, d["input_ids"], d["token_type_ids"], d["attention_mask"])
            for d in inputs_tuple]


# ---------------- deterministic parameter init ----------------
def init_params(key):
    scale = 0.02

    def normal(k, shape):
        return scale * jax.random.normal(k, shape, dtype=jnp.float32)

    keys = iter(jax.random.split(key, 8 + N_LAYERS * 16))
    params = {
        "word_emb": normal(next(keys), (VOCAB, HIDDEN)),
        "pos_emb": normal(next(keys), (MAX_POS, HIDDEN)),
        "type_emb": normal(next(keys), (TYPE_VOCAB, HIDDEN)),
        "emb_ln_g": jnp.ones((1, HIDDEN), jnp.float32),
        "emb_ln_b": jnp.zeros((1, HIDDEN), jnp.float32),
        "layers": [],
    }
    for _ in range(N_LAYERS):
        lp = {
            "q_w": normal(next(keys), (HIDDEN, HIDDEN)),
            "q_b": jnp.zeros((1, HIDDEN), jnp.float32),
            "k_w": normal(next(keys), (HIDDEN, HIDDEN)),
            "k_b": jnp.zeros((1, HIDDEN), jnp.float32),
            "v_w": normal(next(keys), (HIDDEN, HIDDEN)),
            "v_b": jnp.zeros((1, HIDDEN), jnp.float32),
            "ao_w": normal(next(keys), (HIDDEN, HIDDEN)),
            "ao_b": jnp.zeros((1, HIDDEN), jnp.float32),
            "ln1_g": jnp.ones((1, HIDDEN), jnp.float32),
            "ln1_b": jnp.zeros((1, HIDDEN), jnp.float32),
            "i_w": normal(next(keys), (HIDDEN, INTERMEDIATE)),
            "i_b": jnp.zeros((1, INTERMEDIATE), jnp.float32),
            "o_w": normal(next(keys), (INTERMEDIATE, HIDDEN)),
            "o_b": jnp.zeros((1, HIDDEN), jnp.float32),
            "ln2_g": jnp.ones((1, HIDDEN), jnp.float32),
            "ln2_b": jnp.zeros((1, HIDDEN), jnp.float32),
        }
        params["layers"].append(lp)
    return params


# ---------------- pure-JAX reference (same math, no Pallas) ----------------
def bert_reference(params, input_ids, token_type_ids, attention_mask):
    nb, seq = input_ids.shape
    hp = jax.lax.Precision.HIGHEST
    x = (params["word_emb"][input_ids] + params["type_emb"][token_type_ids]
         + params["pos_emb"][:seq][None, :, :])
    x = _layernorm(x, params["emb_ln_g"], params["emb_ln_b"])
    keep = attention_mask[:, None, None, :] > 0                       # [nb,1,1,seq]
    for lp in params["layers"]:
        q = jnp.einsum("bsh,hk->bsk", x, lp["q_w"], precision=hp) + lp["q_b"]
        k = jnp.einsum("bsh,hk->bsk", x, lp["k_w"], precision=hp) + lp["k_b"]
        v = jnp.einsum("bsh,hk->bsk", x, lp["v_w"], precision=hp) + lp["v_b"]

        def split(t):
            return t.reshape(nb, seq, N_HEADS, HEAD_DIM).transpose(0, 2, 1, 3)

        qh, kh, vh = split(q), split(k), split(v)
        s = jnp.einsum("bhqd,bhkd->bhqk", qh, kh, precision=hp) / math.sqrt(HEAD_DIM)
        s = jnp.where(keep, s, -1e30)
        p = jax.nn.softmax(s, axis=-1)
        ctx = jnp.einsum("bhqk,bhkd->bhqd", p, vh, precision=hp)
        ctx = ctx.transpose(0, 2, 1, 3).reshape(nb, seq, HIDDEN)
        attn = jnp.einsum("bsh,hk->bsk", ctx, lp["ao_w"], precision=hp) + lp["ao_b"]
        x1 = _layernorm(attn + x, lp["ln1_g"], lp["ln1_b"])
        inter = jax.nn.gelu(jnp.einsum("bsh,hk->bsk", x1, lp["i_w"], precision=hp)
                            + lp["i_b"], approximate=False)
        out = jnp.einsum("bsk,kh->bsh", inter, lp["o_w"], precision=hp) + lp["o_b"]
        x = _layernorm(out + x1, lp["ln2_g"], lp["ln2_b"])
    return x[:, 0]


# ---------------- main ----------------
if __name__ == "__main__":
    root = jax.random.PRNGKey(0)
    pkey, k1, k2 = jax.random.split(root, 3)
    params = init_params(pkey)

    # Two tokenized batches (e.g. queries / docs), mimicking tokenizer output.
    def make_inputs(k):
        ids = jax.random.randint(k, (BATCH, SEQ), 0, VOCAB, dtype=jnp.int32)
        mask = jnp.ones((BATCH, SEQ), jnp.int32).at[1, SEQ - 2:].set(0)  # pad tail of ex.1
        tt = jnp.zeros((BATCH, SEQ), jnp.int32)
        return {"input_ids": ids, "token_type_ids": tt, "attention_mask": mask}

    inputs_tuple = (make_inputs(k1), make_inputs(k2))

    outs = text_encoder_forward(params, inputs_tuple)
    for o, d in zip(outs, inputs_tuple):
        jax.block_until_ready(o)
        assert o.shape == (BATCH, HIDDEN), o.shape
        assert bool(jnp.all(jnp.isfinite(o)))
        ref = bert_reference(params, d["input_ids"], d["token_type_ids"],
                             d["attention_mask"])
        # generous tolerance covers MXU vs XLA matmul-precision differences
        np.testing.assert_allclose(np.asarray(o), np.asarray(ref),
                                   rtol=5e-3, atol=5e-3)

    print("KERNEL_OK")
</pallas_src>

<mosaic_0001>
module attributes {stable_mosaic.version = 11 : i64} {
  func.func @kernel(%arg0: memref<32x1xi32, #tpu.memory_space<vmem>>, %arg1: memref<1x32xi32, #tpu.memory_space<vmem>>, %arg2: memref<768x128xf32, #tpu.memory_space<vmem>>, %arg3: memref<4x32xf32, #tpu.memory_space<vmem>>) attributes {dimension_semantics = [], scalar_prefetch = 0 : i64, scratch_operands = 0 : i64, tpu.core_type = #tpu.core_type<tc>} {
    %c0 = arith.constant 0 : index
    %c0_0 = arith.constant 0 : index
    %0 = vector.load %arg0[%c0, %c0_0] : memref<32x1xi32, #tpu.memory_space<vmem>>, vector<32x1xi32>
    %c32767_i32 = arith.constant 32767 : i32
    %1 = vector.broadcast %c32767_i32 : i32 to vector<32x1xi32>
    %2 = arith.andi %0, %1 : vector<32x1xi32>
    %c15_i32 = arith.constant 15 : i32
    %3 = vector.broadcast %c15_i32 : i32 to vector<32x1xi32>
    %4 = arith.shrsi %0, %3 : vector<32x1xi32>
    %c3_i32 = arith.constant 3 : i32
    %5 = vector.broadcast %c3_i32 : i32 to vector<32x1xi32>
    %6 = arith.andi %4, %5 : vector<32x1xi32>
    %c17_i32 = arith.constant 17 : i32
    %7 = vector.broadcast %c17_i32 : i32 to vector<32x1xi32>
    %8 = arith.shrsi %0, %7 : vector<32x1xi32>
    %c511_i32 = arith.constant 511 : i32
    %9 = vector.broadcast %c511_i32 : i32 to vector<32x1xi32>
    %10 = arith.andi %8, %9 : vector<32x1xi32>
    %c26_i32 = arith.constant 26 : i32
    %11 = vector.broadcast %c26_i32 : i32 to vector<32x1xi32>
    %12 = arith.shrsi %0, %11 : vector<32x1xi32>
    %c1_i32 = arith.constant 1 : i32
    %13 = vector.broadcast %c1_i32 : i32 to vector<32x1xi32>
    %14 = arith.addi %12, %13 : vector<32x1xi32>
    %15 = tpu.iota {dimensions = array<i32: 1>} : vector<32x88xi32>
    %16 = vector.broadcast %2 : vector<32x1xi32> to vector<32x88xi32>
    %17 = arith.cmpi eq, %15, %16 : vector<32x88xi32>
    %c64_i32 = arith.constant 64 : i32
    %18 = vector.broadcast %c64_i32 : i32 to vector<32x1xi32>
    %19 = arith.cmpi slt, %2, %18 : vector<32x1xi32>
    %20 = vector.broadcast %19 : vector<32x1xi1> to vector<32x88xi1>
    %21 = arith.andi %17, %20 : vector<32x88xi1>
    %c64_i32_1 = arith.constant 64 : i32
    %22 = vector.broadcast %c64_i32_1 : i32 to vector<32x1xi32>
    %23 = arith.addi %6, %22 : vector<32x1xi32>
    %24 = vector.broadcast %23 : vector<32x1xi32> to vector<32x88xi32>
    %25 = arith.cmpi eq, %15, %24 : vector<32x88xi32>
    %c2_i32 = arith.constant 2 : i32
    %26 = vector.broadcast %c2_i32 : i32 to vector<32x1xi32>
    %27 = arith.cmpi slt, %6, %26 : vector<32x1xi32>
    %28 = vector.broadcast %27 : vector<32x1xi1> to vector<32x88xi1>
    %29 = arith.andi %25, %28 : vector<32x88xi1>
    %30 = arith.ori %21, %29 : vector<32x88xi1>
    %c64_i32_2 = arith.constant 64 : i32
    %31 = vector.broadcast %c64_i32_2 : i32 to vector<32x1xi32>
    %32 = arith.addi %10, %31 : vector<32x1xi32>
    %c2_i32_3 = arith.constant 2 : i32
    %33 = vector.broadcast %c2_i32_3 : i32 to vector<32x1xi32>
    %34 = arith.addi %32, %33 : vector<32x1xi32>
    %35 = vector.broadcast %34 : vector<32x1xi32> to vector<32x88xi32>
    %36 = arith.cmpi eq, %15, %35 : vector<32x88xi32>
    %c16_i32 = arith.constant 16 : i32
    %37 = vector.broadcast %c16_i32 : i32 to vector<32x1xi32>
    %38 = arith.cmpi slt, %10, %37 : vector<32x1xi32>
    %39 = vector.broadcast %38 : vector<32x1xi1> to vector<32x88xi1>
    %40 = arith.andi %36, %39 : vector<32x88xi1>
    %41 = arith.ori %30, %40 : vector<32x88xi1>
    %42 = arith.extui %41 : vector<32x88xi1> to vector<32x88xi32>
    %43 = arith.sitofp %42 : vector<32x88xi32> to vector<32x88xf32>
    %c0_4 = arith.constant 0 : index
    %c0_5 = arith.constant 0 : index
    %44 = vector.load %arg2[%c0_4, %c0_5] : memref<768x128xf32, #tpu.memory_space<vmem>>, vector<88x32xf32>
    %cst = arith.constant dense<0.000000e+00> : vector<32x32xf32>
    %45 = tpu.matmul %43, %44, %cst {dimension_numbers = #tpu.dot_dimension_numbers<[1], [0], [0], [1], [0, 0, 1, 1], [], []>} : vector<32x88xf32>, vector<88x32xf32>, vector<32x32xf32> -> vector<32x32xf32>
    %c88 = arith.constant 88 : index
    %c0_6 = arith.constant 0 : index
    %46 = vector.load %arg2[%c88, %c0_6] : memref<768x128xf32, #tpu.memory_space<vmem>>, vector<1x32xf32>
    %c89 = arith.constant 89 : index
    %c0_7 = arith.constant 0 : index
    %47 = vector.load %arg2[%c89, %c0_7] : memref<768x128xf32, #tpu.memory_space<vmem>>, vector<1x32xf32>
    %cst_8 = arith.constant dense<0.000000e+00> : vector<32xf32>
    %48 = vector.multi_reduction <add>, %45, %cst_8 [1] : vector<32x32xf32> to vector<32xf32>
    %49 = vector.shape_cast %48 : vector<32xf32> to vector<32x1xf32>
    %cst_9 = arith.constant 3.200000e+01 : f32
    %50 = vector.broadcast %cst_9 : f32 to vector<32x1xf32>
    %51 = arith.divf %49, %50 : vector<32x1xf32>
    %52 = vector.broadcast %51 : vector<32x1xf32> to vector<32x32xf32>
    %53 = arith.subf %45, %52 : vector<32x32xf32>
    %54 = arith.mulf %53, %53 : vector<32x32xf32>
    %cst_10 = arith.constant dense<0.000000e+00> : vector<32xf32>
    %55 = vector.multi_reduction <add>, %54, %cst_10 [1] : vector<32x32xf32> to vector<32xf32>
    %56 = vector.shape_cast %55 : vector<32xf32> to vector<32x1xf32>
    %cst_11 = arith.constant 3.200000e+01 : f32
    %57 = vector.broadcast %cst_11 : f32 to vector<32x1xf32>
    %58 = arith.divf %56, %57 : vector<32x1xf32>
    %cst_12 = arith.constant 9.99999996E-13 : f32
    %59 = vector.broadcast %cst_12 : f32 to vector<32x1xf32>
    %60 = arith.addf %58, %59 : vector<32x1xf32>
    %61 = math.rsqrt %60 : vector<32x1xf32>
    %62 = vector.broadcast %61 : vector<32x1xf32> to vector<32x32xf32>
    %63 = arith.mulf %53, %62 : vector<32x32xf32>
    %64 = vector.broadcast %46 : vector<1x32xf32> to vector<32x32xf32>
    %65 = arith.mulf %63, %64 : vector<32x32xf32>
    %66 = vector.broadcast %47 : vector<1x32xf32> to vector<32x32xf32>
    %67 = arith.addf %65, %66 : vector<32x32xf32>
    %c0_13 = arith.constant 0 : index
    %c0_14 = arith.constant 0 : index
    %68 = vector.load %arg1[%c0_13, %c0_14] : memref<1x32xi32, #tpu.memory_space<vmem>>, vector<1x32xi32>
    %69 = vector.broadcast %68 : vector<1x32xi32> to vector<32x32xi32>
    %70 = vector.broadcast %14 : vector<32x1xi32> to vector<32x32xi32>
    %71 = arith.cmpi eq, %69, %70 : vector<32x32xi32>
    %cst_15 = arith.constant 0.000000e+00 : f32
    %cst_16 = arith.constant -1.000000e+30 : f32
    %72 = vector.broadcast %cst_15 : f32 to vector<32x32xf32>
    %73 = vector.broadcast %cst_16 : f32 to vector<32x32xf32>
    %74 = arith.select %71, %72, %73 : vector<32x32xi1>, vector<32x32xf32>
    %c96 = arith.constant 96 : index
    %c0_17 = arith.constant 0 : index
    %75 = vector.load %arg2[%c96, %c0_17] : memref<768x128xf32, #tpu.memory_space<vmem>>, vector<32x16xf32>
    %c160 = arith.constant 160 : index
    %c0_18 = arith.constant 0 : index
    %76 = vector.load %arg2[%c160, %c0_18] : memref<768x128xf32, #tpu.memory_space<vmem>>, vector<32x16xf32>
    %c224 = arith.constant 224 : index
    %c0_19 = arith.constant 0 : index
    %77 = vector.load %arg2[%c224, %c0_19] : memref<768x128xf32, #tpu.memory_space<vmem>>, vector<32x16xf32>
    %cst_20 = arith.constant dense<0.000000e+00> : vector<32x16xf32>
    %78 = tpu.matmul %67, %75, %cst_20 {dimension_numbers = #tpu.dot_dimension_numbers<[1], [0], [0], [1], [0, 0, 1, 1], [], []>} : vector<32x32xf32>, vector<32x16xf32>, vector<32x16xf32> -> vector<32x16xf32>
    %c416 = arith.constant 416 : index
    %c0_21 = arith.constant 0 : index
    %79 = vector.load %arg2[%c416, %c0_21] : memref<768x128xf32, #tpu.memory_space<vmem>>, vector<1x16xf32>
    %80 = vector.broadcast %79 : vector<1x16xf32> to vector<32x16xf32>
    %81 = arith.addf %78, %80 : vector<32x16xf32>
    %cst_22 = arith.constant dense<0.000000e+00> : vector<32x16xf32>
    %82 = tpu.matmul %67, %76, %cst_22 {dimension_numbers = #tpu.dot_dimension_numbers<[1], [0], [0], [1], [0, 0, 1, 1], [], []>} : vector<32x32xf32>, vector<32x16xf32>, vector<32x16xf32> -> vector<32x16xf32>
    %c418 = arith.constant 418 : index
    %c0_23 = arith.constant 0 : index
    %83 = vector.load %arg2[%c418, %c0_23] : memref<768x128xf32, #tpu.memory_space<vmem>>, vector<1x16xf32>
    %84 = vector.broadcast %83 : vector<1x16xf32> to vector<32x16xf32>
    %85 = arith.addf %82, %84 : vector<32x16xf32>
    %cst_24 = arith.constant dense<0.000000e+00> : vector<32x16xf32>
    %86 = tpu.matmul %67, %77, %cst_24 {dimension_numbers = #tpu.dot_dimension_numbers<[1], [0], [0], [1], [0, 0, 1, 1], [], []>} : vector<32x32xf32>, vector<32x16xf32>, vector<32x16xf32> -> vector<32x16xf32>
    %c420 = arith.constant 420 : index
    %c0_25 = arith.constant 0 : index
    %87 = vector.load %arg2[%c420, %c0_25] : memref<768x128xf32, #tpu.memory_space<vmem>>, vector<1x16xf32>
    %88 = vector.broadcast %87 : vector<1x16xf32> to vector<32x16xf32>
    %89 = arith.addf %86, %88 : vector<32x16xf32>
    %cst_26 = arith.constant dense<0.000000e+00> : vector<32x32xf32>
    %90 = tpu.matmul %81, %85, %cst_26 {dimension_numbers = #tpu.dot_dimension_numbers<[1], [1], [0], [0], [0, 0, 1, 0], [], []>} : vector<32x16xf32>, vector<32x16xf32>, vector<32x32xf32> -> vector<32x32xf32>
    %cst_27 = arith.constant 2.500000e-01 : f32
    %91 = vector.broadcast %cst_27 : f32 to vector<32x32xf32>
    %92 = arith.mulf %90, %91 : vector<32x32xf32>
    %93 = arith.addf %92, %74 : vector<32x32xf32>
    %cst_28 = arith.constant dense<0xFF800000> : vector<32xf32>
    %94 = vector.multi_reduction <maximumf>, %93, %cst_28 [1] : vector<32x32xf32> to vector<32xf32>
    %95 = vector.shape_cast %94 : vector<32xf32> to vector<32x1xf32>
    %96 = vector.broadcast %95 : vector<32x1xf32> to vector<32x32xf32>
    %97 = arith.subf %93, %96 : vector<32x32xf32>
    %98 = math.exp %97 : vector<32x32xf32>
    %cst_29 = arith.constant dense<0.000000e+00> : vector<32xf32>
    %99 = vector.multi_reduction <add>, %98, %cst_29 [1] : vector<32x32xf32> to vector<32xf32>
    %100 = vector.shape_cast %99 : vector<32xf32> to vector<32x1xf32>
    %cst_30 = arith.constant 1.000000e+00 : f32
    %101 = vector.broadcast %cst_30 : f32 to vector<32x1xf32>
    %102 = arith.divf %101, %100 : vector<32x1xf32>
    %103 = vector.broadcast %102 : vector<32x1xf32> to vector<32x32xf32>
    %104 = arith.mulf %98, %103 : vector<32x32xf32>
    %cst_31 = arith.constant dense<0.000000e+00> : vector<32x16xf32>
    %105 = tpu.matmul %104, %89, %cst_31 {dimension_numbers = #tpu.dot_dimension_numbers<[1], [0], [0], [1], [0, 0, 1, 1], [], []>} : vector<32x32xf32>, vector<32x16xf32>, vector<32x16xf32> -> vector<32x16xf32>
    %c128 = arith.constant 128 : index
    %c0_32 = arith.constant 0 : index
    %106 = vector.load %arg2[%c128, %c0_32] : memref<768x128xf32, #tpu.memory_space<vmem>>, vector<32x16xf32>
    %c192 = arith.constant 192 : index
    %c0_33 = arith.constant 0 : index
    %107 = vector.load %arg2[%c192, %c0_33] : memref<768x128xf32, #tpu.memory_space<vmem>>, vector<32x16xf32>
    %c256 = arith.constant 256 : index
    %c0_34 = arith.constant 0 : index
    %108 = vector.load %arg2[%c256, %c0_34] : memref<768x128xf32, #tpu.memory_space<vmem>>, vector<32x16xf32>
    %cst_35 = arith.constant dense<0.000000e+00> : vector<32x16xf32>
    %109 = tpu.matmul %67, %106, %cst_35 {dimension_numbers = #tpu.dot_dimension_numbers<[1], [0], [0], [1], [0, 0, 1, 1], [], []>} : vector<32x32xf32>, vector<32x16xf32>, vector<32x16xf32> -> vector<32x16xf32>
    %c417 = arith.constant 417 : index
    %c0_36 = arith.constant 0 : index
    %110 = vector.load %arg2[%c417, %c0_36] : memref<768x128xf32, #tpu.memory_space<vmem>>, vector<1x16xf32>
    %111 = vector.broadcast %110 : vector<1x16xf32> to vector<32x16xf32>
    %112 = arith.addf %109, %111 : vector<32x16xf32>
    %cst_37 = arith.constant dense<0.000000e+00> : vector<32x16xf32>
    %113 = tpu.matmul %67, %107, %cst_37 {dimension_numbers = #tpu.dot_dimension_numbers<[1], [0], [0], [1], [0, 0, 1, 1], [], []>} : vector<32x32xf32>, vector<32x16xf32>, vector<32x16xf32> -> vector<32x16xf32>
    %c419 = arith.constant 419 : index
    %c0_38 = arith.constant 0 : index
    %114 = vector.load %arg2[%c419, %c0_38] : memref<768x128xf32, #tpu.memory_space<vmem>>, vector<1x16xf32>
    %115 = vector.broadcast %114 : vector<1x16xf32> to vector<32x16xf32>
    %116 = arith.addf %113, %115 : vector<32x16xf32>
    %cst_39 = arith.constant dense<0.000000e+00> : vector<32x16xf32>
    %117 = tpu.matmul %67, %108, %cst_39 {dimension_numbers = #tpu.dot_dimension_numbers<[1], [0], [0], [1], [0, 0, 1, 1], [], []>} : vector<32x32xf32>, vector<32x16xf32>, vector<32x16xf32> -> vector<32x16xf32>
    %c421 = arith.constant 421 : index
    %c0_40 = arith.constant 0 : index
    %118 = vector.load %arg2[%c421, %c0_40] : memref<768x128xf32, #tpu.memory_space<vmem>>, vector<1x16xf32>
    %119 = vector.broadcast %118 : vector<1x16xf32> to vector<32x16xf32>
    %120 = arith.addf %117, %119 : vector<32x16xf32>
    %cst_41 = arith.constant dense<0.000000e+00> : vector<32x32xf32>
    %121 = tpu.matmul %112, %116, %cst_41 {dimension_numbers = #tpu.dot_dimension_numbers<[1], [1], [0], [0], [0, 0, 1, 0], [], []>} : vector<32x16xf32>, vector<32x16xf32>, vector<32x32xf32> -> vector<32x32xf32>
    %cst_42 = arith.constant 2.500000e-01 : f32
    %122 = vector.broadcast %cst_42 : f32 to vector<32x32xf32>
    %123 = arith.mulf %121, %122 : vector<32x32xf32>
    %124 = arith.addf %123, %74 : vector<32x32xf32>
    %cst_43 = arith.constant dense<0xFF800000> : vector<32xf32>
    %125 = vector.multi_reduction <maximumf>, %124, %cst_43 [1] : vector<32x32xf32> to vector<32xf32>
    %126 = vector.shape_cast %125 : vector<32xf32> to vector<32x1xf32>
    %127 = vector.broadcast %126 : vector<32x1xf32> to vector<32x32xf32>
    %128 = arith.subf %124, %127 : vector<32x32xf32>
    %129 = math.exp %128 : vector<32x32xf32>
    %cst_44 = arith.constant dense<0.000000e+00> : vector<32xf32>
    %130 = vector.multi_reduction <add>, %129, %cst_44 [1] : vector<32x32xf32> to vector<32xf32>
    %131 = vector.shape_cast %130 : vector<32xf32> to vector<32x1xf32>
    %cst_45 = arith.constant 1.000000e+00 : f32
    %132 = vector.broadcast %cst_45 : f32 to vector<32x1xf32>
    %133 = arith.divf %132, %131 : vector<32x1xf32>
    %134 = vector.broadcast %133 : vector<32x1xf32> to vector<32x32xf32>
    %135 = arith.mulf %129, %134 : vector<32x32xf32>
    %cst_46 = arith.constant dense<0.000000e+00> : vector<32x16xf32>
    %136 = tpu.matmul %135, %120, %cst_46 {dimension_numbers = #tpu.dot_dimension_numbers<[1], [0], [0], [1], [0, 0, 1, 1], [], []>} : vector<32x32xf32>, vector<32x16xf32>, vector<32x16xf32> -> vector<32x16xf32>
    %137 = tpu.concatenate %105, %136 in 1 : vector<32x16xf32>, vector<32x16xf32> -> vector<32x32xf32>
    %c288 = arith.constant 288 : index
    %c0_47 = arith.constant 0 : index
    %138 = vector.load %arg2[%c288, %c0_47] : memref<768x128xf32, #tpu.memory_space<vmem>>, vector<32x32xf32>
    %cst_48 = arith.constant dense<0.000000e+00> : vector<32x32xf32>
    %139 = tpu.matmul %137, %138, %cst_48 {dimension_numbers = #tpu.dot_dimension_numbers<[1], [0], [0], [1], [0, 0, 1, 1], [], []>} : vector<32x32xf32>, vector<32x32xf32>, vector<32x32xf32> -> vector<32x32xf32>
    %c422 = arith.constant 422 : index
    %c0_49 = arith.constant 0 : index
    %140 = vector.load %arg2[%c422, %c0_49] : memref<768x128xf32, #tpu.memory_space<vmem>>, vector<1x32xf32>
    %141 = vector.broadcast %140 : vector<1x32xf32> to vector<32x32xf32>
    %142 = arith.addf %139, %141 : vector<32x32xf32>
    %143 = arith.addf %142, %67 : vector<32x32xf32>
    %c425 = arith.constant 425 : index
    %c0_50 = arith.constant 0 : index
    %144 = vector.load %arg2[%c425, %c0_50] : memref<768x128xf32, #tpu.memory_space<vmem>>, vector<1x32xf32>
    %c426 = arith.constant 426 : index
    %c0_51 = arith.constant 0 : index
    %145 = vector.load %arg2[%c426, %c0_51] : memref<768x128xf32, #tpu.memory_space<vmem>>, vector<1x32xf32>
    %cst_52 = arith.constant dense<0.000000e+00> : vector<32xf32>
    %146 = vector.multi_reduction <add>, %143, %cst_52 [1] : vector<32x32xf32> to vector<32xf32>
    %147 = vector.shape_cast %146 : vector<32xf32> to vector<32x1xf32>
    %cst_53 = arith.constant 3.200000e+01 : f32
    %148 = vector.broadcast %cst_53 : f32 to vector<32x1xf32>
    %149 = arith.divf %147, %148 : vector<32x1xf32>
    %150 = vector.broadcast %149 : vector<32x1xf32> to vector<32x32xf32>
    %151 = arith.subf %143, %150 : vector<32x32xf32>
    %152 = arith.mulf %151, %151 : vector<32x32xf32>
    %cst_54 = arith.constant dense<0.000000e+00> : vector<32xf32>
    %153 = vector.multi_reduction <add>, %152, %cst_54 [1] : vector<32x32xf32> to vector<32xf32>
    %154 = vector.shape_cast %153 : vector<32xf32> to vector<32x1xf32>
    %cst_55 = arith.constant 3.200000e+01 : f32
    %155 = vector.broadcast %cst_55 : f32 to vector<32x1xf32>
    %156 = arith.divf %154, %155 : vector<32x1xf32>
    %cst_56 = arith.constant 9.99999996E-13 : f32
    %157 = vector.broadcast %cst_56 : f32 to vector<32x1xf32>
    %158 = arith.addf %156, %157 : vector<32x1xf32>
    %159 = math.rsqrt %158 : vector<32x1xf32>
    %160 = vector.broadcast %159 : vector<32x1xf32> to vector<32x32xf32>
    %161 = arith.mulf %151, %160 : vector<32x32xf32>
    %162 = vector.broadcast %144 : vector<1x32xf32> to vector<32x32xf32>
    %163 = arith.mulf %161, %162 : vector<32x32xf32>
    %164 = vector.broadcast %145 : vector<1x32xf32> to vector<32x32xf32>
    %165 = arith.addf %163, %164 : vector<32x32xf32>
    %c320 = arith.constant 320 : index
    %c0_57 = arith.constant 0 : index
    %166 = vector.load %arg2[%c320, %c0_57] : memref<768x128xf32, #tpu.memory_space<vmem>>, vector<32x64xf32>
    %cst_58 = arith.constant dense<0.000000e+00> : vector<32x64xf32>
    %167 = tpu.matmul %165, %166, %cst_58 {dimension_numbers = #tpu.dot_dimension_numbers<[1], [0], [0], [1], [0, 0, 1, 1], [], []>} : vector<32x32xf32>, vector<32x64xf32>, vector<32x64xf32> -> vector<32x64xf32>
    %c423 = arith.constant 423 : index
    %c0_59 = arith.constant 0 : index
    %168 = vector.load %arg2[%c423, %c0_59] : memref<768x128xf32, #tpu.memory_space<vmem>>, vector<1x64xf32>
    %169 = vector.broadcast %168 : vector<1x64xf32> to vector<32x64xf32>
    %170 = arith.addf %167, %169 : vector<32x64xf32>
    %cst_60 = arith.constant 0.707106769 : f32
    %171 = vector.broadcast %cst_60 : f32 to vector<32x64xf32>
    %172 = arith.mulf %170, %171 : vector<32x64xf32>
    %173 = math.absf %172 : vector<32x64xf32>
    %cst_61 = arith.constant 0.327591091 : f32
    %174 = vector.broadcast %cst_61 : f32 to vector<32x64xf32>
    %175 = arith.mulf %174, %173 : vector<32x64xf32>
    %cst_62 = arith.constant 1.000000e+00 : f32
    %176 = vector.broadcast %cst_62 : f32 to vector<32x64xf32>
    %177 = arith.addf %176, %175 : vector<32x64xf32>
    %cst_63 = arith.constant 1.000000e+00 : f32
    %178 = vector.broadcast %cst_63 : f32 to vector<32x64xf32>
    %179 = arith.divf %178, %177 : vector<32x64xf32>
    %cst_64 = arith.constant 1.06140542 : f32
    %180 = vector.broadcast %cst_64 : f32 to vector<32x64xf32>
    %181 = arith.mulf %180, %179 : vector<32x64xf32>
    %cst_65 = arith.constant 1.45315206 : f32
    %182 = vector.broadcast %cst_65 : f32 to vector<32x64xf32>
    %183 = arith.subf %181, %182 : vector<32x64xf32>
    %184 = arith.mulf %183, %179 : vector<32x64xf32>
    %cst_66 = arith.constant 1.42141378 : f32
    %185 = vector.broadcast %cst_66 : f32 to vector<32x64xf32>
    %186 = arith.addf %184, %185 : vector<32x64xf32>
    %187 = arith.mulf %186, %179 : vector<32x64xf32>
    %cst_67 = arith.constant 0.284496725 : f32
    %188 = vector.broadcast %cst_67 : f32 to vector<32x64xf32>
    %189 = arith.subf %187, %188 : vector<32x64xf32>
    %190 = arith.mulf %189, %179 : vector<32x64xf32>
    %cst_68 = arith.constant 0.254829586 : f32
    %191 = vector.broadcast %cst_68 : f32 to vector<32x64xf32>
    %192 = arith.addf %190, %191 : vector<32x64xf32>
    %193 = arith.mulf %192, %179 : vector<32x64xf32>
    %cst_69 = arith.constant 0.000000e+00 : f32
    %194 = vector.broadcast %cst_69 : f32 to vector<32x64xf32>
    %195 = arith.subf %194, %173 : vector<32x64xf32>
    %196 = arith.mulf %195, %173 : vector<32x64xf32>
    %197 = math.exp %196 : vector<32x64xf32>
    %198 = arith.mulf %193, %197 : vector<32x64xf32>
    %cst_70 = arith.constant 1.000000e+00 : f32
    %199 = vector.broadcast %cst_70 : f32 to vector<32x64xf32>
    %200 = arith.subf %199, %198 : vector<32x64xf32>
    %cst_71 = arith.constant 0.000000e+00 : f32
    %201 = vector.broadcast %cst_71 : f32 to vector<32x64xf32>
    %202 = arith.cmpf oge, %172, %201 : vector<32x64xf32>
    %cst_72 = arith.constant 0.000000e+00 : f32
    %203 = vector.broadcast %cst_72 : f32 to vector<32x64xf32>
    %204 = arith.subf %203, %200 : vector<32x64xf32>
    %205 = arith.select %202, %200, %204 : vector<32x64xi1>, vector<32x64xf32>
    %cst_73 = arith.constant 5.000000e-01 : f32
    %206 = vector.broadcast %cst_73 : f32 to vector<32x64xf32>
    %207 = arith.mulf %206, %170 : vector<32x64xf32>
    %cst_74 = arith.constant 1.000000e+00 : f32
    %208 = vector.broadcast %cst_74 : f32 to vector<32x64xf32>
    %209 = arith.addf %208, %205 : vector<32x64xf32>
    %210 = arith.mulf %207, %209 : vector<32x64xf32>
    %c352 = arith.constant 352 : index
    %c0_75 = arith.constant 0 : index
    %211 = vector.load %arg2[%c352, %c0_75] : memref<768x128xf32, #tpu.memory_space<vmem>>, vector<64x32xf32>
    %cst_76 = arith.constant dense<0.000000e+00> : vector<32x32xf32>
    %212 = tpu.matmul %210, %211, %cst_76 {dimension_numbers = #tpu.dot_dimension_numbers<[1], [0], [0], [1], [0, 0, 1, 1], [], []>} : vector<32x64xf32>, vector<64x32xf32>, vector<32x32xf32> -> vector<32x32xf32>
    %c424 = arith.constant 424 : index
    %c0_77 = arith.constant 0 : index
    %213 = vector.load %arg2[%c424, %c0_77] : memref<768x128xf32, #tpu.memory_space<vmem>>, vector<1x32xf32>
    %214 = vector.broadcast %213 : vector<1x32xf32> to vector<32x32xf32>
    %215 = arith.addf %212, %214 : vector<32x32xf32>
    %216 = arith.addf %215, %165 : vector<32x32xf32>
    %c427 = arith.constant 427 : index
    %c0_78 = arith.constant 0 : index
    %217 = vector.load %arg2[%c427, %c0_78] : memref<768x128xf32, #tpu.memory_space<vmem>>, vector<1x32xf32>
    %c428 = arith.constant 428 : index
    %c0_79 = arith.constant 0 : index
    %218 = vector.load %arg2[%c428, %c0_79] : memref<768x128xf32, #tpu.memory_space<vmem>>, vector<1x32xf32>
    %cst_80 = arith.constant dense<0.000000e+00> : vector<32xf32>
    %219 = vector.multi_reduction <add>, %216, %cst_80 [1] : vector<32x32xf32> to vector<32xf32>
    %220 = vector.shape_cast %219 : vector<32xf32> to vector<32x1xf32>
    %cst_81 = arith.constant 3.200000e+01 : f32
    %221 = vector.broadcast %cst_81 : f32 to vector<32x1xf32>
    %222 = arith.divf %220, %221 : vector<32x1xf32>
    %223 = vector.broadcast %222 : vector<32x1xf32> to vector<32x32xf32>
    %224 = arith.subf %216, %223 : vector<32x32xf32>
    %225 = arith.mulf %224, %224 : vector<32x32xf32>
    %cst_82 = arith.constant dense<0.000000e+00> : vector<32xf32>
    %226 = vector.multi_reduction <add>, %225, %cst_82 [1] : vector<32x32xf32> to vector<32xf32>
    %227 = vector.shape_cast %226 : vector<32xf32> to vector<32x1xf32>
    %cst_83 = arith.constant 3.200000e+01 : f32
    %228 = vector.broadcast %cst_83 : f32 to vector<32x1xf32>
    %229 = arith.divf %227, %228 : vector<32x1xf32>
    %cst_84 = arith.constant 9.99999996E-13 : f32
    %230 = vector.broadcast %cst_84 : f32 to vector<32x1xf32>
    %231 = arith.addf %229, %230 : vector<32x1xf32>
    %232 = math.rsqrt %231 : vector<32x1xf32>
    %233 = vector.broadcast %232 : vector<32x1xf32> to vector<32x32xf32>
    %234 = arith.mulf %224, %233 : vector<32x32xf32>
    %235 = vector.broadcast %217 : vector<1x32xf32> to vector<32x32xf32>
    %236 = arith.mulf %234, %235 : vector<32x32xf32>
    %237 = vector.broadcast %218 : vector<1x32xf32> to vector<32x32xf32>
    %238 = arith.addf %236, %237 : vector<32x32xf32>
    %c432 = arith.constant 432 : index
    %c0_85 = arith.constant 0 : index
    %239 = vector.load %arg2[%c432, %c0_85] : memref<768x128xf32, #tpu.memory_space<vmem>>, vector<32x16xf32>
    %c496 = arith.constant 496 : index
    %c0_86 = arith.constant 0 : index
    %240 = vector.load %arg2[%c496, %c0_86] : memref<768x128xf32, #tpu.memory_space<vmem>>, vector<32x16xf32>
    %c560 = arith.constant 560 : index
    %c0_87 = arith.constant 0 : index
    %241 = vector.load %arg2[%c560, %c0_87] : memref<768x128xf32, #tpu.memory_space<vmem>>, vector<32x16xf32>
    %cst_88 = arith.constant dense<0.000000e+00> : vector<32x16xf32>
    %242 = tpu.matmul %238, %239, %cst_88 {dimension_numbers = #tpu.dot_dimension_numbers<[1], [0], [0], [1], [0, 0, 1, 1], [], []>} : vector<32x32xf32>, vector<32x16xf32>, vector<32x16xf32> -> vector<32x16xf32>
    %c752 = arith.constant 752 : index
    %c0_89 = arith.constant 0 : index
    %243 = vector.load %arg2[%c752, %c0_89] : memref<768x128xf32, #tpu.memory_space<vmem>>, vector<1x16xf32>
    %244 = vector.broadcast %243 : vector<1x16xf32> to vector<32x16xf32>
    %245 = arith.addf %242, %244 : vector<32x16xf32>
    %cst_90 = arith.constant dense<0.000000e+00> : vector<32x16xf32>
    %246 = tpu.matmul %238, %240, %cst_90 {dimension_numbers = #tpu.dot_dimension_numbers<[1], [0], [0], [1], [0, 0, 1, 1], [], []>} : vector<32x32xf32>, vector<32x16xf32>, vector<32x16xf32> -> vector<32x16xf32>
    %c754 = arith.constant 754 : index
    %c0_91 = arith.constant 0 : index
    %247 = vector.load %arg2[%c754, %c0_91] : memref<768x128xf32, #tpu.memory_space<vmem>>, vector<1x16xf32>
    %248 = vector.broadcast %247 : vector<1x16xf32> to vector<32x16xf32>
    %249 = arith.addf %246, %248 : vector<32x16xf32>
    %cst_92 = arith.constant dense<0.000000e+00> : vector<32x16xf32>
    %250 = tpu.matmul %238, %241, %cst_92 {dimension_numbers = #tpu.dot_dimension_numbers<[1], [0], [0], [1], [0, 0, 1, 1], [], []>} : vector<32x32xf32>, vector<32x16xf32>, vector<32x16xf32> -> vector<32x16xf32>
    %c756 = arith.constant 756 : index
    %c0_93 = arith.constant 0 : index
    %251 = vector.load %arg2[%c756, %c0_93] : memref<768x128xf32, #tpu.memory_space<vmem>>, vector<1x16xf32>
    %252 = vector.broadcast %251 : vector<1x16xf32> to vector<32x16xf32>
    %253 = arith.addf %250, %252 : vector<32x16xf32>
    %cst_94 = arith.constant dense<0.000000e+00> : vector<32x32xf32>
    %254 = tpu.matmul %245, %249, %cst_94 {dimension_numbers = #tpu.dot_dimension_numbers<[1], [1], [0], [0], [0, 0, 1, 0], [], []>} : vector<32x16xf32>, vector<32x16xf32>, vector<32x32xf32> -> vector<32x32xf32>
    %cst_95 = arith.constant 2.500000e-01 : f32
    %255 = vector.broadcast %cst_95 : f32 to vector<32x32xf32>
    %256 = arith.mulf %254, %255 : vector<32x32xf32>
    %257 = arith.addf %256, %74 : vector<32x32xf32>
    %cst_96 = arith.constant dense<0xFF800000> : vector<32xf32>
    %258 = vector.multi_reduction <maximumf>, %257, %cst_96 [1] : vector<32x32xf32> to vector<32xf32>
    %259 = vector.shape_cast %258 : vector<32xf32> to vector<32x1xf32>
    %260 = vector.broadcast %259 : vector<32x1xf32> to vector<32x32xf32>
    %261 = arith.subf %257, %260 : vector<32x32xf32>
    %262 = math.exp %261 : vector<32x32xf32>
    %cst_97 = arith.constant dense<0.000000e+00> : vector<32xf32>
    %263 = vector.multi_reduction <add>, %262, %cst_97 [1] : vector<32x32xf32> to vector<32xf32>
    %264 = vector.shape_cast %263 : vector<32xf32> to vector<32x1xf32>
    %cst_98 = arith.constant 1.000000e+00 : f32
    %265 = vector.broadcast %cst_98 : f32 to vector<32x1xf32>
    %266 = arith.divf %265, %264 : vector<32x1xf32>
    %267 = vector.broadcast %266 : vector<32x1xf32> to vector<32x32xf32>
    %268 = arith.mulf %262, %267 : vector<32x32xf32>
    %cst_99 = arith.constant dense<0.000000e+00> : vector<32x16xf32>
    %269 = tpu.matmul %268, %253, %cst_99 {dimension_numbers = #tpu.dot_dimension_numbers<[1], [0], [0], [1], [0, 0, 1, 1], [], []>} : vector<32x32xf32>, vector<32x16xf32>, vector<32x16xf32> -> vector<32x16xf32>
    %c464 = arith.constant 464 : index
    %c0_100 = arith.constant 0 : index
    %270 = vector.load %arg2[%c464, %c0_100] : memref<768x128xf32, #tpu.memory_space<vmem>>, vector<32x16xf32>
    %c528 = arith.constant 528 : index
    %c0_101 = arith.constant 0 : index
    %271 = vector.load %arg2[%c528, %c0_101] : memref<768x128xf32, #tpu.memory_space<vmem>>, vector<32x16xf32>
    %c592 = arith.constant 592 : index
    %c0_102 = arith.constant 0 : index
    %272 = vector.load %arg2[%c592, %c0_102] : memref<768x128xf32, #tpu.memory_space<vmem>>, vector<32x16xf32>
    %cst_103 = arith.constant dense<0.000000e+00> : vector<32x16xf32>
    %273 = tpu.matmul %238, %270, %cst_103 {dimension_numbers = #tpu.dot_dimension_numbers<[1], [0], [0], [1], [0, 0, 1, 1], [], []>} : vector<32x32xf32>, vector<32x16xf32>, vector<32x16xf32> -> vector<32x16xf32>
    %c753 = arith.constant 753 : index
    %c0_104 = arith.constant 0 : index
    %274 = vector.load %arg2[%c753, %c0_104] : memref<768x128xf32, #tpu.memory_space<vmem>>, vector<1x16xf32>
    %275 = vector.broadcast %274 : vector<1x16xf32> to vector<32x16xf32>
    %276 = arith.addf %273, %275 : vector<32x16xf32>
    %cst_105 = arith.constant dense<0.000000e+00> : vector<32x16xf32>
    %277 = tpu.matmul %238, %271, %cst_105 {dimension_numbers = #tpu.dot_dimension_numbers<[1], [0], [0], [1], [0, 0, 1, 1], [], []>} : vector<32x32xf32>, vector<32x16xf32>, vector<32x16xf32> -> vector<32x16xf32>
    %c755 = arith.constant 755 : index
    %c0_106 = arith.constant 0 : index
    %278 = vector.load %arg2[%c755, %c0_106] : memref<768x128xf32, #tpu.memory_space<vmem>>, vector<1x16xf32>
    %279 = vector.broadcast %278 : vector<1x16xf32> to vector<32x16xf32>
    %280 = arith.addf %277, %279 : vector<32x16xf32>
    %cst_107 = arith.constant dense<0.000000e+00> : vector<32x16xf32>
    %281 = tpu.matmul %238, %272, %cst_107 {dimension_numbers = #tpu.dot_dimension_numbers<[1], [0], [0], [1], [0, 0, 1, 1], [], []>} : vector<32x32xf32>, vector<32x16xf32>, vector<32x16xf32> -> vector<32x16xf32>
    %c757 = arith.constant 757 : index
    %c0_108 = arith.constant 0 : index
    %282 = vector.load %arg2[%c757, %c0_108] : memref<768x128xf32, #tpu.memory_space<vmem>>, vector<1x16xf32>
    %283 = vector.broadcast %282 : vector<1x16xf32> to vector<32x16xf32>
    %284 = arith.addf %281, %283 : vector<32x16xf32>
    %cst_109 = arith.constant dense<0.000000e+00> : vector<32x32xf32>
    %285 = tpu.matmul %276, %280, %cst_109 {dimension_numbers = #tpu.dot_dimension_numbers<[1], [1], [0], [0], [0, 0, 1, 0], [], []>} : vector<32x16xf32>, vector<32x16xf32>, vector<32x32xf32> -> vector<32x32xf32>
    %cst_110 = arith.constant 2.500000e-01 : f32
    %286 = vector.broadcast %cst_110 : f32 to vector<32x32xf32>
    %287 = arith.mulf %285, %286 : vector<32x32xf32>
    %288 = arith.addf %287, %74 : vector<32x32xf32>
    %cst_111 = arith.constant dense<0xFF800000> : vector<32xf32>
    %289 = vector.multi_reduction <maximumf>, %288, %cst_111 [1] : vector<32x32xf32> to vector<32xf32>
    %290 = vector.shape_cast %289 : vector<32xf32> to vector<32x1xf32>
    %291 = vector.broadcast %290 : vector<32x1xf32> to vector<32x32xf32>
    %292 = arith.subf %288, %291 : vector<32x32xf32>
    %293 = math.exp %292 : vector<32x32xf32>
    %cst_112 = arith.constant dense<0.000000e+00> : vector<32xf32>
    %294 = vector.multi_reduction <add>, %293, %cst_112 [1] : vector<32x32xf32> to vector<32xf32>
    %295 = vector.shape_cast %294 : vector<32xf32> to vector<32x1xf32>
    %cst_113 = arith.constant 1.000000e+00 : f32
    %296 = vector.broadcast %cst_113 : f32 to vector<32x1xf32>
    %297 = arith.divf %296, %295 : vector<32x1xf32>
    %298 = vector.broadcast %297 : vector<32x1xf32> to vector<32x32xf32>
    %299 = arith.mulf %293, %298 : vector<32x32xf32>
    %cst_114 = arith.constant dense<0.000000e+00> : vector<32x16xf32>
    %300 = tpu.matmul %299, %284, %cst_114 {dimension_numbers = #tpu.dot_dimension_numbers<[1], [0], [0], [1], [0, 0, 1, 1], [], []>} : vector<32x32xf32>, vector<32x16xf32>, vector<32x16xf32> -> vector<32x16xf32>
    %301 = tpu.concatenate %269, %300 in 1 : vector<32x16xf32>, vector<32x16xf32> -> vector<32x32xf32>
    %c624 = arith.constant 624 : index
    %c0_115 = arith.constant 0 : index
    %302 = vector.load %arg2[%c624, %c0_115] : memref<768x128xf32, #tpu.memory_space<vmem>>, vector<32x32xf32>
    %cst_116 = arith.constant dense<0.000000e+00> : vector<32x32xf32>
    %303 = tpu.matmul %301, %302, %cst_116 {dimension_numbers = #tpu.dot_dimension_numbers<[1], [0], [0], [1], [0, 0, 1, 1], [], []>} : vector<32x32xf32>, vector<32x32xf32>, vector<32x32xf32> -> vector<32x32xf32>
    %c758 = arith.constant 758 : index
    %c0_117 = arith.constant 0 : index
    %304 = vector.load %arg2[%c758, %c0_117] : memref<768x128xf32, #tpu.memory_space<vmem>>, vector<1x32xf32>
    %305 = vector.broadcast %304 : vector<1x32xf32> to vector<32x32xf32>
    %306 = arith.addf %303, %305 : vector<32x32xf32>
    %307 = arith.addf %306, %238 : vector<32x32xf32>
    %c761 = arith.constant 761 : index
    %c0_118 = arith.constant 0 : index
    %308 = vector.load %arg2[%c761, %c0_118] : memref<768x128xf32, #tpu.memory_space<vmem>>, vector<1x32xf32>
    %c762 = arith.constant 762 : index
    %c0_119 = arith.constant 0 : index
    %309 = vector.load %arg2[%c762, %c0_119] : memref<768x128xf32, #tpu.memory_space<vmem>>, vector<1x32xf32>
    %cst_120 = arith.constant dense<0.000000e+00> : vector<32xf32>
    %310 = vector.multi_reduction <add>, %307, %cst_120 [1] : vector<32x32xf32> to vector<32xf32>
    %311 = vector.shape_cast %310 : vector<32xf32> to vector<32x1xf32>
    %cst_121 = arith.constant 3.200000e+01 : f32
    %312 = vector.broadcast %cst_121 : f32 to vector<32x1xf32>
    %313 = arith.divf %311, %312 : vector<32x1xf32>
    %314 = vector.broadcast %313 : vector<32x1xf32> to vector<32x32xf32>
    %315 = arith.subf %307, %314 : vector<32x32xf32>
    %316 = arith.mulf %315, %315 : vector<32x32xf32>
    %cst_122 = arith.constant dense<0.000000e+00> : vector<32xf32>
    %317 = vector.multi_reduction <add>, %316, %cst_122 [1] : vector<32x32xf32> to vector<32xf32>
    %318 = vector.shape_cast %317 : vector<32xf32> to vector<32x1xf32>
    %cst_123 = arith.constant 3.200000e+01 : f32
    %319 = vector.broadcast %cst_123 : f32 to vector<32x1xf32>
    %320 = arith.divf %318, %319 : vector<32x1xf32>
    %cst_124 = arith.constant 9.99999996E-13 : f32
    %321 = vector.broadcast %cst_124 : f32 to vector<32x1xf32>
    %322 = arith.addf %320, %321 : vector<32x1xf32>
    %323 = math.rsqrt %322 : vector<32x1xf32>
    %324 = vector.broadcast %323 : vector<32x1xf32> to vector<32x32xf32>
    %325 = arith.mulf %315, %324 : vector<32x32xf32>
    %326 = vector.broadcast %308 : vector<1x32xf32> to vector<32x32xf32>
    %327 = arith.mulf %325, %326 : vector<32x32xf32>
    %328 = vector.broadcast %309 : vector<1x32xf32> to vector<32x32xf32>
    %329 = arith.addf %327, %328 : vector<32x32xf32>
    %c656 = arith.constant 656 : index
    %c0_125 = arith.constant 0 : index
    %330 = vector.load %arg2[%c656, %c0_125] : memref<768x128xf32, #tpu.memory_space<vmem>>, vector<32x64xf32>
    %cst_126 = arith.constant dense<0.000000e+00> : vector<32x64xf32>
    %331 = tpu.matmul %329, %330, %cst_126 {dimension_numbers = #tpu.dot_dimension_numbers<[1], [0], [0], [1], [0, 0, 1, 1], [], []>} : vector<32x32xf32>, vector<32x64xf32>, vector<32x64xf32> -> vector<32x64xf32>
    %c759 = arith.constant 759 : index
    %c0_127 = arith.constant 0 : index
    %332 = vector.load %arg2[%c759, %c0_127] : memref<768x128xf32, #tpu.memory_space<vmem>>, vector<1x64xf32>
    %333 = vector.broadcast %332 : vector<1x64xf32> to vector<32x64xf32>
    %334 = arith.addf %331, %333 : vector<32x64xf32>
    %cst_128 = arith.constant 0.707106769 : f32
    %335 = vector.broadcast %cst_128 : f32 to vector<32x64xf32>
    %336 = arith.mulf %334, %335 : vector<32x64xf32>
    %337 = math.absf %336 : vector<32x64xf32>
    %cst_129 = arith.constant 0.327591091 : f32
    %338 = vector.broadcast %cst_129 : f32 to vector<32x64xf32>
    %339 = arith.mulf %338, %337 : vector<32x64xf32>
    %cst_130 = arith.constant 1.000000e+00 : f32
    %340 = vector.broadcast %cst_130 : f32 to vector<32x64xf32>
    %341 = arith.addf %340, %339 : vector<32x64xf32>
    %cst_131 = arith.constant 1.000000e+00 : f32
    %342 = vector.broadcast %cst_131 : f32 to vector<32x64xf32>
    %343 = arith.divf %342, %341 : vector<32x64xf32>
    %cst_132 = arith.constant 1.06140542 : f32
    %344 = vector.broadcast %cst_132 : f32 to vector<32x64xf32>
    %345 = arith.mulf %344, %343 : vector<32x64xf32>
    %cst_133 = arith.constant 1.45315206 : f32
    %346 = vector.broadcast %cst_133 : f32 to vector<32x64xf32>
    %347 = arith.subf %345, %346 : vector<32x64xf32>
    %348 = arith.mulf %347, %343 : vector<32x64xf32>
    %cst_134 = arith.constant 1.42141378 : f32
    %349 = vector.broadcast %cst_134 : f32 to vector<32x64xf32>
    %350 = arith.addf %348, %349 : vector<32x64xf32>
    %351 = arith.mulf %350, %343 : vector<32x64xf32>
    %cst_135 = arith.constant 0.284496725 : f32
    %352 = vector.broadcast %cst_135 : f32 to vector<32x64xf32>
    %353 = arith.subf %351, %352 : vector<32x64xf32>
    %354 = arith.mulf %353, %343 : vector<32x64xf32>
    %cst_136 = arith.constant 0.254829586 : f32
    %355 = vector.broadcast %cst_136 : f32 to vector<32x64xf32>
    %356 = arith.addf %354, %355 : vector<32x64xf32>
    %357 = arith.mulf %356, %343 : vector<32x64xf32>
    %cst_137 = arith.constant 0.000000e+00 : f32
    %358 = vector.broadcast %cst_137 : f32 to vector<32x64xf32>
    %359 = arith.subf %358, %337 : vector<32x64xf32>
    %360 = arith.mulf %359, %337 : vector<32x64xf32>
    %361 = math.exp %360 : vector<32x64xf32>
    %362 = arith.mulf %357, %361 : vector<32x64xf32>
    %cst_138 = arith.constant 1.000000e+00 : f32
    %363 = vector.broadcast %cst_138 : f32 to vector<32x64xf32>
    %364 = arith.subf %363, %362 : vector<32x64xf32>
    %cst_139 = arith.constant 0.000000e+00 : f32
    %365 = vector.broadcast %cst_139 : f32 to vector<32x64xf32>
    %366 = arith.cmpf oge, %336, %365 : vector<32x64xf32>
    %cst_140 = arith.constant 0.000000e+00 : f32
    %367 = vector.broadcast %cst_140 : f32 to vector<32x64xf32>
    %368 = arith.subf %367, %364 : vector<32x64xf32>
    %369 = arith.select %366, %364, %368 : vector<32x64xi1>, vector<32x64xf32>
    %cst_141 = arith.constant 5.000000e-01 : f32
    %370 = vector.broadcast %cst_141 : f32 to vector<32x64xf32>
    %371 = arith.mulf %370, %334 : vector<32x64xf32>
    %cst_142 = arith.constant 1.000000e+00 : f32
    %372 = vector.broadcast %cst_142 : f32 to vector<32x64xf32>
    %373 = arith.addf %372, %369 : vector<32x64xf32>
    %374 = arith.mulf %371, %373 : vector<32x64xf32>
    %c688 = arith.constant 688 : index
    %c0_143 = arith.constant 0 : index
    %375 = vector.load %arg2[%c688, %c0_143] : memref<768x128xf32, #tpu.memory_space<vmem>>, vector<64x32xf32>
    %cst_144 = arith.constant dense<0.000000e+00> : vector<32x32xf32>
    %376 = tpu.matmul %374, %375, %cst_144 {dimension_numbers = #tpu.dot_dimension_numbers<[1], [0], [0], [1], [0, 0, 1, 1], [], []>} : vector<32x64xf32>, vector<64x32xf32>, vector<32x32xf32> -> vector<32x32xf32>
    %c760 = arith.constant 760 : index
    %c0_145 = arith.constant 0 : index
    %377 = vector.load %arg2[%c760, %c0_145] : memref<768x128xf32, #tpu.memory_space<vmem>>, vector<1x32xf32>
    %378 = vector.broadcast %377 : vector<1x32xf32> to vector<32x32xf32>
    %379 = arith.addf %376, %378 : vector<32x32xf32>
    %380 = arith.addf %379, %329 : vector<32x32xf32>
    %c763 = arith.constant 763 : index
    %c0_146 = arith.constant 0 : index
    %381 = vector.load %arg2[%c763, %c0_146] : memref<768x128xf32, #tpu.memory_space<vmem>>, vector<1x32xf32>
    %c764 = arith.constant 764 : index
    %c0_147 = arith.constant 0 : index
    %382 = vector.load %arg2[%c764, %c0_147] : memref<768x128xf32, #tpu.memory_space<vmem>>, vector<1x32xf32>
    %cst_148 = arith.constant dense<0.000000e+00> : vector<32xf32>
    %383 = vector.multi_reduction <add>, %380, %cst_148 [1] : vector<32x32xf32> to vector<32xf32>
    %384 = vector.shape_cast %383 : vector<32xf32> to vector<32x1xf32>
    %cst_149 = arith.constant 3.200000e+01 : f32
    %385 = vector.broadcast %cst_149 : f32 to vector<32x1xf32>
    %386 = arith.divf %384, %385 : vector<32x1xf32>
    %387 = vector.broadcast %386 : vector<32x1xf32> to vector<32x32xf32>
    %388 = arith.subf %380, %387 : vector<32x32xf32>
    %389 = arith.mulf %388, %388 : vector<32x32xf32>
    %cst_150 = arith.constant dense<0.000000e+00> : vector<32xf32>
    %390 = vector.multi_reduction <add>, %389, %cst_150 [1] : vector<32x32xf32> to vector<32xf32>
    %391 = vector.shape_cast %390 : vector<32xf32> to vector<32x1xf32>
    %cst_151 = arith.constant 3.200000e+01 : f32
    %392 = vector.broadcast %cst_151 : f32 to vector<32x1xf32>
    %393 = arith.divf %391, %392 : vector<32x1xf32>
    %cst_152 = arith.constant 9.99999996E-13 : f32
    %394 = vector.broadcast %cst_152 : f32 to vector<32x1xf32>
    %395 = arith.addf %393, %394 : vector<32x1xf32>
    %396 = math.rsqrt %395 : vector<32x1xf32>
    %397 = vector.broadcast %396 : vector<32x1xf32> to vector<32x32xf32>
    %398 = arith.mulf %388, %397 : vector<32x32xf32>
    %399 = vector.broadcast %381 : vector<1x32xf32> to vector<32x32xf32>
    %400 = arith.mulf %398, %399 : vector<32x32xf32>
    %401 = vector.broadcast %382 : vector<1x32xf32> to vector<32x32xf32>
    %402 = arith.addf %400, %401 : vector<32x32xf32>
    %403 = tpu.iota {dimensions = array<i32: 1>} : vector<4x32xi32>
    %404 = tpu.iota {dimensions = array<i32: 0>} : vector<4x32xi32>
    %c8_i32 = arith.constant 8 : i32
    %405 = vector.broadcast %c8_i32 : i32 to vector<4x32xi32>
    %406 = arith.muli %405, %404 : vector<4x32xi32>
    %407 = arith.cmpi eq, %403, %406 : vector<4x32xi32>
    %408 = arith.extui %407 : vector<4x32xi1> to vector<4x32xi32>
    %409 = arith.sitofp %408 : vector<4x32xi32> to vector<4x32xf32>
    %cst_153 = arith.constant dense<0.000000e+00> : vector<4x32xf32>
    %410 = tpu.matmul %409, %402, %cst_153 {dimension_numbers = #tpu.dot_dimension_numbers<[1], [0], [0], [1], [0, 0, 1, 1], [], []>} : vector<4x32xf32>, vector<32x32xf32>, vector<4x32xf32> -> vector<4x32xf32>
    %c0_154 = arith.constant 0 : index
    %c0_155 = arith.constant 0 : index
    %411 = vector.load %arg3[%c0_154, %c0_155] : memref<4x32xf32, #tpu.memory_space<vmem>>, vector<4x32xf32>
    tpu.vector_store %arg3[%c0_154, %c0_155], %410 {strides = array<i32>} : memref<4x32xf32, #tpu.memory_space<vmem>>, vector<4x32xf32>,
    return
  }
}

</mosaic_0001>

<bundles_post_ra>
// kernel: bert_encode.1
= control target key start
LH: loop header
LB: loop body
LE: loop exit
PB: predicated region body
PF: predicated region fallthrough
CT: control target
= control target key end

     0   :  { %8 = vsyncpa [#allocation3], 0  ;;  %s5845_s0 = inlined_call_operand.vmem [shape: s32[32,1], index: 0, kind: input, shape index: {}]   ;;  %s5846_s1 = inlined_call_operand.vmem [shape: s32[1,32], index: 1, kind: input, shape index: {}]   ;;  %s5847_s2 = inlined_call_operand.hbm [shape: f32[768,128], index: 2, kind: input, shape index: {}]   ;;  %s5848_s3 = inlined_call_operand.hbm [shape: f32[4,32], index: 3, kind: output, shape index: {}]  }
   0x1   :  { %9 = vsyncpa [#allocation4], 0  ;;  %s5215_s12 = smov [#allocation2]   ;;  %s5167_s16 = scalar_lea.hbm %s5847_s2, 12288 }
   0x2   :  { %s19_s13 = sshll.u32 %s5215_s12, 4  ;;  %p5168_p0 = scmp.ne.s32.totalorder %s5847_s2, %s5167_s16  ;;  %s20_s13 = int_to_ptr.vmem [resolvable:$true] %s19_s13 }
   0x3   :  { %p5171_p1 = scmp.lt.u32.totalorder %s5167_s16, %s5847_s2 }
   0x5   :  { %p5173_p2 = pnand %p5171_p1, %p5168_p0 }
   0x7   :  { %5176 = shalt.err (!%p5173_p2)
}
   0x8   :  { %s5177_s21 = scalar_lea.vmem %s20_s13, 12288  ;;  %p5182_p4 = scmp.lt.s32.totalorder %s20_s13, %s20_s13 }
   0x9   :  { %p5178_p3 = scmp.ne.s32.totalorder %s20_s13, %s5177_s21  ;;  %p5183_p5 = scmp.lt.s32.totalorder %s5177_s21, %s5177_s21 }
   0xb   :  { %p5184_p6 = por %p5183_p5, %p5182_p4 }
   0xd   :  { %p5185_p7 = pnand %p5184_p6, %p5178_p3 }
   0xf   :  { %5188 = shalt.err (!%p5185_p7)
}
  0x10   :  { %s5216_s22 = smov 128   ;;  %s5217_s23 = smov 8  }
  0x11   :  { %25 = dma.hbm_to_vmem [thread:$0]  %s5847_s2, 12288, %s20_s13, [#allocation3], %s5216_s22, %s5216_s22, %s5217_s23  }
  0x12   :  { %5211 = dma.done.wait [#allocation3], 12288  }
  0x13   :  { %5212 = vsyncadd [#allocation3], 4294955008  ;;  %v5218_v0 = vmov 0   ;;  %v5262_v1 = vld [vmem:[%s5845_s0] sm:$0xff]  ;;  %v5267_v2 = vld [vmem:[%s5845_s0 + $0x8] sm:$0xff]  ;;  %s5224_s7 = smov [#allocation5]  }
  0x14   :  { %5029 = vset.pattern.permute.xlu0 %v5218_v0  ;;  %5030 = vset.pattern.permute.xlu1 %v5218_v0  ;;  %v33_v3 = vand.u32 32767, %v5262_v1  ;;  %v34_v4 = vand.u32 32767, %v5267_v2  ;;  %v37_v5 = vshra.s32 %v5262_v1, 15  ;;  %v38_v7 = vshra.s32 %v5267_v2, 15  ;;  %v223_v14 = vld [vmem:[#allocation2] sm:$0xff]  ;;  %v224_v15 = vld [vmem:[#allocation2 + $0x8] sm:$0xff] }
  0x15   :  { %v45_v8 = vshra.s32 %v5262_v1, 17  ;;  %v46_v13 = vshra.s32 %v5267_v2, 17  ;;  %v225_v17 = vld [vmem:[#allocation2 + $0x10] sm:$0xff]  ;;  %v226_v18 = vld [vmem:[#allocation2 + $0x18] sm:$0xff]  ;;  %v4753_v20 = vpack.c.bf16 %v224_v15, %v223_v14  ;;  %v227_v25 = vld [vmem:[#allocation2 + $0x20] sm:$0xff]  ;;  %s3914_s8 = sshll.u32 %s5224_s7, 4  ;;  %s3915_s8 = int_to_ptr.vmem [resolvable:$true] %s3914_s8 }
  0x16   :  { %64 = vperm.xlu0 %5029, %v33_v3   ;;  %vm80_vm0 = vcmp.lt.s32.totalorder %v34_v4, 64  ;;  %v41_v6 = vand.u32 3, %v37_v5  ;;  %vm79_vm1 = vcmp.lt.s32.totalorder %v33_v3, 64  ;;  %v42_v11 = vand.u32 3, %v38_v7  ;;  %v228_v26 = vld [vmem:[#allocation2 + $0x28] sm:$0xff]  ;;  %v5282_v31 = vld [vmem:[%s5845_s0 + $0x10] sm:$0xff]  ;;  %p5194_p9 = scmp.lt.s32.totalorder %s3915_s8, %s3915_s8 }
  0x17   :  { %v84_v9 = vsel %vm80_vm0, 1, %v5218_v0  ;;  %v49_v12 = vand.u32 511, %v45_v8  ;;  %v83_v16 = vsel %vm79_vm1, 1, %v5218_v0  ;;  %v50_v23 = vand.u32 511, %v46_v13  ;;  %4754 = vmatprep.subr.bf16.mxu0 %v4753_v20  ;;  %v229_v32 = vld [vmem:[#allocation2 + $0x30] sm:$0xff]  ;;  %v230_v33 = vld [vmem:[#allocation2 + $0x38] sm:$0xff] }
  0x18   :  { %91 = vperm.xlu1 %5030, %v84_v9   ;;  %v107_v10 = vadd.s32 64, %v41_v6  ;;  %vm127_vm2 = vcmp.lt.s32.totalorder %v41_v6, 2  ;;  %v108_v21 = vadd.s32 64, %v42_v11  ;;  %vm128_vm3 = vcmp.lt.s32.totalorder %v42_v11, 2  ;;  %4756 = vmatpush3.bf16.msra.mxu0 %v4753_v20  ;;  %v231_v39 = vld [vmem:[#allocation2 + $0x40] sm:$0xff]  ;;  %v232_v40 = vld [vmem:[#allocation2 + $0x48] sm:$0xff] }
  0x19   :  { %v131_v19 = vsel %vm127_vm2, 1, %v5218_v0  ;;  %v159_v22 = vadd.s32 64, %v49_v12  ;;  %v4757_v24 = vpack.c.bf16 %v226_v18, %v225_v17  ;;  %v132_v27 = vsel %vm128_vm3, 1, %v5218_v0  ;;  %v5291_v44 = vld [vmem:[%s5845_s0 + $0x18] sm:$0xff]  ;;  %v233_v50 = vld [vmem:[#allocation2 + $0x50] sm:$0xff]  ;;  %s5189_s9 = scalar_lea.vmem %s3915_s8, 64 }
  0x1a   :  { %67 = vperm.xlu0 %5029, %v34_v4   ;;  %vm183_vm4 = vcmp.lt.s32.totalorder %v49_v12, 16  ;;  %v160_v29 = vadd.s32 64, %v50_v23  ;;  %v4761_v30 = vpack.c.bf16 %v228_v26, %v227_v25  ;;  %v4765_v35 = vpack.c.bf16 %v230_v33, %v229_v32  ;;  %p5190_p8 = scmp.ne.s32.totalorder %s3915_s8, %s5189_s9  ;;  %p5195_p10 = scmp.lt.s32.totalorder %s5189_s9, %s5189_s9 }
  0x1b   :  { %4758 = vmatprep.subr.bf16.mxu0 %v4757_v24  ;;  %v163_v28 = vadd.s32 2, %v159_v22  ;;  %v187_v34 = vsel %vm183_vm4, 1, %v5218_v0  ;;  %vm184_vm5 = vcmp.lt.s32.totalorder %v50_v23, 16  ;;  %v35_v37 = vand.u32 32767, %v5282_v31 }
  0x1c   :  { %112 = vperm.xlu1 %5030, %v107_v10   ;;  %4760 = vmatpush3.bf16.msra.mxu0 %v4757_v24  ;;  %v164_v36 = vadd.s32 2, %v160_v29  ;;  %v39_v38 = vshra.s32 %v5282_v31, 15  ;;  %v188_v41 = vsel %vm184_vm5, 1, %v5218_v0  ;;  %v4769_v42 = vpack.c.bf16 %v232_v40, %v231_v39  ;;  %p5196_p11 = por %p5195_p10, %p5194_p9 }
  0x1d   :  { %4762 = vmatprep.subr.bf16.mxu0 %v4761_v30  ;;  %vm81_vm6 = vcmp.lt.s32.totalorder %v35_v37, 64  ;;  %v36_v46 = vand.u32 32767, %v5291_v44  ;;  %v40_v48 = vshra.s32 %v5291_v44, 15  ;;  %v47_v49 = vshra.s32 %v5282_v31, 17 }
  0x1e   :  { %88 = vperm.xlu0 %5029, %v83_v16   ;;  %v43_v43 = vand.u32 3, %v39_v38  ;;  %v85_v45 = vsel %vm81_vm6, 1, %v5218_v0  ;;  %v48_v54 = vshra.s32 %v5291_v44, 17  ;;  %v61_v8 = vlaneseq  ;;  %p5197_p12 = pnand %p5196_p11, %p5190_p8 }
  0x1f   :  { %vm82_vm8 = vcmp.lt.s32.totalorder %v36_v46, 64  ;;  %v44_v52 = vand.u32 3, %v40_v48  ;;  %v51_v53 = vand.u32 511, %v47_v49  ;;  %v55_v16 = vshra.s32 %v5282_v31, 26 }
  0x20   :  { %136 = vperm.xlu1 %5030, %v131_v19   ;;  %4764 = vmatpush3.bf16.msra.mxu0 %v4761_v30  ;;  %v109_v47 = vadd.s32 64, %v43_v43  ;;  %vm129_vm7 = vcmp.lt.s32.totalorder %v43_v43, 2  ;;  %v86_v55 = vsel %vm82_vm8, 1, %v5218_v0  ;;  %v52_v58 = vand.u32 511, %v48_v54  ;;  %v3931_v30 = vld [vmem:[#allocation2 + $0x58] ss:$0 sm:$0xff] }
  0x21   :  { %4766 = vmatprep.subr.bf16.mxu0 %v4765_v35  ;;  %v133_v51 = vsel %vm129_vm7, 1, %v5218_v0  ;;  %v110_v56 = vadd.s32 64, %v44_v52  ;;  %vm130_vm9 = vcmp.lt.s32.totalorder %v44_v52, 2  ;;  %v161_v57 = vadd.s32 64, %v51_v53 }
  0x22   :  { %115 = vperm.xlu0 %5029, %v108_v21   ;;  %v134_v59 = vsel %vm130_vm9, 1, %v5218_v0  ;;  %vm185_vm10 = vcmp.lt.s32.totalorder %v51_v53, 16  ;;  %v162_v61 = vadd.s32 64, %v52_v58  ;;  %vm186_vm11 = vcmp.lt.s32.totalorder %v52_v58, 16 }
  0x23   :  { %v165_v60 = vadd.s32 2, %v161_v57  ;;  %v189_v62 = vsel %vm185_vm10, 1, %v5218_v0  ;;  %v190_v3 = vsel %vm186_vm11, 1, %v5218_v0  ;;  %v5304_v11 = vand.u32 127, %v61_v8 }
  0x24   :  { %139 = vperm.xlu1 %5030, %v132_v27   ;;  %4768 = vmatpush3.bf16.msra.mxu0 %v4765_v35  ;;  %v166_v63 = vadd.s32 2, %v162_v61  ;;  %vm234_vm10 = vcmask 719872   ;;  %v5219_v19 = vmov 0.0  }
  0x25   :  { %4770 = vmatprep.subr.bf16.mxu0 %v4769_v42 }
  0x26   :  { %168 = vperm.xlu0 %5029, %v163_v28  }
  0x28   :  { %192 = vperm.xlu1 %5030, %v187_v34   ;;  %4772 = vmatpush3.bf16.msra.mxu0 %v4769_v42  ;;  %v3932_v34 = vld [vmem:[#allocation2 + $0x59] ss:$0 sm:$0xff] }
  0x29   :  { %4354 = vmatprep.subr.mxu0 %v233_v50 }
  0x2a   :  { %171 = vperm.xlu0 %5029, %v164_v36  }
  0x2c   :  { %195 = vperm.xlu1 %5030, %v188_v41   ;;  %4355 = vmatpush3.msra.mxu0 %v233_v50 }
  0x2e   :  { %70 = vperm.xlu0 %5029, %v35_v37  }
  0x30   :  { %94 = vperm.xlu1 %5030, %v85_v45  }
  0x32   :  { %118 = vperm.xlu0 %5029, %v109_v47  }
  0x34   :  { %142 = vperm.xlu1 %5030, %v133_v51  }
  0x36   :  { %73 = vperm.xlu0 %5029, %v36_v46  }
  0x38   :  { %97 = vperm.xlu1 %5030, %v86_v55  }
  0x3a   :  { %121 = vperm.xlu0 %5029, %v110_v56  }
  0x3c   :  { %145 = vperm.xlu1 %5030, %v134_v59  }
  0x3e   :  { %174 = vperm.xlu0 %5029, %v165_v60  }
  0x40   :  { %198 = vperm.xlu1 %5030, %v189_v62  }
  0x42   :  { %177 = vperm.xlu0 %5029, %v166_v63  }
  0x44   :  { %201 = vperm.xlu1 %5030, %v190_v3  }
  0x95   :  { %v65_v4 = vpop.permute.xlu0 %64 }
  0x96   :  { %vm75_vm0 = vcmp.eq.s32.totalorder %v5304_v11, %v65_v4 }
  0x97   :  { %v92_v5 = vpop.permute.xlu1 %91 }
  0x98   :  { %vm100_vm11 = vcmp.eq.s32.totalorder %v92_v5, 1 }
  0x99   :  { %v68_v6 = vpop.permute.xlu0 %67 }
  0x9a   :  { %vm76_vm5 = vcmp.eq.s32.totalorder %v5304_v11, %v68_v6  ;;  %v429_v6 = vld [vmem:[#allocation2 + $0x60] sm:$0xff] }
  0x9b   :  { %v113_v7 = vpop.permute.xlu1 %112 }
  0x9c   :  { %vm123_vm13 = vcmp.eq.s32.totalorder %v5304_v11, %v113_v7  ;;  %v430_v7 = vld [vmem:[#allocation2 + $0x68] sm:$0xff] }
  0x9d   :  { %v89_v9 = vpop.permute.xlu0 %88 }
  0x9e   :  { %vm99_vm14 = vcmp.eq.s32.totalorder %v89_v9, 1  ;;  %v4773_v9 = vpack.c.bf16 %v430_v7, %v429_v6 }
  0x9f   :  { %v137_v10 = vpop.permute.xlu1 %136  ;;  %vm103_vm2 = vmand %vm75_vm0, %vm99_vm14 }
  0xa0   :  { %vm147_vm12 = vcmp.eq.s32.totalorder %v137_v10, 1  ;;  %4774 = vmatprep.subr.bf16.mxu1 %v4773_v9 }
  0xa1   :  { %v116_v12 = vpop.permute.xlu0 %115  ;;  %vm5307_vm15 = vmand %vm123_vm13, %vm147_vm12  ;;  %4776 = vmatpush3.bf16.msra.mxu1 %v4773_v9  ;;  %v3939_v9 = vld [vmem:[#allocation2 + $0x1a2] ss:$0 sm:$0xff] }
  0xa2   :  { %vm124_vm3 = vcmp.eq.s32.totalorder %v5304_v11, %v116_v12  ;;  %vm155_vm4 = vmor %vm103_vm2, %vm5307_vm15  ;;  %v431_v12 = vld [vmem:[#allocation2 + $0x70] sm:$0xff] }
  0xa3   :  { %v140_v13 = vpop.permute.xlu1 %139  ;;  %vm104_vm13 = vmand %vm76_vm5, %vm100_vm11 }
  0xa4   :  { %vm148_vm1 = vcmp.eq.s32.totalorder %v140_v13, 1  ;;  %v432_v13 = vld [vmem:[#allocation2 + $0x78] sm:$0xff] }
  0xa5   :  { %v169_v14 = vpop.permute.xlu0 %168  ;;  %vm5316_vm6 = vmand %vm124_vm3, %vm148_vm1  ;;  %v4777_v0 = vpack.c.bf16 %v432_v13, %v431_v12 }
  0xa6   :  { %vm179_vm7 = vcmp.eq.s32.totalorder %v5304_v11, %v169_v14  ;;  %vm156_vm15 = vmor %vm104_vm13, %vm5316_vm6  ;;  %v53_v14 = vshra.s32 %v5262_v1, 26 }
  0xa7   :  { %v193_v15 = vpop.permute.xlu1 %192  ;;  %4778 = vmatprep.subr.bf16.mxu1 %v4777_v0 }
  0xa8   :  { %vm203_vm8 = vcmp.eq.s32.totalorder %v193_v15, 1  ;;  %4780 = vmatpush3.bf16.msra.mxu1 %v4777_v0  ;;  %v57_v15 = vadd.s32 1, %v53_v14 }
  0xa9   :  { %vm207_vm9 = vmand %vm179_vm7, %vm203_vm8  ;;  %v172_v17 = vpop.permute.xlu0 %171 }
  0xaa   :  { %vm211_vm12 = vmor %vm155_vm4, %vm207_vm9  ;;  %vm180_vm14 = vcmp.eq.s32.totalorder %v5304_v11, %v172_v17  ;;  %v59_v17 = vadd.s32 1, %v55_v16 }
  0xab   :  { %v196_v18 = vpop.permute.xlu1 %195  ;;  %v3923_v20 = vsel %vm211_vm12, 1.0, %v5219_v19 }
  0xac   :  { %vm204_vm0 = vcmp.eq.s32.totalorder %v196_v18, 1  ;;  %4356 = vmatprep.mubr.msk.f32.mxu0 %vm234_vm10, %v3923_v20  ;;  %v56_v18 = vshra.s32 %v5291_v44, 26  ;;  %v54_v20 = vshra.s32 %v5267_v2, 26 }
  0xad   :  { %vm208_vm1 = vmand %vm180_vm14, %vm204_vm0  ;;  %v71_v21 = vpop.permute.xlu0 %70 }
  0xae   :  { %vm212_vm2 = vmor %vm156_vm15, %vm208_vm1  ;;  %vm77_vm7 = vcmp.eq.s32.totalorder %v5304_v11, %v71_v21  ;;  %v60_v21 = vadd.s32 1, %v56_v18 }
  0xaf   :  { %v95_v22 = vpop.permute.xlu1 %94  ;;  %v3924_v23 = vsel %vm212_vm2, 1.0, %v5219_v19 }
  0xb0   :  { %4357 = vmatmul.mubr.msk.f32.vlgmr.msra.gmra.mrb[0].mxu0 %vm234_vm10, %v3924_v23  ;;  %vm101_vm4 = vcmp.eq.s32.totalorder %v95_v22, 1  ;;  %v58_v22 = vadd.s32 1, %v54_v20  ;;  %v433_v23 = vld [vmem:[#allocation2 + $0xa0] sm:$0xff] }
  0xb1   :  { %v119_v24 = vpop.permute.xlu0 %118  ;;  %vm105_vm9 = vmand %vm77_vm7, %vm101_vm4 }
  0xb2   :  { %vm125_vm5 = vcmp.eq.s32.totalorder %v5304_v11, %v119_v24  ;;  %v434_v24 = vld [vmem:[#allocation2 + $0xa8] sm:$0xff] }
  0xb3   :  { %v143_v25 = vpop.permute.xlu1 %142 }
  0xb4   :  { %vm149_vm3 = vcmp.eq.s32.totalorder %v143_v25, 1  ;;  %v4781_v25 = vpack.c.bf16 %v434_v24, %v433_v23 }
  0xb5   :  { %v74_v26 = vpop.permute.xlu0 %73  ;;  %vm5329_vm6 = vmand %vm125_vm5, %vm149_vm3 }
  0xb6   :  { %vm157_vm11 = vmor %vm105_vm9, %vm5329_vm6  ;;  %vm78_vm2 = vcmp.eq.s32.totalorder %v5304_v11, %v74_v26  ;;  %4782 = vmatprep.subr.bf16.mxu1 %v4781_v25 }
  0xb7   :  { %v98_v27 = vpop.permute.xlu1 %97 }
  0xb8   :  { %vm102_vm13 = vcmp.eq.s32.totalorder %v98_v27, 1 }
  0xb9   :  { %v122_v28 = vpop.permute.xlu0 %121  ;;  %vm106_vm4 = vmand %vm78_vm2, %vm102_vm13 }
  0xba   :  { %vm126_vm12 = vcmp.eq.s32.totalorder %v5304_v11, %v122_v28 }
  0xbb   :  { %v146_v29 = vpop.permute.xlu1 %145 }
  0xbc   :  { %vm150_vm8 = vcmp.eq.s32.totalorder %v146_v29, 1 }
  0xbd   :  { %v175_v32 = vpop.permute.xlu0 %174  ;;  %vm5337_vm14 = vmand %vm126_vm12, %vm150_vm8  ;;  %vm334_vm12 = vcmask 261120  }
  0xbe   :  { %vm181_vm15 = vcmp.eq.s32.totalorder %v5304_v11, %v175_v32  ;;  %vm158_vm5 = vmor %vm106_vm4, %vm5337_vm14 }
  0xbf   :  { %v199_v33 = vpop.permute.xlu1 %198 }
  0xc0   :  { %vm205_vm0 = vcmp.eq.s32.totalorder %v199_v33, 1 }
  0xc1   :  { %vm209_vm1 = vmand %vm181_vm15, %vm205_vm0  ;;  %v178_v35 = vpop.permute.xlu0 %177 }
  0xc2   :  { %vm213_vm3 = vmor %vm157_vm11, %vm209_vm1  ;;  %vm182_vm6 = vcmp.eq.s32.totalorder %v5304_v11, %v178_v35 }
  0xc3   :  { %v202_v36 = vpop.permute.xlu1 %201  ;;  %v3925_v37 = vsel %vm213_vm3, 1.0, %v5219_v19  ;;  %vm1957_vm3 = vcmask 523264  }
  0xc4   :  { %vm206_vm7 = vcmp.eq.s32.totalorder %v202_v36, 1  ;;  %4359 = vmatprep.mubr.msk.f32.mxu0 %vm234_vm10, %v3925_v37  ;;  %v435_v37 = vld [vmem:[#allocation2 + $0xb0] sm:$0xff] }
  0xc5   :  { %vm210_vm8 = vmand %vm182_vm6, %vm206_vm7 }
  0xc6   :  { %vm214_vm9 = vmor %vm158_vm5, %vm210_vm8 }
  0xc7   :  { %v3926_v38 = vsel %vm214_vm9, 1.0, %v5219_v19 }
  0xc8   :  { %4360 = vmatmul.mubr.msk.f32.gmra.mrb[2].mxu0 %vm234_vm10, %v3926_v38  ;;  %v436_v38 = vld [vmem:[#allocation2 + $0xb8] sm:$0xff]  ;;  %vm723_vm10 = vcmask 130048  }
  0xc9   :  { %vm5407_vm11 = vmpackc.low %vm723_vm10, %vm723_vm10 }
 0x183   :  { %v4358_v39 = vpop.f32.mrb[0].mxu0 }
 0x184   :  { %v313_v40 = vpop.f32.mrb[1].mxu0  ;;  %v338_v41 = vsel %vm334_vm12, %v4358_v39, 0.0 }
 0x185   :  { %339 = vadd.xlane.f32.xlu1 %v338_v41  ;;  %v335_v42 = vsel %vm334_vm12, %v313_v40, 0.0  ;;  %v4785_v41 = vpack.c.bf16 %v436_v38, %v435_v37 }
 0x186   :  { %336 = vadd.xlane.f32.xlu0 %v335_v42  ;;  %v437_v42 = vld [vmem:[#allocation2 + $0xe0] sm:$0xff] }
 0x19b   :  { %v4361_v43 = vpop.f32.mrb[2].mxu0 }
 0x19c   :  { %v323_v45 = vpop.f32.mrb[3].mxu0  ;;  %v344_v47 = vsel %vm334_vm12, %v4361_v43, 0.0 }
 0x19d   :  { %v341_v46 = vsel %vm334_vm12, %v323_v45, 0.0 }
 0x19e   :  { %342 = vadd.xlane.f32.xlu0 %v341_v46 }
 0x1a2   :  { %345 = vadd.xlane.f32.xlu0 %v344_v47 }
 0x212   :  { %v340_v48 = vpop.xlane.xlu1 %339 }
 0x213   :  { %v349_v49 = vmul.f32 0.03125, %v340_v48  ;;  %v337_v50 = vpop.xlane.xlu0 %336 }
 0x214   :  { %v348_v51 = vmul.f32 0.03125, %v337_v50 }
 0x215   :  { %v353_v52 = vsub.f32 %v4358_v39, %v349_v49 }
 0x216   :  { %v352_v53 = vsub.f32 %v313_v40, %v348_v51 }
 0x217   :  { %v357_v54 = vmul.f32 %v353_v52, %v353_v52 }
 0x218   :  { %v356_v55 = vmul.f32 %v352_v53, %v352_v53 }
 0x219   :  { %v363_v56 = vsel %vm334_vm12, %v357_v54, 0.0 }
 0x21a   :  { %364 = vadd.xlane.f32.xlu0 %v363_v56  ;;  %v360_v57 = vsel %vm334_vm12, %v356_v55, 0.0 }
 0x21b   :  { %361 = vadd.xlane.f32.xlu1 %v360_v57 }
 0x22b   :  { %v343_v58 = vpop.xlane.xlu0 %342 }
 0x22c   :  { %v350_v59 = vmul.f32 0.03125, %v343_v58 }
 0x22e   :  { %v5356_v60 = vsub.f32 %v323_v45, %v350_v59 }
 0x22f   :  { %v346_v61 = vpop.xlane.xlu0 %345 }
 0x230   :  { %v351_v62 = vmul.f32 0.03125, %v346_v61  ;;  %v358_v63 = vmul.f32 %v5356_v60, %v5356_v60  ;;  %v439_v61 = vld [vmem:[#allocation2 + $0xf0] sm:$0xff] }
 0x232   :  { %v5360_v3 = vsub.f32 %v4361_v43, %v351_v62  ;;  %v366_v4 = vsel %vm334_vm12, %v358_v63, 0.0  ;;  %v438_v43 = vld [vmem:[#allocation2 + $0xe8] sm:$0xff]  ;;  %v440_v62 = vld [vmem:[#allocation2 + $0xf8] sm:$0xff]  ;;  %v3934_v63 = vld [vmem:[#allocation2 + $0x1a0] ss:$0 sm:$0xff] }
 0x233   :  { %367 = vadd.xlane.f32.xlu1 %v366_v4  ;;  %v4789_v47 = vpack.c.bf16 %v438_v43, %v437_v42  ;;  %v3933_v43 = vld [vmem:[%s5846_s1] ss:$0 sm:$0xff]  ;;  %s5221_s1 = smov 16  }
 0x234   :  { %v359_v5 = vmul.f32 %v5360_v3, %v5360_v3 }
 0x236   :  { %v369_v10 = vsel %vm334_vm12, %v359_v5, 0.0 }
 0x237   :  { %370 = vadd.xlane.f32.xlu0 %v369_v10 }
 0x244   :  { %410 = vperm.xlu1 %5030, %v57_v15  }
 0x248   :  { %416 = vperm.xlu1 %5030, %v59_v17  }
 0x24c   :  { %419 = vperm.xlu1 %5030, %v60_v21   ;;  %v3944_v21 = vld [vmem:[#allocation2 + $0x1a4] ss:$0 sm:$0xff] }
 0x24d   :  { %413 = vperm.xlu0 %5029, %v58_v22  }
 0x2a7   :  { %v365_v1 = vpop.xlane.xlu0 %364 }
 0x2a8   :  { %v373_v26 = vmul.f32 0.03125, %v365_v1  ;;  %v362_v27 = vpop.xlane.xlu1 %361  ;;  %v990_v1 = vld [vmem:[#allocation2 + $0xc0] sm:$0xff] }
 0x2a9   :  { %v372_v28 = vmul.f32 0.03125, %v362_v27 }
 0x2aa   :  { %v377_v31 = vadd.f32 1e-12, %v373_v26  ;;  %v991_v26 = vld [vmem:[#allocation2 + $0xc8] sm:$0xff] }
 0x2ab   :  { %v376_v29 = vadd.f32 1e-12, %v372_v28 }
 0x2ac   :  { %5031 = vrsqrt.f32 %v377_v31 }
 0x2ad   :  { %5033 = vrsqrt.f32 %v376_v29  ;;  %v4825_v29 = vpack.c.bf16 %v991_v26, %v990_v1 }
 0x2b6   :  { %v5032_v44 = vpop.eup %5031 }
 0x2b7   :  { %v5034_v2 = vpop.eup %5033  ;;  %v385_v32 = vmul.f32 %v5032_v44, %v353_v52 }
 0x2b8   :  { %v384_v33 = vmul.f32 %v5034_v2, %v352_v53 }
 0x2b9   :  { %v393_v35 = vmul.f32 %v3931_v30, %v385_v32 }
 0x2ba   :  { %v392_v36 = vmul.f32 %v3931_v30, %v384_v33  ;;  %v992_v33 = vld [vmem:[#allocation2 + $0xd0] sm:$0xff] }
 0x2bb   :  { %v5372_v40 = vadd.f32 %v3932_v34, %v393_v35 }
 0x2bc   :  { %v5370_v39 = vadd.f32 %v3932_v34, %v392_v36 }
 0x2be   :  { %4370 = vmatprep.mubr.msk.f32.mxu1 %vm334_vm12, %v5370_v39 }
 0x2bf   :  { %4371 = vmatmul.mubr.msk.f32.vlgmr.msra.gmra.mrb[0].mxu1 %vm334_vm12, %v5372_v40 }
 0x2c0   :  { %v368_v45 = vpop.xlane.xlu1 %367  ;;  %4784 = vmatpush3.bf16.msra.mxu1 %v4781_v25 }
 0x2c1   :  { %v374_v46 = vmul.f32 0.03125, %v368_v45  ;;  %4786 = vmatprep.subr.bf16.mxu1 %v4785_v41 }
 0x2c3   :  { %v378_v48 = vadd.f32 1e-12, %v374_v46 }
 0x2c4   :  { %v371_v49 = vpop.xlane.xlu0 %370  ;;  %4788 = vmatpush3.bf16.msra.mxu1 %v4785_v41  ;;  %v411_v41 = vpop.permute.xlu1 %410 }
 0x2c5   :  { %5035 = vrsqrt.f32 %v378_v48  ;;  %v375_v50 = vmul.f32 0.03125, %v371_v49  ;;  %4790 = vmatprep.subr.bf16.mxu1 %v4789_v47  ;;  %vm421_vm14 = vcmp.eq.s32.totalorder %v3933_v43, %v411_v41  ;;  %v5220_v49 = vmov -1e+30  }
 0x2c7   :  { %v379_v51 = vadd.f32 1e-12, %v375_v50 }
 0x2c8   :  { %v417_v45 = vpop.permute.xlu1 %416 }
 0x2c9   :  { %5037 = vrsqrt.f32 %v379_v51  ;;  %vm423_vm15 = vcmp.eq.s32.totalorder %v3933_v43, %v417_v45 }
 0x2cc   :  { %v414_v42 = vpop.permute.xlu0 %413 }
 0x2cd   :  { %vm422_vm13 = vcmp.eq.s32.totalorder %v3933_v43, %v414_v42  ;;  %v986_v42 = vld [vmem:[#allocation2 + $0x80] sm:$0xff] }
 0x2ce   :  { %v5433_v50 = vsel %vm422_vm13, 0.0, %v5220_v49  ;;  %vm3906_vm13 = vcmask 257024  }
 0x2cf   :  { %v5036_v52 = vpop.eup %5035 }
 0x2d0   :  { %v386_v53 = vmul.f32 %v5036_v52, %v5356_v60  ;;  %v4793_v60 = vpack.c.bf16 %v440_v62, %v439_v61  ;;  %v5435_v52 = vsel %vm421_vm14, 0.0, %v5220_v49 }
 0x2d2   :  { %v394_v54 = vmul.f32 %v3931_v30, %v386_v53  ;;  %v420_v53 = vpop.permute.xlu1 %419 }
 0x2d3   :  { %v5038_v55 = vpop.eup %5037  ;;  %vm424_vm0 = vcmp.eq.s32.totalorder %v3933_v43, %v420_v53  ;;  %v987_v43 = vld [vmem:[#allocation2 + $0x88] sm:$0xff]  ;;  %v988_v53 = vld [vmem:[#allocation2 + $0x90] sm:$0xff] }
 0x2d4   :  { %v5379_v56 = vadd.f32 %v3932_v34, %v394_v54  ;;  %v387_v57 = vmul.f32 %v5038_v55, %v5360_v3  ;;  %v4817_v45 = vpack.c.bf16 %v987_v43, %v986_v42 }
 0x2d6   :  { %v395_v58 = vmul.f32 %v3931_v30, %v387_v57  ;;  %4373 = vmatprep.mubr.msk.f32.mxu1 %vm334_vm12, %v5379_v56 }
 0x2d8   :  { %v5384_v59 = vadd.f32 %v3932_v34, %v395_v58  ;;  %v993_v34 = vld [vmem:[#allocation2 + $0xd8] sm:$0xff] }
 0x2d9   :  { %v4829_v36 = vpack.c.bf16 %v993_v34, %v992_v33 }
 0x2da   :  { %4374 = vmatmul.mubr.msk.f32.gmra.mrb[2].mxu1 %vm334_vm12, %v5384_v59 }
 0x2db   :  { %4384 = vmatprep.mubr.msk.f32.mxu1 %vm334_vm12, %v5370_v39 }
 0x2de   :  { %4385 = vmatmul.mubr.msk.f32.vlgmr.msra.gmra.mrb[4].mxu1 %vm334_vm12, %v5372_v40 }
 0x2df   :  { %4387 = vmatprep.mubr.msk.f32.mxu1 %vm334_vm12, %v5379_v56  ;;  %4792 = vmatpush3.bf16.msra.mxu1 %v4789_v47 }
 0x2e0   :  { %4794 = vmatprep.subr.bf16.mxu1 %v4793_v60 }
 0x2e2   :  { %4388 = vmatmul.mubr.msk.f32.gmra.mrb[6].mxu1 %vm334_vm12, %v5384_v59 }
 0x2e3   :  { %4796 = vmatpush3.bf16.msra.mxu1 %v4793_v60  ;;  %4398 = vmatprep.mubr.msk.f32.mxu1 %vm334_vm12, %v5370_v39 }
 0x2e6   :  { %4399 = vmatmul.mubr.msk.f32.vlgmr.msra.gmra.mrb[8].mxu1 %vm334_vm12, %v5372_v40 }
 0x2e7   :  { %4401 = vmatprep.mubr.msk.f32.mxu1 %vm334_vm12, %v5379_v56 }
 0x2ea   :  { %4402 = vmatmul.mubr.msk.f32.gmra.mrb[10].mxu1 %vm334_vm12, %v5384_v59 }
 0x392   :  { %v4372_v3 = vpop.f32.mrb[0].mxu1 }
 0x393   :  { %v524_v4 = vpop.f32.mrb[1].mxu1  ;;  %v530_v35 = vadd.f32 %v4372_v3, %v3934_v63  ;;  %v3966_v3 = vld [vmem:[#allocation2 + $0x1a3] ss:$0 sm:$0xff] }
 0x394   :  { %v525_v5 = vadd.f32 %v3934_v63, %v524_v4  ;;  %v5441_v4 = vsel %vm423_vm15, 0.0, %v5220_v49 }
 0x396   :  { %4412 = vmatprep.mubr.msk.f32.mxu0 %vm723_vm10, %v525_v5 }
 0x3ad   :  { %v4375_v6 = vpop.f32.mrb[2].mxu1 }
 0x3ae   :  { %v534_v7 = vpop.f32.mrb[3].mxu1  ;;  %v540_v38 = vadd.f32 %v4375_v6, %v3934_v63 }
 0x3af   :  { %v535_v37 = vadd.f32 %v3934_v63, %v534_v7  ;;  %v5444_v7 = vsel %vm424_vm0, 0.0, %v5220_v49 }
 0x3b1   :  { %v4386_v10 = vpop.f32.mrb[4].mxu1 }
 0x3b2   :  { %v620_v12 = vadd.f32 %v4386_v10, %v3939_v9  ;;  %v614_v13 = vpop.f32.mrb[5].mxu1 }
 0x3b3   :  { %v615_v0 = vadd.f32 %v3939_v9, %v614_v13 }
 0x3b5   :  { %v4797_v15 = vpack.c.bf16 %v620_v12, %v615_v0  ;;  %v4389_v16 = vpop.f32.mrb[6].mxu1 }
 0x3b6   :  { %v630_v17 = vadd.f32 %v4389_v16, %v3939_v9  ;;  %v624_v18 = vpop.f32.mrb[7].mxu1 }
 0x3b7   :  { %v625_v20 = vadd.f32 %v3939_v9, %v624_v18  ;;  %4799 = vmatprep.subr.msk.bf16.mxu0 %vm5407_vm11, %v4797_v15 }
 0x3b8   :  { %4802 = vmatpush3.bf16.xpose.msk.msra.mxu0 %vm5407_vm11, %v4797_v15 }
 0x3b9   :  { %v4803_v22 = vpack.c.bf16 %v630_v17, %v625_v20  ;;  %v4400_v23 = vpop.f32.mrb[8].mxu1 }
 0x3ba   :  { %v710_v24 = vadd.f32 %v4400_v23, %v3944_v21  ;;  %v704_v25 = vpop.f32.mrb[9].mxu1 }
 0x3bb   :  { %v705_v27 = vadd.f32 %v3944_v21, %v704_v25  ;;  %4805 = vmatprep.subr.msk.bf16.mxu0 %vm5407_vm11, %v4803_v22 }
 0x3bd   :  { %v4809_v28 = vpack.c.bf16 %v710_v24, %v705_v27  ;;  %v4403_v31 = vpop.f32.mrb[10].mxu1 }
 0x3be   :  { %v720_v44 = vadd.f32 %v4403_v31, %v3944_v21  ;;  %v714_v30 = vpop.f32.mrb[11].mxu1 }
 0x3bf   :  { %v715_v2 = vadd.f32 %v3944_v21, %v714_v30  ;;  %4810 = vmatprep.subr.bf16.mxu1 %v4809_v28 }
 0x3c0   :  { %4808 = vmatpush3.bf16.xpose.msk.msra.mxu0 %vm5407_vm11, %v4803_v22  ;;  %4812 = vmatpush3.bf16.msra.mxu1 %v4809_v28 }
 0x3c1   :  { %v4813_v32 = vpack.c.bf16 %v720_v44, %v715_v2  ;;  %4826 = vmatprep.subr.bf16.mxu0 %v4825_v29 }
 0x3c3   :  { %4814 = vmatprep.subr.bf16.mxu1 %v4813_v32 }
 0x3c4   :  { %4816 = vmatpush3.bf16.msra.mxu1 %v4813_v32 }
 0x3c5   :  { %4818 = vmatprep.subr.bf16.mxu1 %v4817_v45 }
 0x3c7   :  { %4413 = vmatmul.mubr.msk.f32.vlgmr.msra.gmra.mrb[4].mxu0 %vm723_vm10, %v530_v35 }
 0x3c8   :  { %4415 = vmatprep.mubr.msk.f32.mxu0 %vm723_vm10, %v535_v37  ;;  %4828 = vmatpush3.bf16.msra.mxu0 %v4825_v29 }
 0x3c9   :  { %4830 = vmatprep.subr.bf16.mxu0 %v4829_v36 }
 0x3cb   :  { %4416 = vmatmul.mubr.msk.f32.gmra.mrb[6].mxu0 %vm723_vm10, %v540_v38 }
 0x3cc   :  { %4832 = vmatpush3.bf16.msra.mxu0 %v4829_v36  ;;  %4454 = vmatprep.mubr.msk.f32.mxu0 %vm334_vm12, %v5370_v39 }
 0x3cf   :  { %4455 = vmatmul.mubr.msk.f32.vlgmr.msra.gmra.mrb[8].mxu0 %vm334_vm12, %v5372_v40 }
 0x3d0   :  { %4457 = vmatprep.mubr.msk.f32.mxu0 %vm334_vm12, %v5379_v56 }
 0x3d3   :  { %4458 = vmatmul.mubr.msk.f32.gmra.mrb[10].mxu0 %vm334_vm12, %v5384_v59 }
 0x49a   :  { %v4414_v46 = vpop.f32.mrb[4].mxu0 }
 0x49b   :  { %v834_v47 = vmul.f32 0.25, %v4414_v46  ;;  %v814_v48 = vpop.f32.mrb[5].mxu0 }
 0x49c   :  { %v833_v51 = vmul.f32 0.25, %v814_v48 }
 0x49d   :  { %v838_v54 = vadd.f32 %v834_v47, %v5433_v50 }
 0x49e   :  { %v4417_v55 = vpop.f32.mrb[6].mxu0  ;;  %v837_v57 = vadd.f32 %v833_v51, %v5435_v52 }
 0x49f   :  { %v824_v58 = vpop.f32.mrb[7].mxu0  ;;  %v844_v61 = vsel %vm334_vm12, %v838_v54, -inf  ;;  %v836_v62 = vmul.f32 0.25, %v4417_v55 }
 0x4a0   :  { %v835_v60 = vmul.f32 0.25, %v824_v58  ;;  %845 = vmax.xlane.f32.xlu1 %v844_v61  ;;  %v841_v63 = vsel %vm334_vm12, %v837_v57, -inf }
 0x4a1   :  { %842 = vmax.xlane.f32.xlu0 %v841_v63  ;;  %v840_v0 = vadd.f32 %v836_v62, %v5444_v7  ;;  %v994_v62 = vld [vmem:[#allocation2 + $0x100] sm:$0xff] }
 0x4a2   :  { %v4456_v5 = vpop.f32.mrb[8].mxu0  ;;  %v839_v6 = vadd.f32 %v835_v60, %v5441_v4  ;;  %v995_v60 = vld [vmem:[#allocation2 + $0x108] sm:$0xff] }
 0x4a3   :  { %v1165_v9 = vadd.f32 %v4456_v5, %v3966_v3  ;;  %v1159_v10 = vpop.f32.mrb[9].mxu0  ;;  %v850_v21 = vsel %vm334_vm12, %v840_v0, -inf  ;;  %v4833_v5 = vpack.c.bf16 %v995_v60, %v994_v62 }
 0x4a4   :  { %v1160_v12 = vadd.f32 %v3966_v3, %v1159_v10  ;;  %v847_v13 = vsel %vm334_vm12, %v839_v6, -inf  ;;  %v996_v10 = vld [vmem:[#allocation2 + $0x110] sm:$0xff] }
 0x4a5   :  { %848 = vmax.xlane.f32.xlu0 %v847_v13 }
 0x4a6   :  { %v4841_v15 = vpack.c.bf16 %v1165_v9, %v1160_v12  ;;  %v4459_v16 = vpop.f32.mrb[10].mxu0  ;;  %v997_v12 = vld [vmem:[#allocation2 + $0x118] sm:$0xff] }
 0x4a7   :  { %v1175_v17 = vadd.f32 %v4459_v16, %v3966_v3  ;;  %v1169_v18 = vpop.f32.mrb[11].mxu0  ;;  %v4837_v13 = vpack.c.bf16 %v997_v12, %v996_v10 }
 0x4a8   :  { %v1170_v20 = vadd.f32 %v3966_v3, %v1169_v18  ;;  %4843 = vmatprep.subr.msk.bf16.mxu0 %vm5407_vm11, %v4841_v15  ;;  %v3961_v18 = vld [vmem:[#allocation2 + $0x1a1] ss:$0 sm:$0xff] }
 0x4a9   :  { %4846 = vmatpush3.bf16.xpose.msk.msra.mxu0 %vm5407_vm11, %v4841_v15  ;;  %851 = vmax.xlane.f32.xlu0 %v850_v21 }
 0x4aa   :  { %v4847_v22 = vpack.c.bf16 %v1175_v17, %v1170_v20 }
 0x4ac   :  { %4849 = vmatprep.subr.msk.bf16.mxu0 %vm5407_vm11, %v4847_v22 }
 0x4b1   :  { %4852 = vmatpush3.bf16.xpose.msk.msra.mxu0 %vm5407_vm11, %v4847_v22 }
 0x52d   :  { %v846_v23 = vpop.xlane.xlu1 %845 }
 0x52e   :  { %v854_v24 = vsub.f32 %v838_v54, %v846_v23  ;;  %v843_v25 = vpop.xlane.xlu0 %842  ;;  %v989_v54 = vld [vmem:[#allocation2 + $0x98] sm:$0xff] }
 0x52f   :  { %v853_v1 = vsub.f32 %v837_v57, %v843_v25  ;;  %v4821_v61 = vpack.c.bf16 %v989_v54, %v988_v53 }
 0x530   :  { %v859_v26 = vmul.f32 1.442695, %v854_v24 }
 0x531   :  { %v857_v27 = vmul.f32 1.442695, %v853_v1 }
 0x532   :  { %5039 = vpow2.f32 %v859_v26  ;;  %v849_v28 = vpop.xlane.xlu0 %848  ;;  %v3971_v26 = vld [vmem:[#allocation2 + $0x1a5] ss:$0 sm:$0xff] }
 0x533   :  { %5041 = vpow2.f32 %v857_v27  ;;  %v855_v31 = vsub.f32 %v839_v6, %v849_v28 }
 0x535   :  { %v861_v29 = vmul.f32 1.442695, %v855_v31 }
 0x536   :  { %v852_v44 = vpop.xlane.xlu0 %851 }
 0x537   :  { %5043 = vpow2.f32 %v861_v29  ;;  %v856_v30 = vsub.f32 %v840_v0, %v852_v44 }
 0x539   :  { %v863_v2 = vmul.f32 1.442695, %v856_v30 }
 0x53b   :  { %5045 = vpow2.f32 %v863_v2 }
 0x53c   :  { %v5040_v32 = vpop.eup %5039 }
 0x53d   :  { %v5042_v33 = vpop.eup %5041  ;;  %v868_v34 = vsel %vm334_vm12, %v5040_v32, 0.0 }
 0x53e   :  { %869 = vadd.xlane.f32.xlu0 %v868_v34  ;;  %v865_v35 = vsel %vm334_vm12, %v5042_v33, 0.0 }
 0x53f   :  { %866 = vadd.xlane.f32.xlu1 %v865_v35 }
 0x541   :  { %v5044_v36 = vpop.eup %5043 }
 0x542   :  { %v871_v37 = vsel %vm334_vm12, %v5044_v36, 0.0 }
 0x543   :  { %872 = vadd.xlane.f32.xlu1 %v871_v37 }
 0x545   :  { %v5046_v38 = vpop.eup %5045 }
 0x546   :  { %v874_v41 = vsel %vm334_vm12, %v5046_v38, 0.0 }
 0x547   :  { %875 = vadd.xlane.f32.xlu0 %v874_v41 }
 0x5cb   :  { %v870_v46 = vpop.xlane.xlu0 %869 }
 0x5cc   :  { %5047 = vrcp.f32 %v870_v46  ;;  %v867_v47 = vpop.xlane.xlu1 %866 }
 0x5cd   :  { %5049 = vrcp.f32 %v867_v47 }
 0x5d0   :  { %v873_v48 = vpop.xlane.xlu1 %872 }
 0x5d1   :  { %5051 = vrcp.f32 %v873_v48 }
 0x5d4   :  { %v876_v49 = vpop.xlane.xlu0 %875 }
 0x5d5   :  { %5053 = vrcp.f32 %v876_v49 }
 0x5d6   :  { %v5048_v51 = vpop.eup %5047 }
 0x5d7   :  { %v5050_v55 = vpop.eup %5049  ;;  %v886_v58 = vmul.f32 %v5048_v51, %v5040_v32 }
 0x5d8   :  { %v885_v57 = vmul.f32 %v5050_v55, %v5042_v33 }
 0x5da   :  { %4426 = vmatprep.mubr.msk.f32.mxu1 %vm334_vm12, %v885_v57 }
 0x5db   :  { %v5052_v63 = vpop.eup %5051  ;;  %4427 = vmatmul.mubr.msk.f32.vlgmr.msra.gmra.mrb[12].mxu1 %vm334_vm12, %v886_v58 }
 0x5dc   :  { %v887_v3 = vmul.f32 %v5052_v63, %v5044_v36  ;;  %4820 = vmatpush3.bf16.msra.mxu1 %v4817_v45 }
 0x5dd   :  { %4822 = vmatprep.subr.bf16.mxu1 %v4821_v61 }
 0x5de   :  { %4429 = vmatprep.mubr.msk.f32.mxu1 %vm334_vm12, %v887_v3 }
 0x5df   :  { %v5054_v6 = vpop.eup %5053 }
 0x5e0   :  { %v888_v9 = vmul.f32 %v5054_v6, %v5046_v38  ;;  %4824 = vmatpush3.bf16.msra.mxu1 %v4821_v61 }
 0x5e1   :  { %4834 = vmatprep.subr.bf16.mxu1 %v4833_v5 }
 0x5e2   :  { %4430 = vmatmul.mubr.msk.f32.gmra.mrb[14].mxu1 %vm334_vm12, %v888_v9 }
 0x5e3   :  { %4440 = vmatprep.mubr.msk.f32.mxu1 %vm334_vm12, %v5370_v39 }
 0x5e6   :  { %4441 = vmatmul.mubr.msk.f32.vlgmr.msra.gmra.mrb[16].mxu1 %vm334_vm12, %v5372_v40 }
 0x5e7   :  { %4443 = vmatprep.mubr.msk.f32.mxu1 %vm334_vm12, %v5379_v56  ;;  %4836 = vmatpush3.bf16.msra.mxu1 %v4833_v5 }
 0x5e8   :  { %4838 = vmatprep.subr.bf16.mxu1 %v4837_v13 }
 0x5ea   :  { %4444 = vmatmul.mubr.msk.f32.gmra.mrb[18].mxu1 %vm334_vm12, %v5384_v59 }
 0x5eb   :  { %4840 = vmatpush3.bf16.msra.mxu1 %v4837_v13  ;;  %4468 = vmatprep.mubr.msk.f32.mxu1 %vm334_vm12, %v5370_v39 }
 0x5ee   :  { %4469 = vmatmul.mubr.msk.f32.vlgmr.msra.gmra.mrb[20].mxu1 %vm334_vm12, %v5372_v40 }
 0x5ef   :  { %4471 = vmatprep.mubr.msk.f32.mxu1 %vm334_vm12, %v5379_v56 }
 0x5f2   :  { %4472 = vmatmul.mubr.msk.f32.gmra.mrb[22].mxu1 %vm334_vm12, %v5384_v59 }
 0x6ae   :  { %v5481_v0 = vpop.f32.mrb[12].mxu1 }
 0x6af   :  { %v5483_v15 = vpop.f32.mrb[13].mxu1 }
 0x6b5   :  { %v5485_v16 = vpop.f32.mrb[14].mxu1 }
 0x6b6   :  { %v5487_v17 = vpop.f32.mrb[15].mxu1 }
 0x6b9   :  { %v4442_v20 = vpop.f32.mrb[16].mxu1 }
 0x6ba   :  { %v1069_v21 = vpop.f32.mrb[17].mxu1  ;;  %v1075_v23 = vadd.f32 %v4442_v20, %v3961_v18 }
 0x6bb   :  { %v1070_v22 = vadd.f32 %v3961_v18, %v1069_v21 }
 0x6bd   :  { %v4445_v24 = vpop.f32.mrb[18].mxu1  ;;  %4482 = vmatprep.mubr.msk.f32.mxu0 %vm723_vm10, %v1070_v22 }
 0x6be   :  { %v1079_v25 = vpop.f32.mrb[19].mxu1  ;;  %4483 = vmatmul.mubr.msk.f32.vlgmr.msra.gmra.mrb[12].mxu0 %vm723_vm10, %v1075_v23  ;;  %v1085_v27 = vadd.f32 %v4445_v24, %v3961_v18 }
 0x6bf   :  { %v1080_v1 = vadd.f32 %v3961_v18, %v1079_v25 }
 0x6c1   :  { %v4470_v28 = vpop.f32.mrb[20].mxu1  ;;  %4485 = vmatprep.mubr.msk.f32.mxu0 %vm723_vm10, %v1080_v1 }
 0x6c2   :  { %v1255_v31 = vadd.f32 %v4470_v28, %v3971_v26  ;;  %v1249_v29 = vpop.f32.mrb[21].mxu1  ;;  %4486 = vmatmul.mubr.msk.f32.gmra.mrb[14].mxu0 %vm723_vm10, %v1085_v27 }
 0x6c3   :  { %v1250_v44 = vadd.f32 %v3971_v26, %v1249_v29 }
 0x6c5   :  { %v4853_v30 = vpack.c.bf16 %v1255_v31, %v1250_v44  ;;  %v4473_v2 = vpop.f32.mrb[22].mxu1 }
 0x6c6   :  { %v1265_v32 = vadd.f32 %v4473_v2, %v3971_v26  ;;  %v1259_v33 = vpop.f32.mrb[23].mxu1 }
 0x6c7   :  { %v1260_v34 = vadd.f32 %v3971_v26, %v1259_v33  ;;  %4854 = vmatprep.subr.bf16.mxu1 %v4853_v30 }
 0x6c8   :  { %4856 = vmatpush3.bf16.msra.mxu1 %v4853_v30 }
 0x6c9   :  { %v4857_v35 = vpack.c.bf16 %v1265_v32, %v1260_v34 }
 0x6cb   :  { %4858 = vmatprep.subr.bf16.mxu1 %v4857_v35 }
 0x6cc   :  { %4860 = vmatpush3.bf16.msra.mxu1 %v4857_v35 }
 0x791   :  { %v4484_v36 = vpop.f32.mrb[12].mxu0 }
 0x792   :  { %v1378_v37 = vmul.f32 0.25, %v4484_v36  ;;  %v1358_v38 = vpop.f32.mrb[13].mxu0  ;;  %v1550_v36 = vld [vmem:[#allocation2 + $0x120] sm:$0xff] }
 0x793   :  { %v1377_v41 = vmul.f32 0.25, %v1358_v38  ;;  %v1552_v38 = vld [vmem:[#allocation2 + $0x130] sm:$0xff] }
 0x794   :  { %v1382_v42 = vadd.f32 %v1378_v37, %v5433_v50  ;;  %v1551_v37 = vld [vmem:[#allocation2 + $0x128] sm:$0xff] }
 0x795   :  { %v4487_v43 = vpop.f32.mrb[14].mxu0  ;;  %v1381_v45 = vadd.f32 %v1377_v41, %v5435_v52  ;;  %v4861_v41 = vpack.c.bf16 %v1551_v37, %v1550_v36  ;;  %v1731_v36 = vld [vmem:[#allocation2 + $0x148] sm:$0xff] }
 0x796   :  { %v1380_v46 = vmul.f32 0.25, %v4487_v43  ;;  %v1368_v47 = vpop.f32.mrb[15].mxu0  ;;  %v1388_v48 = vsel %vm334_vm12, %v1382_v42, -inf }
 0x797   :  { %v1379_v49 = vmul.f32 0.25, %v1368_v47  ;;  %1389 = vmax.xlane.f32.xlu0 %v1388_v48  ;;  %v1385_v51 = vsel %vm334_vm12, %v1381_v45, -inf  ;;  %4862 = vmatprep.subr.bf16.mxu1 %v4861_v41 }
 0x798   :  { %1386 = vmax.xlane.f32.xlu1 %v1385_v51  ;;  %v1384_v53 = vadd.f32 %v1380_v46, %v5444_v7 }
 0x799   :  { %v1383_v54 = vadd.f32 %v1379_v49, %v5441_v4 }
 0x79a   :  { %v1394_v55 = vsel %vm334_vm12, %v1384_v53, -inf }
 0x79b   :  { %1395 = vmax.xlane.f32.xlu0 %v1394_v55  ;;  %v1391_v57 = vsel %vm334_vm12, %v1383_v54, -inf }
 0x79c   :  { %1392 = vmax.xlane.f32.xlu1 %v1391_v57 }
 0x824   :  { %v1390_v58 = vpop.xlane.xlu0 %1389 }
 0x825   :  { %v1398_v61 = vsub.f32 %v1382_v42, %v1390_v58  ;;  %v1387_v62 = vpop.xlane.xlu1 %1386  ;;  %v1553_v42 = vld [vmem:[#allocation2 + $0x138] sm:$0xff] }
 0x826   :  { %v1397_v60 = vsub.f32 %v1381_v45, %v1387_v62  ;;  %v4865_v43 = vpack.c.bf16 %v1553_v42, %v1552_v38  ;;  %v1732_v38 = vld [vmem:[#allocation2 + $0x150] sm:$0xff] }
 0x827   :  { %v1403_v63 = vmul.f32 1.442695, %v1398_v61 }
 0x828   :  { %v1401_v3 = vmul.f32 1.442695, %v1397_v60  ;;  %v1396_v5 = vpop.xlane.xlu0 %1395 }
 0x829   :  { %5055 = vpow2.f32 %v1403_v63  ;;  %v1400_v6 = vsub.f32 %v1384_v53, %v1396_v5  ;;  %v1393_v9 = vpop.xlane.xlu1 %1392 }
 0x82a   :  { %5057 = vpow2.f32 %v1401_v3  ;;  %v1399_v10 = vsub.f32 %v1383_v54, %v1393_v9 }
 0x82b   :  { %v1407_v12 = vmul.f32 1.442695, %v1400_v6 }
 0x82c   :  { %v1405_v13 = vmul.f32 1.442695, %v1399_v10 }
 0x82d   :  { %5059 = vpow2.f32 %v1407_v12 }
 0x82e   :  { %5061 = vpow2.f32 %v1405_v13 }
 0x833   :  { %v5056_v18 = vpop.eup %5055 }
 0x834   :  { %v5058_v20 = vpop.eup %5057  ;;  %v1412_v21 = vsel %vm334_vm12, %v5056_v18, 0.0 }
 0x835   :  { %1413 = vadd.xlane.f32.xlu0 %v1412_v21  ;;  %v1409_v22 = vsel %vm334_vm12, %v5058_v20, 0.0 }
 0x836   :  { %1410 = vadd.xlane.f32.xlu1 %v1409_v22 }
 0x837   :  { %v5060_v23 = vpop.eup %5059 }
 0x838   :  { %v5062_v24 = vpop.eup %5061  ;;  %v1418_v25 = vsel %vm334_vm12, %v5060_v23, 0.0 }
 0x839   :  { %1419 = vadd.xlane.f32.xlu0 %v1418_v25  ;;  %v1415_v1 = vsel %vm334_vm12, %v5062_v24, 0.0 }
 0x83a   :  { %1416 = vadd.xlane.f32.xlu1 %v1415_v1 }
 0x8c2   :  { %v1414_v26 = vpop.xlane.xlu0 %1413 }
 0x8c3   :  { %5063 = vrcp.f32 %v1414_v26  ;;  %v1411_v27 = vpop.xlane.xlu1 %1410 }
 0x8c4   :  { %5065 = vrcp.f32 %v1411_v27 }
 0x8c6   :  { %v1420_v28 = vpop.xlane.xlu0 %1419 }
 0x8c7   :  { %5067 = vrcp.f32 %v1420_v28  ;;  %v1417_v31 = vpop.xlane.xlu1 %1416 }
 0x8c8   :  { %5069 = vrcp.f32 %v1417_v31 }
 0x8cd   :  { %v5064_v29 = vpop.eup %5063 }
 0x8ce   :  { %v5066_v44 = vpop.eup %5065  ;;  %v1430_v2 = vmul.f32 %v5064_v29, %v5056_v18 }
 0x8cf   :  { %v1429_v30 = vmul.f32 %v5066_v44, %v5058_v20 }
 0x8d1   :  { %v5068_v32 = vpop.eup %5067  ;;  %4496 = vmatprep.mubr.msk.f32.mxu1 %vm334_vm12, %v1429_v30 }
 0x8d2   :  { %v5070_v33 = vpop.eup %5069  ;;  %4497 = vmatmul.mubr.msk.f32.vlgmr.msra.gmra.mrb[24].mxu1 %vm334_vm12, %v1430_v2  ;;  %v1432_v35 = vmul.f32 %v5068_v32, %v5060_v23 }
 0x8d3   :  { %v1431_v34 = vmul.f32 %v5070_v33, %v5062_v24  ;;  %4864 = vmatpush3.bf16.msra.mxu1 %v4861_v41  ;;  %v1733_v41 = vld [vmem:[#allocation2 + $0x158] sm:$0xff] }
 0x8d4   :  { %4866 = vmatprep.subr.bf16.mxu1 %v4865_v43  ;;  %v4873_v42 = vpack.c.bf16 %v1733_v41, %v1732_v38 }
 0x8d5   :  { %4499 = vmatprep.mubr.msk.f32.mxu1 %vm334_vm12, %v1431_v34 }
 0x8d6   :  { %4500 = vmatmul.mubr.msk.f32.gmra.mrb[26].mxu1 %vm334_vm12, %v1432_v35  ;;  %v1730_v35 = vld [vmem:[#allocation2 + $0x140] sm:$0xff] }
 0x8d7   :  { %4868 = vmatpush3.bf16.msra.mxu1 %v4865_v43  ;;  %v4869_v37 = vpack.c.bf16 %v1731_v36, %v1730_v35 }
 0x8d9   :  { %4870 = vmatprep.subr.bf16.mxu0 %v4869_v37 }
 0x8da   :  { %4872 = vmatpush3.bf16.msra.mxu0 %v4869_v37 }
 0x8db   :  { %4874 = vmatprep.subr.bf16.mxu0 %v4873_v42 }
 0x8de   :  { %4876 = vmatpush3.bf16.msra.mxu0 %v4873_v42 }
 0x9a5   :  { %v4498_v45 = vpop.f32.mrb[24].mxu1 }
 0x9a6   :  { %1536 = vrot.lane.b32.xlu0 %v4498_v45, %s5221_s1  ;;  %v1511_v46 = vpop.f32.mrb[25].mxu1 }
 0x9a7   :  { %1534 = vrot.lane.b32.xlu1 %v1511_v46, %s5221_s1 }
 0x9a9   :  { %v4501_v47 = vpop.f32.mrb[26].mxu1 }
 0x9aa   :  { %v1521_v48 = vpop.f32.mrb[27].mxu1 }
 0x9ab   :  { %1538 = vrot.lane.b32.xlu1 %v1521_v48, %s5221_s1 }
 0x9af   :  { %1540 = vrot.lane.b32.xlu1 %v4501_v47, %s5221_s1 }
 0xa18   :  { %v1537_v49 = vpop.permute.xlu0 %1536 }
 0xa19   :  { %v1535_v51 = vpop.permute.xlu1 %1534  ;;  %v1547_v54 = vsel %vm723_vm10, %v5481_v0, %v1537_v49 }
 0xa1a   :  { %v1546_v53 = vsel %vm723_vm10, %v5483_v15, %v1535_v51  ;;  %v3988_v15 = vld [vmem:[#allocation2 + $0x1a6] ss:$0 sm:$0xff] }
 0xa1b   :  { %4510 = vmatprep.mubr.msk.f32.mxu1 %vm334_vm12, %v1546_v53 }
 0xa1c   :  { %4511 = vmatmul.mubr.msk.f32.vlgmr.msra.gmra.mrb[28].mxu1 %vm334_vm12, %v1547_v54 }
 0xa1d   :  { %v1539_v55 = vpop.permute.xlu1 %1538 }
 0xa1e   :  { %v1548_v57 = vsel %vm723_vm10, %v5487_v17, %v1539_v55 }
 0xa1f   :  { %4513 = vmatprep.mubr.msk.f32.mxu1 %vm334_vm12, %v1548_v57 }
 0xa21   :  { %v1541_v58 = vpop.permute.xlu1 %1540 }
 0xa22   :  { %v1549_v61 = vsel %vm723_vm10, %v5485_v16, %v1541_v58 }
 0xa23   :  { %4514 = vmatmul.mubr.msk.f32.gmra.mrb[30].mxu1 %vm334_vm12, %v1549_v61 }
 0xaef   :  { %v4512_v62 = vpop.f32.mrb[28].mxu1 }
 0xaf0   :  { %v1643_v60 = vadd.f32 %v4512_v62, %v3988_v15  ;;  %v1637_v0 = vpop.f32.mrb[29].mxu1 }
 0xaf1   :  { %v1638_v63 = vadd.f32 %v3988_v15, %v1637_v0 }
 0xaf2   :  { %v1657_v3 = vadd.f32 %v1643_v60, %v5372_v40 }
 0xaf3   :  { %v1656_v5 = vadd.f32 %v1638_v63, %v5370_v39  ;;  %v3994_v63 = vld [vmem:[#allocation2 + $0x1aa] ss:$0 sm:$0xff] }
 0xaf4   :  { %v1665_v6 = vsel %vm334_vm12, %v1657_v3, 0.0 }
 0xaf5   :  { %1666 = vadd.xlane.f32.xlu1 %v1665_v6  ;;  %v1662_v17 = vsel %vm334_vm12, %v1656_v5, 0.0 }
 0xaf6   :  { %1663 = vadd.xlane.f32.xlu0 %v1662_v17  ;;  %v4515_v9 = vpop.f32.mrb[30].mxu1 }
 0xaf7   :  { %v1647_v10 = vpop.f32.mrb[31].mxu1  ;;  %v1653_v16 = vadd.f32 %v4515_v9, %v3988_v15 }
 0xaf8   :  { %v1648_v12 = vadd.f32 %v3988_v15, %v1647_v10  ;;  %v3993_v15 = vld [vmem:[#allocation2 + $0x1a9] ss:$0 sm:$0xff] }
 0xaf9   :  { %v1659_v20 = vadd.f32 %v1653_v16, %v5384_v59 }
 0xafa   :  { %v1658_v13 = vadd.f32 %v1648_v12, %v5379_v56 }
 0xafb   :  { %v1671_v40 = vsel %vm334_vm12, %v1659_v20, 0.0 }
 0xafc   :  { %v1668_v18 = vsel %vm334_vm12, %v1658_v13, 0.0 }
 0xafd   :  { %1669 = vadd.xlane.f32.xlu0 %v1668_v18 }
 0xb01   :  { %1672 = vadd.xlane.f32.xlu0 %v1671_v40 }
 0xb82   :  { %v1667_v39 = vpop.xlane.xlu1 %1666 }
 0xb83   :  { %v1675_v21 = vmul.f32 0.03125, %v1667_v39  ;;  %v1664_v22 = vpop.xlane.xlu0 %1663  ;;  %v1944_v39 = vld [vmem:[#allocation2 + $0x160] sm:$0xff] }
 0xb84   :  { %v1674_v23 = vmul.f32 0.03125, %v1664_v22 }
 0xb85   :  { %v1679_v24 = vsub.f32 %v1657_v3, %v1675_v21  ;;  %v1945_v21 = vld [vmem:[#allocation2 + $0x168] sm:$0xff] }
 0xb86   :  { %v1678_v25 = vsub.f32 %v1656_v5, %v1674_v23  ;;  %v4877_v22 = vpack.c.bf16 %v1945_v21, %v1944_v39  ;;  %v1946_v23 = vld [vmem:[#allocation2 + $0x170] sm:$0xff] }
 0xb87   :  { %v1683_v1 = vmul.f32 %v1679_v24, %v1679_v24 }
 0xb88   :  { %v1682_v26 = vmul.f32 %v1678_v25, %v1678_v25  ;;  %4878 = vmatprep.subr.bf16.mxu1 %v4877_v22 }
 0xb89   :  { %v1689_v27 = vsel %vm334_vm12, %v1683_v1, 0.0  ;;  %4880 = vmatpush3.bf16.msra.mxu1 %v4877_v22  ;;  %v1948_v1 = vld [vmem:[#allocation2 + $0x180] sm:$0xff] }
 0xb8a   :  { %v1670_v28 = vpop.xlane.xlu0 %1669  ;;  %1690 = vadd.xlane.f32.xlu0 %v1689_v27  ;;  %v1686_v56 = vsel %vm334_vm12, %v1682_v26, 0.0  ;;  %v1949_v26 = vld [vmem:[#allocation2 + $0x188] sm:$0xff] }
 0xb8b   :  { %v1676_v31 = vmul.f32 0.03125, %v1670_v28  ;;  %1687 = vadd.xlane.f32.xlu1 %v1686_v56  ;;  %v4885_v27 = vpack.c.bf16 %v1949_v26, %v1948_v1  ;;  %v1950_v28 = vld [vmem:[#allocation2 + $0x190] sm:$0xff]  ;;  %v1951_v56 = vld [vmem:[#allocation2 + $0x198] sm:$0xff] }
 0xb8d   :  { %v1680_v59 = vsub.f32 %v1658_v13, %v1676_v31  ;;  %v4889_v31 = vpack.c.bf16 %v1951_v56, %v1950_v28 }
 0xb8e   :  { %v1673_v29 = vpop.xlane.xlu0 %1672 }
 0xb8f   :  { %v1677_v44 = vmul.f32 0.03125, %v1673_v29  ;;  %v1684_v30 = vmul.f32 %v1680_v59, %v1680_v59 }
 0xb91   :  { %v1681_v2 = vsub.f32 %v1659_v20, %v1677_v44  ;;  %v1692_v32 = vsel %vm334_vm12, %v1684_v30, 0.0 }
 0xb92   :  { %1693 = vadd.xlane.f32.xlu1 %v1692_v32 }
 0xb93   :  { %v1685_v33 = vmul.f32 %v1681_v2, %v1681_v2 }
 0xb95   :  { %v1695_v34 = vsel %vm334_vm12, %v1685_v33, 0.0 }
 0xb96   :  { %1696 = vadd.xlane.f32.xlu0 %v1695_v34 }
 0xc17   :  { %v1691_v43 = vpop.xlane.xlu0 %1690 }
 0xc18   :  { %v1699_v45 = vmul.f32 0.03125, %v1691_v43  ;;  %v1688_v46 = vpop.xlane.xlu1 %1687 }
 0xc19   :  { %v1698_v47 = vmul.f32 0.03125, %v1688_v46 }
 0xc1a   :  { %v1703_v48 = vadd.f32 1e-12, %v1699_v45 }
 0xc1b   :  { %v1702_v49 = vadd.f32 1e-12, %v1698_v47 }
 0xc1c   :  { %5071 = vrsqrt.f32 %v1703_v48 }
 0xc1d   :  { %5073 = vrsqrt.f32 %v1702_v49 }
 0xc1f   :  { %v1694_v51 = vpop.xlane.xlu1 %1693 }
 0xc20   :  { %v1700_v53 = vmul.f32 0.03125, %v1694_v51 }
 0xc22   :  { %v1704_v54 = vadd.f32 1e-12, %v1700_v53 }
 0xc23   :  { %v1697_v55 = vpop.xlane.xlu0 %1696 }
 0xc24   :  { %5075 = vrsqrt.f32 %v1704_v54  ;;  %v1701_v57 = vmul.f32 0.03125, %v1697_v55 }
 0xc26   :  { %v5072_v58 = vpop.eup %5071  ;;  %v1705_v61 = vadd.f32 1e-12, %v1701_v57 }
 0xc27   :  { %v5074_v62 = vpop.eup %5073  ;;  %v1711_v60 = vmul.f32 %v5072_v58, %v1679_v24  ;;  %v1947_v24 = vld [vmem:[#allocation2 + $0x178] sm:$0xff] }
 0xc28   :  { %5077 = vrsqrt.f32 %v1705_v61  ;;  %v1710_v0 = vmul.f32 %v5074_v62, %v1678_v25  ;;  %v4881_v25 = vpack.c.bf16 %v1947_v24, %v1946_v23 }
 0xc29   :  { %v1719_v3 = vmul.f32 %v3993_v15, %v1711_v60 }
 0xc2a   :  { %v1718_v5 = vmul.f32 %v3993_v15, %v1710_v0  ;;  %4882 = vmatprep.subr.bf16.mxu1 %v4881_v25 }
 0xc2b   :  { %v5539_v17 = vadd.f32 %v3994_v63, %v1719_v3  ;;  %4884 = vmatpush3.bf16.msra.mxu1 %v4881_v25 }
 0xc2c   :  { %v5537_v6 = vadd.f32 %v3994_v63, %v1718_v5  ;;  %4886 = vmatprep.subr.bf16.mxu1 %v4885_v27 }
 0xc2e   :  { %v5076_v9 = vpop.eup %5075  ;;  %4524 = vmatprep.mubr.msk.f32.mxu0 %vm334_vm12, %v5537_v6 }
 0xc2f   :  { %4525 = vmatmul.mubr.msk.f32.vlgmr.msra.gmra.mrb[16].mxu0 %vm334_vm12, %v5539_v17  ;;  %v1712_v10 = vmul.f32 %v5076_v9, %v1680_v59  ;;  %4888 = vmatpush3.bf16.msra.mxu1 %v4885_v27  ;;  %v3995_v59 = vld [vmem:[#allocation2 + $0x1a7] ss:$0 sm:$0xff] }
 0xc30   :  { %4890 = vmatprep.subr.bf16.mxu1 %v4889_v31 }
 0xc31   :  { %v1720_v16 = vmul.f32 %v3993_v15, %v1712_v10 }
 0xc32   :  { %v5078_v12 = vpop.eup %5077 }
 0xc33   :  { %v5545_v13 = vadd.f32 %v3994_v63, %v1720_v16  ;;  %v1713_v18 = vmul.f32 %v5078_v12, %v1681_v2  ;;  %4892 = vmatpush3.bf16.msra.mxu1 %v4889_v31 }
 0xc35   :  { %4527 = vmatprep.mubr.msk.f32.mxu0 %vm334_vm12, %v5545_v13  ;;  %v1721_v20 = vmul.f32 %v3993_v15, %v1713_v18 }
 0xc37   :  { %v5549_v40 = vadd.f32 %v3994_v63, %v1721_v20 }
 0xc39   :  { %4528 = vmatmul.mubr.msk.f32.gmra.mrb[18].mxu0 %vm334_vm12, %v5549_v40 }
 0xd02   :  { %v4526_v29 = vpop.f32.mrb[16].mxu0 }
 0xd03   :  { %v5553_v44 = vadd.f32 %v4526_v29, %v3995_v59  ;;  %v1817_v30 = vpop.f32.mrb[17].mxu0 }
 0xd04   :  { %v5555_v2 = vadd.f32 %v3995_v59, %v1817_v30 }
 0xd05   :  { %v5558_v32 = vmul.f32 0.70710677, %v5553_v44 }
 0xd06   :  { %v5561_v33 = vmul.f32 0.70710677, %v5555_v2 }
 0xd07   :  { %v1841_v34 = vand.u32 2147483647, %v5558_v32  ;;  %vm1921_vm1 = vcmp.ge.f32.partialorder %v5558_v32, 0.0 }
 0xd08   :  { %v1840_v35 = vand.u32 2147483647, %v5561_v33  ;;  %vm1920_vm2 = vcmp.ge.f32.partialorder %v5561_v33, 0.0 }
 0xd09   :  { %v1845_v36 = vmul.f32 0.3275911, %v1841_v34  ;;  %v1897_v53 = vsub.f32 0.0, %v1841_v34 }
 0xd0a   :  { %v1844_v37 = vmul.f32 0.3275911, %v1840_v35  ;;  %v1896_v55 = vsub.f32 0.0, %v1840_v35 }
 0xd0b   :  { %v1849_v38 = vadd.f32 1.0, %v1845_v36  ;;  %v1901_v62 = vmul.f32 %v1897_v53, %v1841_v34 }
 0xd0c   :  { %v1848_v41 = vadd.f32 1.0, %v1844_v37  ;;  %v4529_v42 = vpop.f32.mrb[18].mxu0  ;;  %v1900_v63 = vmul.f32 %v1896_v55, %v1840_v35 }
 0xd0d   :  { %5079 = vrcp.f32 %v1849_v38  ;;  %v5565_v43 = vadd.f32 %v4529_v42, %v3995_v59  ;;  %v1827_v45 = vpop.f32.mrb[19].mxu0  ;;  %v1906_v9 = vmul.f32 1.442695, %v1901_v62 }
 0xd0e   :  { %5081 = vrcp.f32 %v1848_v41  ;;  %v5567_v46 = vadd.f32 %v3995_v59, %v1827_v45  ;;  %v1904_v12 = vmul.f32 1.442695, %v1900_v63 }
 0xd0f   :  { %v5570_v47 = vmul.f32 0.70710677, %v5565_v43 }
 0xd10   :  { %v5573_v48 = vmul.f32 0.70710677, %v5567_v46 }
 0xd11   :  { %v1843_v49 = vand.u32 2147483647, %v5570_v47  ;;  %vm1923_vm4 = vcmp.ge.f32.partialorder %v5570_v47, 0.0 }
 0xd12   :  { %v1842_v51 = vand.u32 2147483647, %v5573_v48  ;;  %vm1922_vm5 = vcmp.ge.f32.partialorder %v5573_v48, 0.0 }
 0xd13   :  { %v1847_v54 = vmul.f32 0.3275911, %v1843_v49  ;;  %v1899_v20 = vsub.f32 0.0, %v1843_v49 }
 0xd14   :  { %v1846_v57 = vmul.f32 0.3275911, %v1842_v51  ;;  %v1898_v21 = vsub.f32 0.0, %v1842_v51 }
 0xd15   :  { %v1851_v58 = vadd.f32 1.0, %v1847_v54  ;;  %v1903_v1 = vmul.f32 %v1899_v20, %v1843_v49 }
 0xd16   :  { %v1850_v61 = vadd.f32 1.0, %v1846_v57  ;;  %v1902_v56 = vmul.f32 %v1898_v21, %v1842_v51 }
 0xd17   :  { %v5080_v15 = vpop.eup %5079  ;;  %5083 = vrcp.f32 %v1851_v58  ;;  %v1910_v35 = vmul.f32 1.442695, %v1903_v1 }
 0xd18   :  { %v5082_v60 = vpop.eup %5081  ;;  %v1861_v0 = vmul.f32 1.0614054, %v5080_v15  ;;  %5085 = vrcp.f32 %v1850_v61  ;;  %v1908_v41 = vmul.f32 1.442695, %v1902_v56 }
 0xd19   :  { %v1860_v3 = vmul.f32 1.0614054, %v5082_v60  ;;  %5087 = vpow2.f32 %v1906_v9 }
 0xd1a   :  { %v4001_v5 = vadd.f32 -1.4531521, %v1861_v0  ;;  %5089 = vpow2.f32 %v1904_v12 }
 0xd1b   :  { %v4000_v10 = vadd.f32 -1.4531521, %v1860_v3  ;;  %5091 = vpow2.f32 %v1910_v35  ;;  %v1934_v35 = vmul.f32 0.5, %v5567_v46 }
 0xd1c   :  { %v1869_v16 = vmul.f32 %v5080_v15, %v4001_v5  ;;  %5093 = vpow2.f32 %v1908_v41 }
 0xd1d   :  { %v1868_v18 = vmul.f32 %v5082_v60, %v4000_v10 }
 0xd1e   :  { %v1873_v39 = vadd.f32 1.4214138, %v1869_v16 }
 0xd1f   :  { %v1872_v22 = vadd.f32 1.4214138, %v1868_v18 }
 0xd20   :  { %v1877_v23 = vmul.f32 %v5080_v15, %v1873_v39 }
 0xd21   :  { %v5084_v24 = vpop.eup %5083  ;;  %v1876_v25 = vmul.f32 %v5082_v60, %v1872_v22  ;;  %v1932_v22 = vmul.f32 0.5, %v5555_v2 }
 0xd22   :  { %v5086_v26 = vpop.eup %5085  ;;  %v4005_v27 = vadd.f32 -0.28449672, %v1877_v23  ;;  %v1863_v28 = vmul.f32 1.0614054, %v5084_v24 }
 0xd23   :  { %v4004_v31 = vadd.f32 -0.28449672, %v1876_v25  ;;  %v1862_v59 = vmul.f32 1.0614054, %v5086_v26  ;;  %v5088_v55 = vpop.eup %5087 }
 0xd24   :  { %v1885_v29 = vmul.f32 %v5080_v15, %v4005_v27  ;;  %v4003_v30 = vadd.f32 -1.4531521, %v1863_v28  ;;  %v5090_v58 = vpop.eup %5089  ;;  %v1933_v27 = vmul.f32 0.5, %v5553_v44 }
 0xd25   :  { %v1884_v34 = vmul.f32 %v5082_v60, %v4004_v31  ;;  %v4002_v36 = vadd.f32 -1.4531521, %v1862_v59  ;;  %v5092_v1 = vpop.eup %5091 }
 0xd26   :  { %v1889_v37 = vadd.f32 0.2548296, %v1885_v29  ;;  %v1871_v38 = vmul.f32 %v5084_v24, %v4003_v30  ;;  %v5094_v56 = vpop.eup %5093 }
 0xd27   :  { %v1888_v42 = vadd.f32 0.2548296, %v1884_v34  ;;  %v1870_v45 = vmul.f32 %v5086_v26, %v4002_v36 }
 0xd28   :  { %v1893_v53 = vmul.f32 %v5080_v15, %v1889_v37  ;;  %v1875_v54 = vadd.f32 1.4214138, %v1871_v38  ;;  %v1935_v37 = vmul.f32 0.5, %v5565_v43 }
 0xd29   :  { %v1892_v49 = vmul.f32 %v5082_v60, %v1888_v42  ;;  %v1874_v57 = vadd.f32 1.4214138, %v1870_v45  ;;  %v4008_v42 = vld [vmem:[#allocation2 + $0x1a8] ss:$0 sm:$0xff] }
 0xd2a   :  { %v1913_v51 = vmul.f32 %v5088_v55, %v1893_v53  ;;  %v1879_v61 = vmul.f32 %v5084_v24, %v1875_v54 }
 0xd2b   :  { %v1912_v62 = vmul.f32 %v5090_v58, %v1892_v49  ;;  %v1878_v0 = vmul.f32 %v5086_v26, %v1874_v57 }
 0xd2c   :  { %v1917_v63 = vsub.f32 1.0, %v1913_v51  ;;  %v4007_v3 = vadd.f32 -0.28449672, %v1879_v61 }
 0xd2d   :  { %v1916_v5 = vsub.f32 1.0, %v1912_v62  ;;  %v4006_v9 = vadd.f32 -0.28449672, %v1878_v0 }
 0xd2e   :  { %v1925_v10 = vsub.f32 0.0, %v1917_v63  ;;  %v1887_v16 = vmul.f32 %v5084_v24, %v4007_v3 }
 0xd2f   :  { %v1924_v15 = vsub.f32 0.0, %v1916_v5  ;;  %v1886_v12 = vmul.f32 %v5086_v26, %v4006_v9 }
 0xd30   :  { %v1929_v18 = vsel %vm1921_vm1, %v1917_v63, %v1925_v10  ;;  %v1891_v60 = vadd.f32 0.2548296, %v1887_v16 }
 0xd31   :  { %v1937_v20 = vadd.f32 1.0, %v1929_v18  ;;  %v1928_v39 = vsel %vm1920_vm2, %v1916_v5, %v1924_v15  ;;  %v1890_v21 = vadd.f32 0.2548296, %v1886_v12 }
 0xd32   :  { %v1936_v23 = vadd.f32 1.0, %v1928_v39  ;;  %v1895_v25 = vmul.f32 %v5084_v24, %v1891_v60 }
 0xd33   :  { %v1894_v28 = vmul.f32 %v5086_v26, %v1890_v21  ;;  %v1941_v59 = vmul.f32 %v1937_v20, %v1933_v27  ;;  %v2129_v27 = vld [vmem:[#allocation2 + $0x1b0] sm:$0xff] }
 0xd34   :  { %v1940_v32 = vmul.f32 %v1936_v23, %v1932_v22  ;;  %v1915_v31 = vmul.f32 %v5092_v1, %v1895_v25 }
 0xd35   :  { %v1914_v29 = vmul.f32 %v5094_v56, %v1894_v28  ;;  %v2130_v28 = vld [vmem:[#allocation2 + $0x1b8] sm:$0xff]  ;;  %v2137_v56 = vld [vmem:[#allocation2 + $0x230] sm:$0xff] }
 0xd36   :  { %v1919_v30 = vsub.f32 1.0, %v1915_v31  ;;  %4546 = vmatprep.mubr.msk.f32.mxu1 %vm1957_vm3, %v1940_v32  ;;  %v4893_v32 = vpack.c.bf16 %v2130_v28, %v2129_v27  ;;  %v2138_v31 = vld [vmem:[#allocation2 + $0x238] sm:$0xff] }
 0xd37   :  { %v1918_v33 = vsub.f32 1.0, %v1914_v29  ;;  %4547 = vmatmul.mubr.msk.f32.vlgmr.msra.gmra.mrb[32].mxu1 %vm1957_vm3, %v1941_v59  ;;  %v4909_v59 = vpack.c.bf16 %v2138_v31, %v2137_v56  ;;  %v2131_v29 = vld [vmem:[#allocation2 + $0x1c0] sm:$0xff] }
 0xd38   :  { %v1927_v34 = vsub.f32 0.0, %v1919_v30  ;;  %4894 = vmatprep.subr.bf16.mxu0 %v4893_v32 }
 0xd39   :  { %v1926_v2 = vsub.f32 0.0, %v1918_v33  ;;  %4910 = vmatprep.subr.bf16.mxu1 %v4909_v59  ;;  %4896 = vmatpush3.bf16.msra.mxu0 %v4893_v32 }
 0xd3a   :  { %v1931_v24 = vsel %vm1923_vm4, %v1919_v30, %v1927_v34  ;;  %v2132_v30 = vld [vmem:[#allocation2 + $0x1c8] sm:$0xff]  ;;  %4912 = vmatpush3.bf16.msra.mxu1 %v4909_v59 }
 0xd3b   :  { %v1939_v44 = vadd.f32 1.0, %v1931_v24  ;;  %v1930_v26 = vsel %vm1922_vm5, %v1918_v33, %v1926_v2  ;;  %v2139_v33 = vld [vmem:[#allocation2 + $0x240] sm:$0xff]  ;;  %v4897_v34 = vpack.c.bf16 %v2132_v30, %v2131_v29  ;;  %v2140_v2 = vld [vmem:[#allocation2 + $0x248] sm:$0xff] }
 0xd3c   :  { %v1938_v36 = vadd.f32 1.0, %v1930_v26  ;;  %v4913_v24 = vpack.c.bf16 %v2140_v2, %v2139_v33  ;;  %v2134_v26 = vld [vmem:[#allocation2 + $0x1f8] sm:$0xff]  ;;  %v4020_v33 = vld [vmem:[#allocation2 + $0x2f2] ss:$0 sm:$0xff] }
 0xd3d   :  { %v1943_v41 = vmul.f32 %v1939_v44, %v1935_v37  ;;  %4898 = vmatprep.subr.bf16.mxu0 %v4897_v34  ;;  %v2133_v44 = vld [vmem:[#allocation2 + $0x1f0] sm:$0xff] }
 0xd3e   :  { %v1942_v38 = vmul.f32 %v1938_v36, %v1934_v35  ;;  %4914 = vmatprep.subr.bf16.mxu1 %v4913_v24  ;;  %4900 = vmatpush3.bf16.msra.mxu0 %v4897_v34  ;;  %v4901_v35 = vpack.c.bf16 %v2134_v26, %v2133_v44 }
 0xd3f   :  { %4916 = vmatpush3.bf16.msra.mxu1 %v4913_v24 }
 0xd40   :  { %4549 = vmatprep.mubr.msk.f32.mxu1 %vm1957_vm3, %v1942_v38  ;;  %4902 = vmatprep.subr.bf16.mxu0 %v4901_v35 }
 0xd41   :  { %4550 = vmatmul.mubr.msk.f32.gmra.mrb[34].mxu1 %vm1957_vm3, %v1943_v41 }
 0xe0a   :  { %v4548_v45 = vpop.f32.mrb[32].mxu1 }
 0xe0b   :  { %v2042_v47 = vadd.f32 %v4548_v45, %v4008_v42  ;;  %v2036_v53 = vpop.f32.mrb[33].mxu1 }
 0xe0c   :  { %v2037_v54 = vadd.f32 %v4008_v42, %v2036_v53 }
 0xe0d   :  { %v2056_v48 = vadd.f32 %v2042_v47, %v5539_v17 }
 0xe0e   :  { %v2055_v55 = vadd.f32 %v2037_v54, %v5537_v6 }
 0xe0f   :  { %v2064_v46 = vsel %vm334_vm12, %v2056_v48, 0.0 }
 0xe10   :  { %2065 = vadd.xlane.f32.xlu0 %v2064_v46  ;;  %v2061_v43 = vsel %vm334_vm12, %v2055_v55, 0.0 }
 0xe11   :  { %2062 = vadd.xlane.f32.xlu1 %v2061_v43 }
 0xe14   :  { %v4551_v49 = vpop.f32.mrb[34].mxu1 }
 0xe15   :  { %v2052_v57 = vadd.f32 %v4551_v49, %v4008_v42  ;;  %v2046_v58 = vpop.f32.mrb[35].mxu1  ;;  %v4013_v49 = vld [vmem:[#allocation2 + $0x1ab] ss:$0 sm:$0xff] }
 0xe16   :  { %v2047_v51 = vadd.f32 %v4008_v42, %v2046_v58 }
 0xe17   :  { %v2058_v61 = vadd.f32 %v2052_v57, %v5549_v40 }
 0xe18   :  { %v2057_v62 = vadd.f32 %v2047_v51, %v5545_v13 }
 0xe19   :  { %v2070_v0 = vsel %vm334_vm12, %v2058_v61, 0.0 }
 0xe1a   :  { %2071 = vadd.xlane.f32.xlu0 %v2070_v0  ;;  %v2067_v17 = vsel %vm334_vm12, %v2057_v62, 0.0 }
 0xe1b   :  { %2068 = vadd.xlane.f32.xlu1 %v2067_v17  ;;  %v2135_v17 = vld [vmem:[#allocation2 + $0x200] sm:$0xff] }
 0xe9d   :  { %v2066_v6 = vpop.xlane.xlu0 %2065 }
 0xe9e   :  { %v2074_v63 = vmul.f32 0.03125, %v2066_v6  ;;  %v2063_v3 = vpop.xlane.xlu1 %2062  ;;  %v2136_v6 = vld [vmem:[#allocation2 + $0x208] sm:$0xff] }
 0xe9f   :  { %v2073_v5 = vmul.f32 0.03125, %v2063_v3 }
 0xea0   :  { %v2078_v9 = vsub.f32 %v2056_v48, %v2074_v63 }
 0xea1   :  { %v5597_v10 = vsub.f32 %v2055_v55, %v2073_v5  ;;  %v4905_v5 = vpack.c.bf16 %v2136_v6, %v2135_v17 }
 0xea2   :  { %v2082_v16 = vmul.f32 %v2078_v9, %v2078_v9 }
 0xea3   :  { %v2081_v15 = vmul.f32 %v5597_v10, %v5597_v10 }
 0xea4   :  { %v2088_v40 = vsel %vm334_vm12, %v2082_v16, 0.0 }
 0xea5   :  { %2089 = vadd.xlane.f32.xlu0 %v2088_v40  ;;  %v2085_v13 = vsel %vm334_vm12, %v2081_v15, 0.0 }
 0xea6   :  { %2086 = vadd.xlane.f32.xlu1 %v2085_v13 }
 0xea7   :  { %v2072_v12 = vpop.xlane.xlu0 %2071 }
 0xea8   :  { %v2076_v18 = vmul.f32 0.03125, %v2072_v12  ;;  %v2069_v60 = vpop.xlane.xlu1 %2068 }
 0xea9   :  { %v2075_v20 = vmul.f32 0.03125, %v2069_v60  ;;  %v4025_v60 = vld [vmem:[#allocation2 + $0x2f4] ss:$0 sm:$0xff] }
 0xeaa   :  { %v5603_v39 = vsub.f32 %v2058_v61, %v2076_v18  ;;  %v4014_v61 = vld [vmem:[#allocation2 + $0x1ac] ss:$0 sm:$0xff] }
 0xeab   :  { %v5605_v21 = vsub.f32 %v2057_v62, %v2075_v20  ;;  %v4015_v20 = vld [vmem:[#allocation2 + $0x2f0] ss:$0 sm:$0xff] }
 0xeac   :  { %v2084_v22 = vmul.f32 %v5603_v39, %v5603_v39 }
 0xead   :  { %v2083_v23 = vmul.f32 %v5605_v21, %v5605_v21 }
 0xeae   :  { %v2094_v25 = vsel %vm334_vm12, %v2084_v22, 0.0 }
 0xeaf   :  { %2095 = vadd.xlane.f32.xlu0 %v2094_v25  ;;  %v2091_v1 = vsel %vm334_vm12, %v2083_v23, 0.0 }
 0xeb0   :  { %2092 = vadd.xlane.f32.xlu1 %v2091_v1 }
 0xf32   :  { %v2090_v36 = vpop.xlane.xlu0 %2089 }
 0xf33   :  { %v2098_v37 = vmul.f32 0.03125, %v2090_v36  ;;  %v2087_v38 = vpop.xlane.xlu1 %2086 }
 0xf34   :  { %v2097_v41 = vmul.f32 0.03125, %v2087_v38 }
 0xf35   :  { %v2102_v42 = vadd.f32 1e-12, %v2098_v37 }
 0xf36   :  { %v2101_v45 = vadd.f32 1e-12, %v2097_v41 }
 0xf37   :  { %5095 = vrsqrt.f32 %v2102_v42 }
 0xf38   :  { %5097 = vrsqrt.f32 %v2101_v45  ;;  %v2689_v45 = vld [vmem:[#allocation2 + $0x210] sm:$0xff] }
 0xf3c   :  { %v2096_v47 = vpop.xlane.xlu0 %2095 }
 0xf3d   :  { %v2100_v53 = vmul.f32 0.03125, %v2096_v47  ;;  %v2093_v54 = vpop.xlane.xlu1 %2092  ;;  %v2690_v47 = vld [vmem:[#allocation2 + $0x218] sm:$0xff] }
 0xf3e   :  { %v2099_v48 = vmul.f32 0.03125, %v2093_v54  ;;  %v2691_v54 = vld [vmem:[#allocation2 + $0x220] sm:$0xff] }
 0xf3f   :  { %v2104_v55 = vadd.f32 1e-12, %v2100_v53  ;;  %v4945_v53 = vpack.c.bf16 %v2690_v47, %v2689_v45 }
 0xf40   :  { %v2103_v46 = vadd.f32 1e-12, %v2099_v48  ;;  %v2692_v48 = vld [vmem:[#allocation2 + $0x228] sm:$0xff] }
 0xf41   :  { %v5096_v43 = vpop.eup %5095  ;;  %5099 = vrsqrt.f32 %v2104_v55 }
 0xf42   :  { %v5098_v57 = vpop.eup %5097  ;;  %v2110_v58 = vmul.f32 %v5096_v43, %v2078_v9  ;;  %5101 = vrsqrt.f32 %v2103_v46  ;;  %v4949_v46 = vpack.c.bf16 %v2692_v48, %v2691_v54  ;;  %v2685_v54 = vld [vmem:[#allocation2 + $0x1d0] sm:$0xff]  ;;  %v2686_v48 = vld [vmem:[#allocation2 + $0x1d8] sm:$0xff] }
 0xf43   :  { %v2109_v51 = vmul.f32 %v5098_v57, %v5597_v10 }
 0xf44   :  { %v2118_v62 = vmul.f32 %v4013_v49, %v2110_v58 }
 0xf45   :  { %v2117_v0 = vmul.f32 %v4013_v49, %v2109_v51 }
 0xf46   :  { %v5616_v3 = vadd.f32 %v4014_v61, %v2118_v62 }
 0xf47   :  { %v5614_v63 = vadd.f32 %v4014_v61, %v2117_v0 }
 0xf49   :  { %4560 = vmatprep.mubr.msk.f32.mxu0 %vm334_vm12, %v5614_v63  ;;  %4588 = vmatprep.mubr.msk.f32.mxu1 %vm334_vm12, %v5614_v63 }
 0xf4a   :  { %4561 = vmatmul.mubr.msk.f32.vlgmr.msra.gmra.mrb[20].mxu0 %vm334_vm12, %v5616_v3  ;;  %4589 = vmatmul.mubr.msk.f32.vlgmr.msra.gmra.mrb[36].mxu1 %vm334_vm12, %v5616_v3 }
 0xf4b   :  { %v5100_v9 = vpop.eup %5099  ;;  %4904 = vmatpush3.bf16.msra.mxu0 %v4901_v35 }
 0xf4c   :  { %v5102_v10 = vpop.eup %5101  ;;  %v2112_v16 = vmul.f32 %v5100_v9, %v5603_v39  ;;  %4906 = vmatprep.subr.bf16.mxu0 %v4905_v5 }
 0xf4d   :  { %v2111_v15 = vmul.f32 %v5102_v10, %v5605_v21 }
 0xf4e   :  { %v2120_v40 = vmul.f32 %v4013_v49, %v2112_v16 }
 0xf4f   :  { %v2119_v13 = vmul.f32 %v4013_v49, %v2111_v15  ;;  %4908 = vmatpush3.bf16.msra.mxu0 %v4905_v5  ;;  %v4047_v15 = vld [vmem:[#allocation2 + $0x2f3] ss:$0 sm:$0xff] }
 0xf50   :  { %v5630_v18 = vadd.f32 %v4014_v61, %v2120_v40 }
 0xf51   :  { %v5628_v12 = vadd.f32 %v4014_v61, %v2119_v13 }
 0xf53   :  { %4563 = vmatprep.mubr.msk.f32.mxu0 %vm334_vm12, %v5628_v12  ;;  %4591 = vmatprep.mubr.msk.f32.mxu1 %vm334_vm12, %v5628_v12 }
 0xf54   :  { %4564 = vmatmul.mubr.msk.f32.gmra.mrb[22].mxu0 %vm334_vm12, %v5630_v18  ;;  %4592 = vmatmul.mubr.msk.f32.gmra.mrb[38].mxu1 %vm334_vm12, %v5630_v18 }
 0xf55   :  { %4574 = vmatprep.mubr.msk.f32.mxu0 %vm334_vm12, %v5614_v63 }
 0xf58   :  { %4575 = vmatmul.mubr.msk.f32.vlgmr.msra.gmra.mrb[24].mxu0 %vm334_vm12, %v5616_v3 }
 0xf59   :  { %4577 = vmatprep.mubr.msk.f32.mxu0 %vm334_vm12, %v5628_v12 }
 0xf5c   :  { %4578 = vmatmul.mubr.msk.f32.gmra.mrb[26].mxu0 %vm334_vm12, %v5630_v18 }
0x101d   :  { %v4562_v39 = vpop.f32.mrb[20].mxu0  ;;  %v4590_v21 = vpop.f32.mrb[36].mxu1 }
0x101e   :  { %v2410_v22 = vadd.f32 %v4590_v21, %v4025_v60  ;;  %v2224_v23 = vpop.f32.mrb[21].mxu0  ;;  %v2404_v25 = vpop.f32.mrb[37].mxu1  ;;  %v2230_v55 = vadd.f32 %v4562_v39, %v4015_v20 }
0x101f   :  { %v2225_v1 = vadd.f32 %v4015_v20, %v2224_v23  ;;  %v2405_v27 = vadd.f32 %v4025_v60, %v2404_v25 }
0x1021   :  { %v4929_v28 = vpack.c.bf16 %v2410_v22, %v2405_v27  ;;  %4602 = vmatprep.mubr.msk.f32.mxu0 %vm723_vm10, %v2225_v1 }
0x1023   :  { %4930 = vmatprep.subr.bf16.mxu1 %v4929_v28 }
0x1024   :  { %4932 = vmatpush3.bf16.msra.mxu1 %v4929_v28 }
0x1027   :  { %v4565_v56 = vpop.f32.mrb[22].mxu0  ;;  %v4593_v32 = vpop.f32.mrb[38].mxu1 }
0x1028   :  { %v2420_v31 = vadd.f32 %v4593_v32, %v4025_v60  ;;  %v2234_v59 = vpop.f32.mrb[23].mxu0  ;;  %v2414_v29 = vpop.f32.mrb[39].mxu1  ;;  %v2240_v49 = vadd.f32 %v4565_v56, %v4015_v20 }
0x1029   :  { %v2415_v30 = vadd.f32 %v4025_v60, %v2414_v29  ;;  %v2235_v43 = vadd.f32 %v4015_v20, %v2234_v59 }
0x102b   :  { %v4933_v34 = vpack.c.bf16 %v2420_v31, %v2415_v30  ;;  %v4576_v2 = vpop.f32.mrb[24].mxu0 }
0x102c   :  { %v2320_v24 = vadd.f32 %v4576_v2, %v4020_v33  ;;  %v2314_v44 = vpop.f32.mrb[25].mxu0 }
0x102d   :  { %v2315_v26 = vadd.f32 %v4020_v33, %v2314_v44  ;;  %4934 = vmatprep.subr.bf16.mxu1 %v4933_v34 }
0x102e   :  { %4936 = vmatpush3.bf16.msra.mxu1 %v4933_v34 }
0x102f   :  { %v4917_v35 = vpack.c.bf16 %v2320_v24, %v2315_v26  ;;  %v4579_v36 = vpop.f32.mrb[26].mxu0 }
0x1030   :  { %v2330_v37 = vadd.f32 %v4579_v36, %v4020_v33  ;;  %v2324_v38 = vpop.f32.mrb[27].mxu0 }
0x1031   :  { %v2325_v41 = vadd.f32 %v4020_v33, %v2324_v38  ;;  %4919 = vmatprep.subr.msk.bf16.mxu0 %vm5407_vm11, %v4917_v35 }
0x1032   :  { %4922 = vmatpush3.bf16.xpose.msk.msra.mxu0 %vm5407_vm11, %v4917_v35 }
0x1033   :  { %v4923_v42 = vpack.c.bf16 %v2330_v37, %v2325_v41 }
0x1035   :  { %4925 = vmatprep.subr.msk.bf16.mxu0 %vm5407_vm11, %v4923_v42 }
0x103a   :  { %4928 = vmatpush3.bf16.xpose.msk.msra.mxu0 %vm5407_vm11, %v4923_v42 }
0x103b   :  { %4946 = vmatprep.subr.bf16.mxu0 %v4945_v53 }
0x1041   :  { %4603 = vmatmul.mubr.msk.f32.vlgmr.msra.gmra.mrb[28].mxu0 %vm723_vm10, %v2230_v55  ;;  %v4937_v55 = vpack.c.bf16 %v2686_v48, %v2685_v54 }
0x1042   :  { %4605 = vmatprep.mubr.msk.f32.mxu0 %vm723_vm10, %v2235_v43  ;;  %4948 = vmatpush3.bf16.msra.mxu0 %v4945_v53 }
0x1043   :  { %4950 = vmatprep.subr.bf16.mxu0 %v4949_v46  ;;  %4938 = vmatprep.subr.bf16.mxu1 %v4937_v55 }
0x1045   :  { %4606 = vmatmul.mubr.msk.f32.gmra.mrb[30].mxu0 %vm723_vm10, %v2240_v49 }
0x1046   :  { %4952 = vmatpush3.bf16.msra.mxu0 %v4949_v46  ;;  %4644 = vmatprep.mubr.msk.f32.mxu0 %vm334_vm12, %v5614_v63 }
0x1049   :  { %4645 = vmatmul.mubr.msk.f32.vlgmr.msra.gmra.mrb[32].mxu0 %vm334_vm12, %v5616_v3 }
0x104a   :  { %4647 = vmatprep.mubr.msk.f32.mxu0 %vm334_vm12, %v5628_v12 }
0x104d   :  { %4648 = vmatmul.mubr.msk.f32.gmra.mrb[34].mxu0 %vm334_vm12, %v5630_v18 }
0x1114   :  { %v4604_v57 = vpop.f32.mrb[28].mxu0 }
0x1115   :  { %v2533_v58 = vmul.f32 0.25, %v4604_v57  ;;  %v2513_v51 = vpop.f32.mrb[29].mxu0 }
0x1116   :  { %v2532_v61 = vmul.f32 0.25, %v2513_v51  ;;  %v2687_v51 = vld [vmem:[#allocation2 + $0x1e0] sm:$0xff] }
0x1117   :  { %v2537_v62 = vadd.f32 %v2533_v58, %v5433_v50 }
0x1118   :  { %v4607_v0 = vpop.f32.mrb[30].mxu0  ;;  %v2536_v17 = vadd.f32 %v2532_v61, %v5435_v52  ;;  %v2688_v61 = vld [vmem:[#allocation2 + $0x1e8] sm:$0xff] }
0x1119   :  { %v2535_v6 = vmul.f32 0.25, %v4607_v0  ;;  %v2523_v5 = vpop.f32.mrb[31].mxu0  ;;  %v2543_v9 = vsel %vm334_vm12, %v2537_v62, -inf }
0x111a   :  { %v2534_v10 = vmul.f32 0.25, %v2523_v5  ;;  %2544 = vmax.xlane.f32.xlu0 %v2543_v9  ;;  %v2540_v16 = vsel %vm334_vm12, %v2536_v17, -inf  ;;  %v2693_v9 = vld [vmem:[#allocation2 + $0x250] sm:$0xff] }
0x111b   :  { %2541 = vmax.xlane.f32.xlu1 %v2540_v16  ;;  %v2539_v40 = vadd.f32 %v2535_v6, %v5444_v7  ;;  %v4941_v6 = vpack.c.bf16 %v2688_v61, %v2687_v51 }
0x111c   :  { %v4646_v13 = vpop.f32.mrb[32].mxu0  ;;  %v2538_v60 = vadd.f32 %v2534_v10, %v5441_v4  ;;  %v2694_v10 = vld [vmem:[#allocation2 + $0x258] sm:$0xff] }
0x111d   :  { %v2864_v20 = vadd.f32 %v4646_v13, %v4047_v15  ;;  %v2858_v39 = vpop.f32.mrb[33].mxu0  ;;  %v2549_v21 = vsel %vm334_vm12, %v2539_v40, -inf  ;;  %v4953_v13 = vpack.c.bf16 %v2694_v10, %v2693_v9 }
0x111e   :  { %v2859_v22 = vadd.f32 %v4047_v15, %v2858_v39  ;;  %2550 = vmax.xlane.f32.xlu0 %v2549_v21  ;;  %v2546_v23 = vsel %vm334_vm12, %v2538_v60, -inf }
0x111f   :  { %2547 = vmax.xlane.f32.xlu1 %v2546_v23 }
0x1120   :  { %v4961_v25 = vpack.c.bf16 %v2864_v20, %v2859_v22  ;;  %v4649_v1 = vpop.f32.mrb[34].mxu0  ;;  %v2696_v20 = vld [vmem:[#allocation2 + $0x268] sm:$0xff] }
0x1121   :  { %v2874_v27 = vadd.f32 %v4649_v1, %v4047_v15  ;;  %v2868_v28 = vpop.f32.mrb[35].mxu0  ;;  %v4042_v1 = vld [vmem:[#allocation2 + $0x2f1] ss:$0 sm:$0xff] }
0x1122   :  { %v2869_v56 = vadd.f32 %v4047_v15, %v2868_v28  ;;  %4963 = vmatprep.subr.msk.bf16.mxu0 %vm5407_vm11, %v4961_v25 }
0x1123   :  { %4966 = vmatpush3.bf16.xpose.msk.msra.mxu0 %vm5407_vm11, %v4961_v25 }
0x1124   :  { %v4967_v32 = vpack.c.bf16 %v2874_v27, %v2869_v56 }
0x1126   :  { %4969 = vmatprep.subr.msk.bf16.mxu0 %vm5407_vm11, %v4967_v32 }
0x112b   :  { %4972 = vmatpush3.bf16.xpose.msk.msra.mxu0 %vm5407_vm11, %v4967_v32 }
0x11a7   :  { %v2545_v31 = vpop.xlane.xlu0 %2544 }
0x11a8   :  { %v2553_v59 = vsub.f32 %v2537_v62, %v2545_v31  ;;  %v2542_v29 = vpop.xlane.xlu1 %2541 }
0x11a9   :  { %v2552_v30 = vsub.f32 %v2536_v17, %v2542_v29 }
0x11aa   :  { %v2558_v33 = vmul.f32 1.442695, %v2553_v59 }
0x11ab   :  { %v2556_v34 = vmul.f32 1.442695, %v2552_v30  ;;  %v2551_v2 = vpop.xlane.xlu0 %2550  ;;  %v4052_v30 = vld [vmem:[#allocation2 + $0x2f5] ss:$0 sm:$0xff] }
0x11ac   :  { %5103 = vpow2.f32 %v2558_v33  ;;  %v2555_v24 = vsub.f32 %v2539_v40, %v2551_v2  ;;  %v2548_v44 = vpop.xlane.xlu1 %2547 }
0x11ad   :  { %5105 = vpow2.f32 %v2556_v34  ;;  %v2554_v26 = vsub.f32 %v2538_v60, %v2548_v44  ;;  %v2695_v60 = vld [vmem:[#allocation2 + $0x260] sm:$0xff] }
0x11ae   :  { %v2562_v35 = vmul.f32 1.442695, %v2555_v24  ;;  %v4957_v39 = vpack.c.bf16 %v2696_v20, %v2695_v60 }
0x11af   :  { %v2560_v36 = vmul.f32 1.442695, %v2554_v26 }
0x11b0   :  { %5107 = vpow2.f32 %v2562_v35 }
0x11b1   :  { %5109 = vpow2.f32 %v2560_v36 }
0x11b6   :  { %v5104_v37 = vpop.eup %5103 }
0x11b7   :  { %v5106_v38 = vpop.eup %5105  ;;  %v2567_v14 = vsel %vm334_vm12, %v5104_v37, 0.0 }
0x11b8   :  { %2568 = vadd.xlane.f32.xlu0 %v2567_v14  ;;  %v2564_v41 = vsel %vm334_vm12, %v5106_v38, 0.0 }
0x11b9   :  { %2565 = vadd.xlane.f32.xlu1 %v2564_v41 }
0x11ba   :  { %v5108_v42 = vpop.eup %5107 }
0x11bb   :  { %v5110_v45 = vpop.eup %5109  ;;  %v2573_v47 = vsel %vm334_vm12, %v5108_v42, 0.0 }
0x11bc   :  { %2574 = vadd.xlane.f32.xlu0 %v2573_v47  ;;  %v2570_v53 = vsel %vm334_vm12, %v5110_v45, 0.0 }
0x11bd   :  { %2571 = vadd.xlane.f32.xlu1 %v2570_v53 }
0x1245   :  { %v2569_v46 = vpop.xlane.xlu0 %2568 }
0x1246   :  { %5111 = vrcp.f32 %v2569_v46  ;;  %v2566_v43 = vpop.xlane.xlu1 %2565 }
0x1247   :  { %5113 = vrcp.f32 %v2566_v43 }
0x1249   :  { %v2575_v49 = vpop.xlane.xlu0 %2574 }
0x124a   :  { %5115 = vrcp.f32 %v2575_v49  ;;  %v2572_v57 = vpop.xlane.xlu1 %2571 }
0x124b   :  { %5117 = vrcp.f32 %v2572_v57 }
0x1250   :  { %v5112_v58 = vpop.eup %5111 }
0x1251   :  { %v5114_v62 = vpop.eup %5113  ;;  %v2585_v17 = vmul.f32 %v5112_v58, %v5104_v37 }
0x1252   :  { %v2584_v0 = vmul.f32 %v5114_v62, %v5106_v38 }
0x1254   :  { %v5116_v5 = vpop.eup %5115  ;;  %4616 = vmatprep.mubr.msk.f32.mxu1 %vm334_vm12, %v2584_v0 }
0x1255   :  { %v5118_v16 = vpop.eup %5117  ;;  %4617 = vmatmul.mubr.msk.f32.vlgmr.msra.gmra.mrb[40].mxu1 %vm334_vm12, %v2585_v17  ;;  %v2587_v40 = vmul.f32 %v5116_v5, %v5108_v42 }
0x1256   :  { %4940 = vmatpush3.bf16.msra.mxu1 %v4937_v55  ;;  %v2586_v15 = vmul.f32 %v5118_v16, %v5110_v45 }
0x1257   :  { %4942 = vmatprep.subr.bf16.mxu1 %v4941_v6 }
0x1258   :  { %4619 = vmatprep.mubr.msk.f32.mxu1 %vm334_vm12, %v2586_v15 }
0x1259   :  { %4620 = vmatmul.mubr.msk.f32.gmra.mrb[42].mxu1 %vm334_vm12, %v2587_v40 }
0x125a   :  { %4944 = vmatpush3.bf16.msra.mxu1 %v4941_v6  ;;  %4630 = vmatprep.mubr.msk.f32.mxu1 %vm334_vm12, %v5614_v63 }
0x125b   :  { %4954 = vmatprep.subr.bf16.mxu1 %v4953_v13 }
0x125d   :  { %4631 = vmatmul.mubr.msk.f32.vlgmr.msra.gmra.mrb[44].mxu1 %vm334_vm12, %v5616_v3 }
0x125e   :  { %4633 = vmatprep.mubr.msk.f32.mxu1 %vm334_vm12, %v5628_v12  ;;  %4956 = vmatpush3.bf16.msra.mxu1 %v4953_v13 }
0x125f   :  { %4958 = vmatprep.subr.bf16.mxu1 %v4957_v39 }
0x1261   :  { %4634 = vmatmul.mubr.msk.f32.gmra.mrb[46].mxu1 %vm334_vm12, %v5630_v18 }
0x1262   :  { %4960 = vmatpush3.bf16.msra.mxu1 %v4957_v39  ;;  %4658 = vmatprep.mubr.msk.f32.mxu1 %vm334_vm12, %v5614_v63 }
0x1265   :  { %4659 = vmatmul.mubr.msk.f32.vlgmr.msra.gmra.mrb[48].mxu1 %vm334_vm12, %v5616_v3 }
0x1266   :  { %4661 = vmatprep.mubr.msk.f32.mxu1 %vm334_vm12, %v5628_v12 }
0x1269   :  { %4662 = vmatmul.mubr.msk.f32.gmra.mrb[50].mxu1 %vm334_vm12, %v5630_v18 }
0x1328   :  { %v5708_v21 = vpop.f32.mrb[40].mxu1 }
0x1329   :  { %v5710_v22 = vpop.f32.mrb[41].mxu1 }
0x132c   :  { %v5712_v23 = vpop.f32.mrb[42].mxu1 }
0x132d   :  { %v5714_v25 = vpop.f32.mrb[43].mxu1 }
0x1330   :  { %v4632_v27 = vpop.f32.mrb[44].mxu1 }
0x1331   :  { %v2768_v28 = vpop.f32.mrb[45].mxu1  ;;  %v2774_v32 = vadd.f32 %v4632_v27, %v4042_v1 }
0x1332   :  { %v2769_v56 = vadd.f32 %v4042_v1, %v2768_v28 }
0x1334   :  { %v4635_v31 = vpop.f32.mrb[46].mxu1  ;;  %4672 = vmatprep.mubr.msk.f32.mxu0 %vm723_vm10, %v2769_v56 }
0x1335   :  { %v2778_v59 = vpop.f32.mrb[47].mxu1  ;;  %4673 = vmatmul.mubr.msk.f32.vlgmr.msra.gmra.mrb[36].mxu0 %vm723_vm10, %v2774_v32  ;;  %v2784_v33 = vadd.f32 %v4635_v31, %v4042_v1 }
0x1336   :  { %v2779_v29 = vadd.f32 %v4042_v1, %v2778_v59 }
0x1338   :  { %v4660_v34 = vpop.f32.mrb[48].mxu1  ;;  %4675 = vmatprep.mubr.msk.f32.mxu0 %vm723_vm10, %v2779_v29 }
0x1339   :  { %v2954_v2 = vadd.f32 %v4660_v34, %v4052_v30  ;;  %v2948_v24 = vpop.f32.mrb[49].mxu1  ;;  %4676 = vmatmul.mubr.msk.f32.gmra.mrb[38].mxu0 %vm723_vm10, %v2784_v33 }
0x133a   :  { %v2949_v44 = vadd.f32 %v4052_v30, %v2948_v24 }
0x133c   :  { %v4973_v26 = vpack.c.bf16 %v2954_v2, %v2949_v44  ;;  %v4663_v35 = vpop.f32.mrb[50].mxu1 }
0x133d   :  { %v2964_v36 = vadd.f32 %v4663_v35, %v4052_v30  ;;  %v2958_v37 = vpop.f32.mrb[51].mxu1  ;;  %v3249_v35 = vld [vmem:[#allocation2 + $0x270] sm:$0xff] }
0x133e   :  { %v2959_v38 = vadd.f32 %v4052_v30, %v2958_v37  ;;  %4974 = vmatprep.subr.bf16.mxu1 %v4973_v26  ;;  %v3251_v37 = vld [vmem:[#allocation2 + $0x280] sm:$0xff] }
0x133f   :  { %4976 = vmatpush3.bf16.msra.mxu1 %v4973_v26 }
0x1340   :  { %v4977_v14 = vpack.c.bf16 %v2964_v36, %v2959_v38  ;;  %v3250_v36 = vld [vmem:[#allocation2 + $0x278] sm:$0xff] }
0x1341   :  { %v4981_v38 = vpack.c.bf16 %v3250_v36, %v3249_v35 }
0x1342   :  { %4978 = vmatprep.subr.bf16.mxu1 %v4977_v14 }
0x1343   :  { %4980 = vmatpush3.bf16.msra.mxu1 %v4977_v14  ;;  %v3252_v14 = vld [vmem:[#allocation2 + $0x288] sm:$0xff] }
0x1344   :  { %4982 = vmatprep.subr.bf16.mxu1 %v4981_v38 }
0x1408   :  { %v4674_v41 = vpop.f32.mrb[36].mxu0 }
0x1409   :  { %v3077_v42 = vmul.f32 0.25, %v4674_v41  ;;  %v3057_v45 = vpop.f32.mrb[37].mxu0  ;;  %v4985_v41 = vpack.c.bf16 %v3252_v14, %v3251_v37 }
0x140a   :  { %v3076_v47 = vmul.f32 0.25, %v3057_v45 }
0x140b   :  { %v3081_v53 = vadd.f32 %v3077_v42, %v5433_v50 }
0x140c   :  { %v4677_v54 = vpop.f32.mrb[38].mxu0  ;;  %v3080_v48 = vadd.f32 %v3076_v47, %v5435_v52 }
0x140d   :  { %v3079_v55 = vmul.f32 0.25, %v4677_v54  ;;  %v3067_v46 = vpop.f32.mrb[39].mxu0  ;;  %v3087_v43 = vsel %vm334_vm12, %v3081_v53, -inf }
0x140e   :  { %v3078_v49 = vmul.f32 0.25, %v3067_v46  ;;  %3088 = vmax.xlane.f32.xlu0 %v3087_v43  ;;  %v3084_v57 = vsel %vm334_vm12, %v3080_v48, -inf }
0x140f   :  { %3085 = vmax.xlane.f32.xlu1 %v3084_v57  ;;  %v3083_v58 = vadd.f32 %v3079_v55, %v5444_v7 }
0x1410   :  { %v3082_v51 = vadd.f32 %v3078_v49, %v5441_v4 }
0x1411   :  { %v3093_v61 = vsel %vm334_vm12, %v3083_v58, -inf }
0x1412   :  { %3094 = vmax.xlane.f32.xlu0 %v3093_v61  ;;  %v3090_v50 = vsel %vm334_vm12, %v3082_v51, -inf }
0x1413   :  { %3091 = vmax.xlane.f32.xlu1 %v3090_v50 }
0x149b   :  { %v3089_v52 = vpop.xlane.xlu0 %3088 }
0x149c   :  { %v3097_v62 = vsub.f32 %v3081_v53, %v3089_v52  ;;  %v3086_v0 = vpop.xlane.xlu1 %3085 }
0x149d   :  { %v3096_v17 = vsub.f32 %v3080_v48, %v3086_v0 }
0x149e   :  { %v3102_v6 = vmul.f32 1.442695, %v3097_v62 }
0x149f   :  { %v3100_v5 = vmul.f32 1.442695, %v3096_v17  ;;  %v3095_v9 = vpop.xlane.xlu0 %3094 }
0x14a0   :  { %5119 = vpow2.f32 %v3102_v6  ;;  %v3099_v10 = vsub.f32 %v3083_v58, %v3095_v9  ;;  %v3092_v16 = vpop.xlane.xlu1 %3091 }
0x14a1   :  { %5121 = vpow2.f32 %v3100_v5  ;;  %v3098_v7 = vsub.f32 %v3082_v51, %v3092_v16 }
0x14a2   :  { %v3106_v15 = vmul.f32 1.442695, %v3099_v10 }
0x14a3   :  { %v3104_v4 = vmul.f32 1.442695, %v3098_v7 }
0x14a4   :  { %5123 = vpow2.f32 %v3106_v15 }
0x14a5   :  { %5125 = vpow2.f32 %v3104_v4 }
0x14aa   :  { %v5120_v40 = vpop.eup %5119 }
0x14ab   :  { %v5122_v13 = vpop.eup %5121  ;;  %v3111_v60 = vsel %vm334_vm12, %v5120_v40, 0.0 }
0x14ac   :  { %3112 = vadd.xlane.f32.xlu0 %v3111_v60  ;;  %v3108_v20 = vsel %vm334_vm12, %v5122_v13, 0.0 }
0x14ad   :  { %3109 = vadd.xlane.f32.xlu1 %v3108_v20 }
0x14ae   :  { %v5124_v39 = vpop.eup %5123 }
0x14af   :  { %v5126_v1 = vpop.eup %5125  ;;  %v3117_v27 = vsel %vm334_vm12, %v5124_v39, 0.0 }
0x14b0   :  { %3118 = vadd.xlane.f32.xlu0 %v3117_v27  ;;  %v3114_v28 = vsel %vm334_vm12, %v5126_v1, 0.0 }
0x14b1   :  { %3115 = vadd.xlane.f32.xlu1 %v3114_v28 }
0x1539   :  { %v3113_v56 = vpop.xlane.xlu0 %3112 }
0x153a   :  { %5127 = vrcp.f32 %v3113_v56  ;;  %v3110_v32 = vpop.xlane.xlu1 %3109 }
0x153b   :  { %5129 = vrcp.f32 %v3110_v32 }
0x153d   :  { %v3119_v31 = vpop.xlane.xlu0 %3118 }
0x153e   :  { %5131 = vrcp.f32 %v3119_v31  ;;  %v3116_v59 = vpop.xlane.xlu1 %3115 }
0x153f   :  { %5133 = vrcp.f32 %v3116_v59 }
0x1544   :  { %v5128_v29 = vpop.eup %5127 }
0x1545   :  { %v5130_v30 = vpop.eup %5129  ;;  %v3129_v34 = vmul.f32 %v5128_v29, %v5120_v40 }
0x1546   :  { %v3128_v33 = vmul.f32 %v5130_v30, %v5122_v13 }
0x1548   :  { %v5132_v2 = vpop.eup %5131  ;;  %4686 = vmatprep.mubr.msk.f32.mxu1 %vm334_vm12, %v3128_v33  ;;  %v3429_v33 = vld [vmem:[#allocation2 + $0x290] sm:$0xff] }
0x1549   :  { %v5134_v24 = vpop.eup %5133  ;;  %4687 = vmatmul.mubr.msk.f32.vlgmr.msra.gmra.mrb[52].mxu1 %vm334_vm12, %v3129_v34  ;;  %v3131_v26 = vmul.f32 %v5132_v2, %v5124_v39  ;;  %v3430_v34 = vld [vmem:[#allocation2 + $0x298] sm:$0xff] }
0x154a   :  { %v3130_v44 = vmul.f32 %v5134_v24, %v5126_v1  ;;  %4984 = vmatpush3.bf16.msra.mxu1 %v4981_v38  ;;  %v4989_v2 = vpack.c.bf16 %v3430_v34, %v3429_v33  ;;  %v3431_v24 = vld [vmem:[#allocation2 + $0x2a0] sm:$0xff] }
0x154b   :  { %4986 = vmatprep.subr.bf16.mxu1 %v4985_v41 }
0x154c   :  { %4689 = vmatprep.mubr.msk.f32.mxu1 %vm334_vm12, %v3130_v44  ;;  %4990 = vmatprep.subr.bf16.mxu0 %v4989_v2  ;;  %v3432_v44 = vld [vmem:[#allocation2 + $0x2a8] sm:$0xff] }
0x154d   :  { %4690 = vmatmul.mubr.msk.f32.gmra.mrb[54].mxu1 %vm334_vm12, %v3131_v26  ;;  %4992 = vmatpush3.bf16.msra.mxu0 %v4989_v2  ;;  %v4993_v26 = vpack.c.bf16 %v3432_v44, %v3431_v24 }
0x154e   :  { %4988 = vmatpush3.bf16.msra.mxu1 %v4985_v41 }
0x154f   :  { %4994 = vmatprep.subr.bf16.mxu0 %v4993_v26 }
0x1551   :  { %4996 = vmatpush3.bf16.msra.mxu0 %v4993_v26 }
0x161c   :  { %v4688_v42 = vpop.f32.mrb[52].mxu1 }
0x161d   :  { %3235 = vrot.lane.b32.xlu0 %v4688_v42, %s5221_s1  ;;  %v3210_v45 = vpop.f32.mrb[53].mxu1 }
0x161e   :  { %3233 = vrot.lane.b32.xlu1 %v3210_v45, %s5221_s1 }
0x1620   :  { %v4691_v47 = vpop.f32.mrb[54].mxu1 }
0x1621   :  { %v3220_v53 = vpop.f32.mrb[55].mxu1 }
0x1622   :  { %3237 = vrot.lane.b32.xlu1 %v3220_v53, %s5221_s1 }
0x1626   :  { %3239 = vrot.lane.b32.xlu1 %v4691_v47, %s5221_s1 }
0x168f   :  { %v3236_v54 = vpop.permute.xlu0 %3235 }
0x1690   :  { %v3234_v48 = vpop.permute.xlu1 %3233  ;;  %v3246_v46 = vsel %vm723_vm10, %v5708_v21, %v3236_v54 }
0x1691   :  { %v3245_v55 = vsel %vm723_vm10, %v5710_v22, %v3234_v48  ;;  %v4069_v22 = vld [vmem:[#allocation2 + $0x2f6] ss:$0 sm:$0xff] }
0x1692   :  { %4700 = vmatprep.mubr.msk.f32.mxu1 %vm334_vm12, %v3245_v55 }
0x1693   :  { %4701 = vmatmul.mubr.msk.f32.vlgmr.msra.gmra.mrb[56].mxu1 %vm334_vm12, %v3246_v46  ;;  %v4074_v46 = vld [vmem:[#allocation2 + $0x2f9] ss:$0 sm:$0xff] }
0x1694   :  { %v3238_v43 = vpop.permute.xlu1 %3237 }
0x1695   :  { %v3247_v49 = vsel %vm723_vm10, %v5714_v25, %v3238_v43 }
0x1696   :  { %4703 = vmatprep.mubr.msk.f32.mxu1 %vm334_vm12, %v3247_v49 }
0x1698   :  { %v3240_v57 = vpop.permute.xlu1 %3239 }
0x1699   :  { %v3248_v58 = vsel %vm723_vm10, %v5712_v23, %v3240_v57  ;;  %vm5223_vm10 = vmmov 0  }
0x169a   :  { %4704 = vmatmul.mubr.msk.f32.gmra.mrb[58].mxu1 %vm334_vm12, %v3248_v58  ;;  %v4075_v58 = vld [vmem:[#allocation2 + $0x2fa] ss:$0 sm:$0xff] }
0x1766   :  { %v4702_v51 = vpop.f32.mrb[56].mxu1 }
0x1767   :  { %v3342_v61 = vadd.f32 %v4702_v51, %v4069_v22  ;;  %v3336_v21 = vpop.f32.mrb[57].mxu1 }
0x1768   :  { %v3337_v50 = vadd.f32 %v4069_v22, %v3336_v21 }
0x1769   :  { %v3356_v52 = vadd.f32 %v3342_v61, %v5616_v3 }
0x176a   :  { %v3355_v62 = vadd.f32 %v3337_v50, %v5614_v63 }
0x176b   :  { %v3364_v0 = vsel %vm334_vm12, %v3356_v52, 0.0 }
0x176c   :  { %3365 = vadd.xlane.f32.xlu1 %v3364_v0  ;;  %v3361_v25 = vsel %vm334_vm12, %v3355_v62, 0.0 }
0x176d   :  { %3362 = vadd.xlane.f32.xlu0 %v3361_v25  ;;  %v4705_v17 = vpop.f32.mrb[58].mxu1 }
0x176e   :  { %v3346_v6 = vpop.f32.mrb[59].mxu1  ;;  %v3352_v23 = vadd.f32 %v4705_v17, %v4069_v22 }
0x176f   :  { %v3347_v5 = vadd.f32 %v4069_v22, %v3346_v6 }
0x1770   :  { %v3358_v16 = vadd.f32 %v3352_v23, %v5630_v18 }
0x1771   :  { %v3357_v9 = vadd.f32 %v3347_v5, %v5628_v12  ;;  %v3643_v5 = vld [vmem:[#allocation2 + $0x2b0] sm:$0xff] }
0x1772   :  { %v3370_v3 = vsel %vm334_vm12, %v3358_v16, 0.0 }
0x1773   :  { %v3367_v10 = vsel %vm334_vm12, %v3357_v9, 0.0 }
0x1774   :  { %3368 = vadd.xlane.f32.xlu0 %v3367_v10 }
0x1778   :  { %3371 = vadd.xlane.f32.xlu0 %v3370_v3  ;;  %v3646_v3 = vld [vmem:[#allocation2 + $0x2c8] sm:$0xff] }
0x17f9   :  { %v3366_v63 = vpop.xlane.xlu1 %3365 }
0x17fa   :  { %v3374_v7 = vmul.f32 0.03125, %v3366_v63  ;;  %v3363_v15 = vpop.xlane.xlu0 %3362 }
0x17fb   :  { %v3373_v4 = vmul.f32 0.03125, %v3363_v15  ;;  %v3648_v15 = vld [vmem:[#allocation2 + $0x2d8] sm:$0xff] }
0x17fc   :  { %v3378_v40 = vsub.f32 %v3356_v52, %v3374_v7  ;;  %v3647_v7 = vld [vmem:[#allocation2 + $0x2d0] sm:$0xff] }
0x17fd   :  { %v3377_v13 = vsub.f32 %v3355_v62, %v3373_v4  ;;  %v5005_v4 = vpack.c.bf16 %v3648_v15, %v3647_v7 }
0x17fe   :  { %v3382_v60 = vmul.f32 %v3378_v40, %v3378_v40 }
0x17ff   :  { %v3381_v20 = vmul.f32 %v3377_v13, %v3377_v13 }
0x1800   :  { %v3388_v39 = vsel %vm334_vm12, %v3382_v60, 0.0 }
0x1801   :  { %v3369_v1 = vpop.xlane.xlu0 %3368  ;;  %3389 = vadd.xlane.f32.xlu0 %v3388_v39  ;;  %v3385_v12 = vsel %vm334_vm12, %v3381_v20, 0.0  ;;  %v4076_v20 = vld [vmem:[#allocation2 + $0x2f7] ss:$0 sm:$0xff] }
0x1802   :  { %v3375_v27 = vmul.f32 0.03125, %v3369_v1  ;;  %3386 = vadd.xlane.f32.xlu1 %v3385_v12 }
0x1804   :  { %v3379_v18 = vsub.f32 %v3357_v9, %v3375_v27  ;;  %v3644_v9 = vld [vmem:[#allocation2 + $0x2b8] sm:$0xff] }
0x1805   :  { %v3372_v28 = vpop.xlane.xlu0 %3371  ;;  %v4997_v10 = vpack.c.bf16 %v3644_v9, %v3643_v5 }
0x1806   :  { %v3376_v56 = vmul.f32 0.03125, %v3372_v28  ;;  %v3383_v32 = vmul.f32 %v3379_v18, %v3379_v18 }
0x1807   :  { %4998 = vmatprep.subr.bf16.mxu1 %v4997_v10 }
0x1808   :  { %v3380_v31 = vsub.f32 %v3358_v16, %v3376_v56  ;;  %v3391_v59 = vsel %vm334_vm12, %v3383_v32, 0.0  ;;  %5000 = vmatpush3.bf16.msra.mxu1 %v4997_v10  ;;  %v3645_v16 = vld [vmem:[#allocation2 + $0x2c0] sm:$0xff] }
0x1809   :  { %3392 = vadd.xlane.f32.xlu1 %v3391_v59  ;;  %v5001_v63 = vpack.c.bf16 %v3646_v3, %v3645_v16 }
0x180a   :  { %v3384_v29 = vmul.f32 %v3380_v31, %v3380_v31 }
0x180b   :  { %5002 = vmatprep.subr.bf16.mxu1 %v5001_v63 }
0x180c   :  { %v3394_v30 = vsel %vm334_vm12, %v3384_v29, 0.0  ;;  %5004 = vmatpush3.bf16.msra.mxu1 %v5001_v63 }
0x180d   :  { %3395 = vadd.xlane.f32.xlu0 %v3394_v30  ;;  %5006 = vmatprep.subr.bf16.mxu1 %v5005_v4 }
0x1810   :  { %5008 = vmatpush3.bf16.msra.mxu1 %v5005_v4 }
0x188e   :  { %v3390_v35 = vpop.xlane.xlu0 %3389 }
0x188f   :  { %v3398_v36 = vmul.f32 0.03125, %v3390_v35  ;;  %v3387_v37 = vpop.xlane.xlu1 %3386 }
0x1890   :  { %v3397_v38 = vmul.f32 0.03125, %v3387_v37 }
0x1891   :  { %v3402_v14 = vadd.f32 1e-12, %v3398_v36 }
0x1892   :  { %v3401_v41 = vadd.f32 1e-12, %v3397_v38 }
0x1893   :  { %5135 = vrsqrt.f32 %v3402_v14 }
0x1894   :  { %5137 = vrsqrt.f32 %v3401_v41 }
0x1896   :  { %v3393_v42 = vpop.xlane.xlu1 %3392 }
0x1897   :  { %v3399_v45 = vmul.f32 0.03125, %v3393_v42 }
0x1899   :  { %v3403_v47 = vadd.f32 1e-12, %v3399_v45 }
0x189a   :  { %v3396_v53 = vpop.xlane.xlu0 %3395 }
0x189b   :  { %5139 = vrsqrt.f32 %v3403_v47  ;;  %v3400_v54 = vmul.f32 0.03125, %v3396_v53 }
0x189d   :  { %v5136_v48 = vpop.eup %5135  ;;  %v3404_v55 = vadd.f32 1e-12, %v3400_v54 }
0x189e   :  { %v5138_v43 = vpop.eup %5137  ;;  %v3410_v49 = vmul.f32 %v5136_v48, %v3378_v40  ;;  %v3649_v40 = vld [vmem:[#allocation2 + $0x2e0] sm:$0xff] }
0x189f   :  { %5141 = vrsqrt.f32 %v3404_v55  ;;  %v3409_v57 = vmul.f32 %v5138_v43, %v3377_v13  ;;  %v3650_v13 = vld [vmem:[#allocation2 + $0x2e8] sm:$0xff] }
0x18a0   :  { %v3418_v22 = vmul.f32 %v4074_v46, %v3410_v49  ;;  %v5009_v60 = vpack.c.bf16 %v3650_v13, %v3649_v40 }
0x18a1   :  { %v3417_v51 = vmul.f32 %v4074_v46, %v3409_v57 }
0x18a2   :  { %v5766_v21 = vadd.f32 %v4075_v58, %v3418_v22  ;;  %5010 = vmatprep.subr.bf16.mxu1 %v5009_v60 }
0x18a3   :  { %v5764_v61 = vadd.f32 %v4075_v58, %v3417_v51  ;;  %5012 = vmatpush3.bf16.msra.mxu1 %v5009_v60 }
0x18a5   :  { %v5140_v50 = vpop.eup %5139  ;;  %4714 = vmatprep.mubr.msk.f32.mxu0 %vm334_vm12, %v5764_v61 }
0x18a6   :  { %4715 = vmatmul.mubr.msk.f32.vlgmr.msra.gmra.mrb[40].mxu0 %vm334_vm12, %v5766_v21  ;;  %v3411_v52 = vmul.f32 %v5140_v50, %v3379_v18 }
0x18a8   :  { %v3419_v62 = vmul.f32 %v4074_v46, %v3411_v52 }
0x18a9   :  { %v5142_v0 = vpop.eup %5141 }
0x18aa   :  { %v5772_v25 = vadd.f32 %v4075_v58, %v3419_v62  ;;  %v3412_v17 = vmul.f32 %v5142_v0, %v3380_v31 }
0x18ac   :  { %4717 = vmatprep.mubr.msk.f32.mxu0 %vm334_vm12, %v5772_v25  ;;  %v3420_v6 = vmul.f32 %v4074_v46, %v3412_v17 }
0x18ae   :  { %v5776_v23 = vadd.f32 %v4075_v58, %v3420_v6 }
0x18b0   :  { %4718 = vmatmul.mubr.msk.f32.gmra.mrb[42].mxu0 %vm334_vm12, %v5776_v23 }
0x18b1   :  { %4750 = vmatprep.mubr.msk.f32.mxu0 %vm5223_vm10, %v5219_v19 }
0x1979   :  { %v4716_v39 = vpop.f32.mrb[40].mxu0 }
0x197a   :  { %v5780_v1 = vadd.f32 %v4716_v39, %v4076_v20  ;;  %v3516_v12 = vpop.f32.mrb[41].mxu0 }
0x197b   :  { %v5782_v27 = vadd.f32 %v4076_v20, %v3516_v12 }
0x197c   :  { %v5785_v18 = vmul.f32 0.70710677, %v5780_v1 }
0x197d   :  { %v5788_v28 = vmul.f32 0.70710677, %v5782_v27 }
0x197e   :  { %v3540_v56 = vand.u32 2147483647, %v5785_v18  ;;  %vm3620_vm6 = vcmp.ge.f32.partialorder %v5785_v18, 0.0 }
0x197f   :  { %v3539_v32 = vand.u32 2147483647, %v5788_v28  ;;  %vm3619_vm7 = vcmp.ge.f32.partialorder %v5788_v28, 0.0 }
0x1980   :  { %v3544_v31 = vmul.f32 0.3275911, %v3540_v56  ;;  %v3596_v37 = vsub.f32 0.0, %v3540_v56 }
0x1981   :  { %v3543_v59 = vmul.f32 0.3275911, %v3539_v32  ;;  %v3595_v14 = vsub.f32 0.0, %v3539_v32 }
0x1982   :  { %v3548_v29 = vadd.f32 1.0, %v3544_v31  ;;  %v3600_v53 = vmul.f32 %v3596_v37, %v3540_v56 }
0x1983   :  { %v3547_v30 = vadd.f32 1.0, %v3543_v59  ;;  %v4719_v33 = vpop.f32.mrb[42].mxu0  ;;  %v3599_v55 = vmul.f32 %v3595_v14, %v3539_v32 }
0x1984   :  { %5143 = vrcp.f32 %v3548_v29  ;;  %v5792_v34 = vadd.f32 %v4719_v33, %v4076_v20  ;;  %v3526_v2 = vpop.f32.mrb[43].mxu0  ;;  %v3605_v49 = vmul.f32 1.442695, %v3600_v53 }
0x1985   :  { %5145 = vrcp.f32 %v3547_v30  ;;  %v5794_v24 = vadd.f32 %v4076_v20, %v3526_v2  ;;  %v3603_v22 = vmul.f32 1.442695, %v3599_v55 }
0x1986   :  { %v5797_v44 = vmul.f32 0.70710677, %v5792_v34 }
0x1987   :  { %v5800_v26 = vmul.f32 0.70710677, %v5794_v24 }
0x1988   :  { %v3542_v35 = vand.u32 2147483647, %v5797_v44  ;;  %vm3622_vm8 = vcmp.ge.f32.partialorder %v5797_v44, 0.0 }
0x1989   :  { %v3541_v36 = vand.u32 2147483647, %v5800_v26  ;;  %vm3621_vm9 = vcmp.ge.f32.partialorder %v5800_v26, 0.0 }
0x198a   :  { %v3546_v38 = vmul.f32 0.3275911, %v3542_v35  ;;  %v3598_v50 = vsub.f32 0.0, %v3542_v35 }
0x198b   :  { %v3545_v41 = vmul.f32 0.3275911, %v3541_v36  ;;  %v3597_v62 = vsub.f32 0.0, %v3541_v36 }
0x198c   :  { %v3550_v42 = vadd.f32 1.0, %v3546_v38  ;;  %v3602_v9 = vmul.f32 %v3598_v50, %v3542_v35 }
0x198d   :  { %v3549_v45 = vadd.f32 1.0, %v3545_v41  ;;  %v3601_v63 = vmul.f32 %v3597_v62, %v3541_v36  ;;  %v3632_v62 = vmul.f32 0.5, %v5780_v1 }
0x198e   :  { %v5144_v47 = vpop.eup %5143  ;;  %5147 = vrcp.f32 %v3550_v42  ;;  %v3609_v60 = vmul.f32 1.442695, %v3602_v9 }
0x198f   :  { %v5146_v54 = vpop.eup %5145  ;;  %v3560_v48 = vmul.f32 1.0614054, %v5144_v47  ;;  %5149 = vrcp.f32 %v3549_v45  ;;  %v3607_v56 = vmul.f32 1.442695, %v3601_v63 }
0x1990   :  { %v3559_v46 = vmul.f32 1.0614054, %v5146_v54  ;;  %5151 = vpow2.f32 %v3605_v49 }
0x1991   :  { %v4082_v43 = vadd.f32 -1.4531521, %v3560_v48  ;;  %5153 = vpow2.f32 %v3603_v22  ;;  %v3631_v22 = vmul.f32 0.5, %v5782_v27 }
0x1992   :  { %v4081_v57 = vadd.f32 -1.4531521, %v3559_v46  ;;  %5155 = vpow2.f32 %v3609_v60  ;;  %v4089_v60 = vld [vmem:[#allocation2 + $0x2f8] ss:$0 sm:$0xff] }
0x1993   :  { %v3568_v58 = vmul.f32 %v5144_v47, %v4082_v43  ;;  %5157 = vpow2.f32 %v3607_v56 }
0x1994   :  { %v3567_v51 = vmul.f32 %v5146_v54, %v4081_v57 }
0x1995   :  { %v3572_v52 = vadd.f32 1.4214138, %v3568_v58 }
0x1996   :  { %v3571_v0 = vadd.f32 1.4214138, %v3567_v51 }
0x1997   :  { %v3576_v17 = vmul.f32 %v5144_v47, %v3572_v52 }
0x1998   :  { %v5148_v6 = vpop.eup %5147  ;;  %v3575_v5 = vmul.f32 %v5146_v54, %v3571_v0 }
0x1999   :  { %v5150_v10 = vpop.eup %5149  ;;  %v4086_v16 = vadd.f32 -0.28449672, %v3576_v17  ;;  %v3562_v3 = vmul.f32 1.0614054, %v5148_v6 }
0x199a   :  { %v4085_v7 = vadd.f32 -0.28449672, %v3575_v5  ;;  %v3561_v15 = vmul.f32 1.0614054, %v5150_v10  ;;  %v5152_v30 = vpop.eup %5151 }
0x199b   :  { %v3584_v4 = vmul.f32 %v5144_v47, %v4086_v16  ;;  %v4084_v40 = vadd.f32 -1.4531521, %v3562_v3  ;;  %v5154_v35 = vpop.eup %5153 }
0x199c   :  { %v3583_v13 = vmul.f32 %v5146_v54, %v4085_v7  ;;  %v4083_v20 = vadd.f32 -1.4531521, %v3561_v15  ;;  %v5156_v52 = vpop.eup %5155  ;;  %v3633_v7 = vmul.f32 0.5, %v5794_v24 }
0x199d   :  { %v3588_v39 = vadd.f32 0.2548296, %v3584_v4  ;;  %v3570_v12 = vmul.f32 %v5148_v6, %v4084_v40  ;;  %v5158_v17 = vpop.eup %5157  ;;  %v3634_v4 = vmul.f32 0.5, %v5792_v34 }
0x199e   :  { %v3587_v32 = vadd.f32 0.2548296, %v3583_v13  ;;  %v3569_v31 = vmul.f32 %v5150_v10, %v4083_v20 }
0x199f   :  { %v3592_v59 = vmul.f32 %v5144_v47, %v3588_v39  ;;  %v3574_v29 = vadd.f32 1.4214138, %v3570_v12 }
0x19a0   :  { %v3591_v33 = vmul.f32 %v5146_v54, %v3587_v32  ;;  %v3573_v2 = vadd.f32 1.4214138, %v3569_v31 }
0x19a1   :  { %v3612_v36 = vmul.f32 %v5152_v30, %v3592_v59  ;;  %v3578_v37 = vmul.f32 %v5148_v6, %v3574_v29 }
0x19a2   :  { %v3611_v38 = vmul.f32 %v5154_v35, %v3591_v33  ;;  %v3577_v14 = vmul.f32 %v5150_v10, %v3573_v2 }
0x19a3   :  { %v3616_v41 = vsub.f32 1.0, %v3612_v36  ;;  %v4088_v42 = vadd.f32 -0.28449672, %v3578_v37 }
0x19a4   :  { %v3615_v45 = vsub.f32 1.0, %v3611_v38  ;;  %v4087_v53 = vadd.f32 -0.28449672, %v3577_v14 }
0x19a5   :  { %v3624_v48 = vsub.f32 0.0, %v3616_v41  ;;  %v3586_v55 = vmul.f32 %v5148_v6, %v4088_v42 }
0x19a6   :  { %v3623_v47 = vsub.f32 0.0, %v3615_v45  ;;  %v3585_v46 = vmul.f32 %v5150_v10, %v4087_v53 }
0x19a7   :  { %v3628_v43 = vsel %vm3620_vm6, %v3616_v41, %v3624_v48  ;;  %v3590_v54 = vadd.f32 0.2548296, %v3586_v55 }
0x19a8   :  { %v3636_v49 = vadd.f32 1.0, %v3628_v43  ;;  %v3627_v57 = vsel %vm3619_vm7, %v3615_v45, %v3623_v47  ;;  %v3589_v58 = vadd.f32 0.2548296, %v3585_v46 }
0x19a9   :  { %v3635_v51 = vadd.f32 1.0, %v3627_v57  ;;  %v3594_v50 = vmul.f32 %v5148_v6, %v3590_v54 }
0x19aa   :  { %v3593_v0 = vmul.f32 %v5150_v10, %v3589_v58  ;;  %v3640_v9 = vmul.f32 %v3636_v49, %v3632_v62  ;;  %v5222_v58 = vmov 0.0|0.0  }
0x19ab   :  { %v3639_v5 = vmul.f32 %v3635_v51, %v3631_v22  ;;  %v3614_v18 = vmul.f32 %v5156_v52, %v3594_v50  ;;  %5013 = vmatprep.subr.bf16.mxu0 %v5222_v58 }
0x19ac   :  { %v3613_v16 = vmul.f32 %v5158_v17, %v3593_v0 }
0x19ad   :  { %v3618_v3 = vsub.f32 1.0, %v3614_v18  ;;  %4736 = vmatprep.mubr.msk.f32.mxu1 %vm1957_vm3, %v3639_v5 }
0x19ae   :  { %v3617_v28 = vsub.f32 1.0, %v3613_v16  ;;  %4737 = vmatmul.mubr.msk.f32.vlgmr.msra.gmra.mrb[60].mxu1 %vm1957_vm3, %v3640_v9 }
0x19af   :  { %v3626_v63 = vsub.f32 0.0, %v3618_v3 }
0x19b0   :  { %v3625_v27 = vsub.f32 0.0, %v3617_v28 }
0x19b1   :  { %v3630_v6 = vsel %vm3622_vm8, %v3618_v3, %v3626_v63  ;;  %v4094_v63 = vld [vmem:[#allocation2 + $0x2fb] ss:$0 sm:$0xff] }
0x19b2   :  { %v3638_v1 = vadd.f32 1.0, %v3630_v6  ;;  %v3629_v10 = vsel %vm3621_vm9, %v3617_v28, %v3625_v27 }
0x19b3   :  { %v3637_v15 = vadd.f32 1.0, %v3629_v10  ;;  %v4095_v10 = vld [vmem:[#allocation2 + $0x2fc] ss:$0 sm:$0xff] }
0x19b4   :  { %v3642_v13 = vmul.f32 %v3638_v1, %v3634_v4 }
0x19b5   :  { %v3641_v40 = vmul.f32 %v3637_v15, %v3633_v7 }
0x19b7   :  { %4739 = vmatprep.mubr.msk.f32.mxu1 %vm1957_vm3, %v3641_v40 }
0x19b8   :  { %4740 = vmatmul.mubr.msk.f32.gmra.mrb[62].mxu1 %vm1957_vm3, %v3642_v13 }
0x1a81   :  { %v4738_v20 = vpop.f32.mrb[60].mxu1 }
0x1a82   :  { %v3740_v44 = vadd.f32 %v4738_v20, %v4089_v60  ;;  %v3734_v39 = vpop.f32.mrb[61].mxu1 }
0x1a83   :  { %v3735_v12 = vadd.f32 %v4089_v60, %v3734_v39 }
0x1a84   :  { %v3754_v26 = vadd.f32 %v3740_v44, %v5766_v21 }
0x1a85   :  { %v3753_v56 = vadd.f32 %v3735_v12, %v5764_v61 }
0x1a86   :  { %v3762_v24 = vsel %vm334_vm12, %v3754_v26, 0.0 }
0x1a87   :  { %3763 = vadd.xlane.f32.xlu0 %v3762_v24  ;;  %v3759_v34 = vsel %vm334_vm12, %v3753_v56, 0.0 }
0x1a88   :  { %3760 = vadd.xlane.f32.xlu1 %v3759_v34 }
0x1a8b   :  { %v4741_v32 = vpop.f32.mrb[62].mxu1 }
0x1a8c   :  { %v3750_v31 = vadd.f32 %v4741_v32, %v4089_v60  ;;  %v3744_v59 = vpop.f32.mrb[63].mxu1 }
0x1a8d   :  { %v3745_v29 = vadd.f32 %v4089_v60, %v3744_v59  ;;  %v3828_v60 = vshrl.u32 %v61_v8, 7 }
0x1a8e   :  { %v3756_v30 = vadd.f32 %v3750_v31, %v5776_v23 }
0x1a8f   :  { %v3755_v33 = vadd.f32 %v3745_v29, %v5772_v25 }
0x1a90   :  { %v3768_v2 = vsel %vm334_vm12, %v3756_v30, 0.0 }
0x1a91   :  { %3769 = vadd.xlane.f32.xlu0 %v3768_v2  ;;  %v3765_v21 = vsel %vm334_vm12, %v3755_v33, 0.0 }
0x1a92   :  { %3766 = vadd.xlane.f32.xlu1 %v3765_v21 }
0x1b14   :  { %v3764_v61 = vpop.xlane.xlu0 %3763 }
0x1b15   :  { %v3772_v35 = vmul.f32 0.03125, %v3764_v61  ;;  %v3761_v36 = vpop.xlane.xlu1 %3760 }
0x1b16   :  { %v3771_v37 = vmul.f32 0.03125, %v3761_v36 }
0x1b17   :  { %v3776_v38 = vsub.f32 %v3754_v26, %v3772_v35 }
0x1b18   :  { %v3775_v14 = vsub.f32 %v3753_v56, %v3771_v37  ;;  %v3829_v56 = vmul.u32 8, %v3828_v60 }
0x1b19   :  { %v3780_v41 = vmul.f32 %v3776_v38, %v3776_v38 }
0x1b1a   :  { %v3779_v42 = vmul.f32 %v3775_v14, %v3775_v14  ;;  %vm3830_vm11 = vcmp.eq.s32.totalorder %v5304_v11, %v3829_v56 }
0x1b1b   :  { %v3786_v45 = vsel %vm334_vm12, %v3780_v41, 0.0  ;;  %v4096_v59 = vsel %vm3830_vm11, 1.0, %v5219_v19 }
0x1b1c   :  { %3787 = vadd.xlane.f32.xlu0 %v3786_v45  ;;  %v3783_v23 = vsel %vm334_vm12, %v3779_v42, 0.0 }
0x1b1d   :  { %3784 = vadd.xlane.f32.xlu1 %v3783_v23 }
0x1b1e   :  { %v3770_v25 = vpop.xlane.xlu0 %3769 }
0x1b1f   :  { %v3774_v53 = vmul.f32 0.03125, %v3770_v25  ;;  %v3767_v48 = vpop.xlane.xlu1 %3766 }
0x1b20   :  { %v3773_v55 = vmul.f32 0.03125, %v3767_v48 }
0x1b21   :  { %v3778_v47 = vsub.f32 %v3756_v30, %v3774_v53 }
0x1b22   :  { %v3777_v46 = vsub.f32 %v3755_v33, %v3773_v55 }
0x1b23   :  { %v3782_v43 = vmul.f32 %v3778_v47, %v3778_v47 }
0x1b24   :  { %v3781_v54 = vmul.f32 %v3777_v46, %v3777_v46 }
0x1b25   :  { %v3792_v49 = vsel %vm334_vm12, %v3782_v43, 0.0 }
0x1b26   :  { %3793 = vadd.xlane.f32.xlu0 %v3792_v49  ;;  %v3789_v57 = vsel %vm334_vm12, %v3781_v54, 0.0 }
0x1b27   :  { %3790 = vadd.xlane.f32.xlu1 %v3789_v57 }
0x1ba9   :  { %v3788_v22 = vpop.xlane.xlu0 %3787 }
0x1baa   :  { %v3796_v51 = vmul.f32 0.03125, %v3788_v22  ;;  %v3785_v50 = vpop.xlane.xlu1 %3784 }
0x1bab   :  { %v3795_v52 = vmul.f32 0.03125, %v3785_v50 }
0x1bac   :  { %v3800_v62 = vadd.f32 1e-12, %v3796_v51 }
0x1bad   :  { %v3799_v0 = vadd.f32 1e-12, %v3795_v52 }
0x1bae   :  { %5159 = vrsqrt.f32 %v3800_v62 }
0x1baf   :  { %5161 = vrsqrt.f32 %v3799_v0 }
0x1bb3   :  { %v3794_v17 = vpop.xlane.xlu0 %3793 }
0x1bb4   :  { %v3798_v5 = vmul.f32 0.03125, %v3794_v17  ;;  %v3791_v18 = vpop.xlane.xlu1 %3790 }
0x1bb5   :  { %v3797_v9 = vmul.f32 0.03125, %v3791_v18 }
0x1bb6   :  { %v3802_v16 = vadd.f32 1e-12, %v3798_v5 }
0x1bb7   :  { %v3801_v3 = vadd.f32 1e-12, %v3797_v9 }
0x1bb8   :  { %v5160_v28 = vpop.eup %5159  ;;  %5163 = vrsqrt.f32 %v3802_v16 }
0x1bb9   :  { %v5162_v27 = vpop.eup %5161  ;;  %v3808_v6 = vmul.f32 %v5160_v28, %v3776_v38  ;;  %5165 = vrsqrt.f32 %v3801_v3 }
0x1bba   :  { %v3807_v1 = vmul.f32 %v5162_v27, %v3775_v14 }
0x1bbb   :  { %v3816_v7 = vmul.f32 %v4094_v63, %v3808_v6 }
0x1bbc   :  { %v3815_v15 = vmul.f32 %v4094_v63, %v3807_v1 }
0x1bbd   :  { %v3824_v4 = vadd.f32 %v4095_v10, %v3816_v7 }
0x1bbe   :  { %v3823_v40 = vadd.f32 %v4095_v10, %v3815_v15 }
0x1bc0   :  { %v5014_v13 = vpack.c.bf16 %v3824_v4, %v3823_v40 }
0x1bc2   :  { %v5164_v20 = vpop.eup %5163  ;;  %5015 = vmatpush3.bf16.msra.mxu0 %v5014_v13 }
0x1bc3   :  { %v5166_v44 = vpop.eup %5165  ;;  %v3810_v39 = vmul.f32 %v5164_v20, %v3778_v47  ;;  %5016 = vmatprep.subr.bf16.mxu0 %v5222_v58 }
0x1bc4   :  { %v3809_v12 = vmul.f32 %v5166_v44, %v3777_v46 }
0x1bc5   :  { %v3818_v26 = vmul.f32 %v4094_v63, %v3810_v39 }
0x1bc6   :  { %v3817_v24 = vmul.f32 %v4094_v63, %v3809_v12 }
0x1bc7   :  { %v3826_v34 = vadd.f32 %v4095_v10, %v3818_v26 }
0x1bc8   :  { %v3825_v32 = vadd.f32 %v4095_v10, %v3817_v24 }
0x1bca   :  { %v5017_v31 = vpack.c.bf16 %v3826_v34, %v3825_v32 }
0x1bcc   :  { %5018 = vmatpush3.bf16.msra.mxu0 %v5017_v31 }
0x1bcf   :  { %4751 = vmatmul.mubr.msk.f32.vlgmr.msra.gmra.mrb[44].mxu0 %vm334_vm12, %v4096_v59 }
0x1ca2   :  { %v3902_v8 = vpop.f32.mrb[44].mxu0 }
0x1ca3   :  { %v4752_v29 = vpop.f32.mrb[45].mxu0  ;;  %3907 = vst.msk [vmem:[#allocation5] sm:$0xf] %vm3906_vm13, %v3902_v8 }
0x1ca4   :  { %5200 = shalt.err (!%p5197_p12)
}
0x1ca5   :  { %s5201_s12 = scalar_lea.hbm %s5848_s3, 64 }
0x1ca6   :  { %p5202_p13 = scmp.ne.s32.totalorder %s5848_s3, %s5201_s12  ;;  %p5205_p0 = scmp.lt.u32.totalorder %s5201_s12, %s5848_s3 }
0x1ca8   :  { %p5207_p1 = pnand %p5205_p0, %p5202_p13 }
0x1caa   :  { %5210 = shalt.err (!%p5207_p1)
}
0x1cab   :  { %3917 = dma.vmem_to_hbm [thread:$0]  %s3915_s8, 64, %s5848_s3, [#allocation4]  }
0x1cac   :  { %5213 = dma.done.wait [#allocation4], 64  }
0x1cad   :  { %5214 = vsyncadd [#allocation4], 4294967232 }
0x1cae   :  { %3921 = vsyncpa [#allocation3], 1 }
0x1caf   :  { %3922 = vsyncpa [#allocation4], 1 }

</bundles_post_ra>
